<compile_context>
chip_gen: v7x
topology: tpu7x:2x2x1
jax: 0.10.0
libtpu: 0.0.40
codegen_flags: <defaults>
</compile_context>

<pallas_src>
import functools
import math

import jax
import jax.numpy as jnp
from jax.experimental import pallas as pl
from jax.experimental.pallas import tpu as pltpu


_VMEM_BLOCK_BUDGET = 12 * 1024 * 1024   # per-grid-step working-set target (bytes)
_VMEM_LIMIT_BYTES = 64 * 1024 * 1024    # scoped-VMEM cap; safe on v5e/v6e/v7x


def _ceil_to(v, m):
    return ((v + m - 1) // m) * m


def _row_vmem_bytes(seq, d, heads, dim_head, out_bytes):
    """Approx VMEM footprint (bytes) of one attention row (one element of the
    flattened (rows, seq, d) problem), including (8,128) sublane/lane padding
    and double-buffered input/output blocks."""
    inner = heads * dim_head
    sp = _ceil_to(seq, 8)
    d_p = _ceil_to(d, 128)
    inner_p = _ceil_to(inner, 128)
    dh_p = _ceil_to(dim_head, 128)
    seq_lp = _ceil_to(seq, 128)
    total = 0
    total += 2 * sp * d_p * 4               # f32 input block (double-buffered)
    total += 2 * sp * inner_p * out_bytes   # output block (double-buffered)
    total += sp * d_p * 2                   # bf16 x copy
    total += sp * 3 * inner_p * 4           # fused QKV f32 matmul result
    total += 3 * heads * sp * dh_p * 2      # head-batched bf16 q/k/v
    total += 2 * heads * sp * seq_lp * 4    # scores + exp (f32)
    total += 2 * heads * sp * dh_p * 4      # PV accum + normalized out (f32)
    total += sp * inner_p * 4               # merged heads before final cast
    return total


def _choose_rows(total_rows, row_bytes):
    """Rows per grid step: as many as fit the VMEM budget, but keep >= 2 grid
    steps whenever the problem allows it (megacore / v7x 2-TC sharding)."""
    cap = max(1, _VMEM_BLOCK_BUDGET // max(1, row_bytes))
    rows = max(1, min(total_rows, cap))
    if total_rows >= 2:
        rows = min(rows, pl.cdiv(total_rows, 2))
    return rows


def _mha_core(x, w, *, heads, dim_head, scale):
    """x: (BB, N, D) float, w: (D, 3*inner) bf16 -> (BB, N, inner) f32.
    Columns of w are [q | k | v], each head-major (h, dh) — PyTorch layout."""
    BB, N, D = x.shape
    H, Dh = heads, dim_head
    inner = H * Dh

    # In-kernel cast to bf16 MXU inputs (fused with the load).
    x2 = x.reshape(BB * N, D).astype(jnp.bfloat16)

    # One wide fused QKV matmul (bf16 in, f32 accumulation).
    qkv = jnp.dot(x2, w, preferred_element_type=jnp.float32)   # (BB*N, 3*inner)

    def head_batch(z2):
        # (BB*N, inner) f32 -> (BB*H, N, Dh) bf16 via a single transpose.
        z = z2.astype(jnp.bfloat16).reshape(BB, N, H, Dh)
        return jnp.swapaxes(z, 1, 2).reshape(BB * H, N, Dh)

    qh = head_batch(qkv[:, :inner] * scale)        # fold softmax scale into q
    kh = head_batch(qkv[:, inner:2 * inner])
    vh = head_batch(qkv[:, 2 * inner:])

    # Head-batched scaled dot-product attention, f32 softmax statistics.
    dots = jnp.einsum('bnd,bmd->bnm', qh, kh,
                      preferred_element_type=jnp.float32)       # (BB*H, N, N)
    m = jnp.max(dots, axis=-1, keepdims=True)
    e = jnp.exp(dots - m)
    l = jnp.sum(e, axis=-1, keepdims=True)
    o = jnp.einsum('bnm,bmd->bnd', e.astype(jnp.bfloat16), vh,
                   preferred_element_type=jnp.float32)          # (BB*H, N, Dh)
    # Deferred normalization: scale the (N, Dh) output, not the (N, N) probs.
    o = o * pl.reciprocal(l, approx=True)

    # Merge heads into a lane-dense (BB, N, inner) tensor: single transpose.
    return jnp.swapaxes(o.reshape(BB, H, N, Dh), 1, 2).reshape(BB, N, inner)


def _space_kernel(x_ref, w_ref, o_ref, *, heads, dim_head, scale):
    out = _mha_core(x_ref[...], w_ref[...],
                    heads=heads, dim_head=dim_head, scale=scale)
    o_ref[...] = out.astype(o_ref.dtype)


def _time_kernel(x_ref, w_ref, o_ref, *, heads, dim_head, scale):
    # x_ref: (bb, t, n, d); attention runs over t for every (batch, spatial).
    bb, t, n, d = x_ref.shape
    inner = heads * dim_head
    # (bb, t, n, d) -> (bb, n, t, d) in-register; no scratch, no masked stores.
    x = jnp.swapaxes(x_ref[...], 1, 2).reshape(bb * n, t, d)
    out = _mha_core(x, w_ref[...], heads=heads, dim_head=dim_head, scale=scale)
    out = out.reshape(bb, n, t, inner)
    o_ref[...] = jnp.swapaxes(out, 1, 2).astype(o_ref.dtype)


def _attention_space(x, w, heads, dim_head, out_dtype):
    b, t, n, d = x.shape
    inner = heads * dim_head
    B = b * t
    xf = x.reshape(B, n, d)                          # metadata-only reshape

    row_bytes = _row_vmem_bytes(n, d, heads, dim_head,
                                jnp.dtype(out_dtype).itemsize)
    bt = _choose_rows(B, row_bytes)
    kernel = functools.partial(_space_kernel, heads=heads, dim_head=dim_head,
                               scale=dim_head ** (-0.5))
    out = pl.pallas_call(
        kernel,
        out_shape=jax.ShapeDtypeStruct((B, n, inner), out_dtype),
        grid_spec=pltpu.PrefetchScalarGridSpec(
            num_scalar_prefetch=0,
            grid=(pl.cdiv(B, bt),),                  # cdiv grid; tail is padded
            in_specs=[
                pl.BlockSpec((bt, n, d), lambda i: (i, 0, 0)),
                pl.BlockSpec((d, 3 * inner), lambda i: (0, 0)),
            ],
            out_specs=pl.BlockSpec((bt, n, inner), lambda i: (i, 0, 0)),
        ),
        compiler_params=pltpu.CompilerParams(
            dimension_semantics=("parallel",),
            vmem_limit_bytes=_VMEM_LIMIT_BYTES),
    )(xf, w)
    return out.reshape(b, t, n, inner)


def _attention_time(x, w, heads, dim_head, out_dtype):
    b, t, n, d = x.shape
    inner = heads * dim_head

    per_b = n * _row_vmem_bytes(t, d, heads, dim_head,
                                jnp.dtype(out_dtype).itemsize)
    bb = _choose_rows(b, per_b)
    kernel = functools.partial(_time_kernel, heads=heads, dim_head=dim_head,
                               scale=dim_head ** (-0.5))
    return pl.pallas_call(
        kernel,
        out_shape=jax.ShapeDtypeStruct((b, t, n, inner), out_dtype),
        grid_spec=pltpu.PrefetchScalarGridSpec(
            num_scalar_prefetch=0,
            grid=(pl.cdiv(b, bb),),
            in_specs=[
                pl.BlockSpec((bb, t, n, d), lambda i: (i, 0, 0, 0)),
                pl.BlockSpec((d, 3 * inner), lambda i: (0, 0)),
            ],
            out_specs=pl.BlockSpec((bb, t, n, inner), lambda i: (i, 0, 0, 0)),
        ),
        compiler_params=pltpu.CompilerParams(
            dimension_semantics=("parallel",),
            vmem_limit_bytes=_VMEM_LIMIT_BYTES),
    )(x, w)


def attention_forward(x, w_qkv, *, heads, dim_head, attn_type,
                      out_dtype=jnp.float32):
    """x: (b, t, n, d) f32; w_qkv: (d, 3*heads*dim_head) so qkv = x @ w_qkv.
    Returns (b, t, n, heads*dim_head) in `out_dtype` (the module has no output
    projection).  Use out_dtype=jnp.bfloat16 when the consumer allows it —
    halves the dominant HBM stream (inner >> d)."""
    assert attn_type in ("space", "time")
    # Weight stays in its natural (d, 3*inner) layout: q/k/v are contiguous,
    # lane-aligned column blocks selected in-kernel (no per-plane transpose).
    w = w_qkv.astype(jnp.bfloat16)
    x = x.astype(jnp.float32)   # f32 in HBM; bf16 cast is fused into the kernel
    if attn_type == "space":
        return _attention_space(x, w, heads, dim_head, out_dtype)
    return _attention_time(x, w, heads, dim_head, out_dtype)


def attention_reference(x, w_qkv, *, heads, dim_head, attn_type):
    """Pure-JAX f32 reference mirroring the PyTorch forward, for verification."""
    b, t, n, d = x.shape
    inner = heads * dim_head
    scale = dim_head ** (-0.5)

    if attn_type == "space":
        xf = x.reshape(b * t, n, d)
    else:
        xf = jnp.transpose(x, (0, 2, 1, 3)).reshape(b * n, t, d)

    qkv = jnp.einsum("bnd,de->bne", xf, w_qkv)
    q, k, v = jnp.split(qkv, 3, axis=-1)

    def split_heads(z):
        B, N, _ = z.shape
        return jnp.transpose(z.reshape(B, N, heads, dim_head), (0, 2, 1, 3))

    q, k, v = map(split_heads, (q, k, v))
    dots = jnp.einsum("bhid,bhjd->bhij", q, k) * scale
    attn = jax.nn.softmax(dots, axis=-1)
    out = jnp.einsum("bhij,bhjd->bhid", attn, v)
    out = jnp.transpose(out, (0, 2, 1, 3)).reshape(out.shape[0], out.shape[2], inner)

    if attn_type == "space":
        return out.reshape(b, t, n, inner)
    out = out.reshape(b, n, t, inner)
    return jnp.transpose(out, (0, 2, 1, 3))


if __name__ == "__main__":
    # Small, deterministic problem consistent with the module's forward:
    #   x: (b, t, n, d) = (2, 8, 8, 32); heads=4, dim_head=128 -> inner_dim=512
    b, t, n, d = 2, 8, 8, 32
    heads, dim_head = 4, 128
    inner = heads * dim_head

    key = jax.random.PRNGKey(0)
    kx, kw = jax.random.split(key)
    x = jax.random.normal(kx, (b, t, n, d), dtype=jnp.float32)

    # nn.Linear(dim, 3*inner, bias=False): weight (3*inner, d); pass it
    # transposed so that qkv = x @ w_qkv, matching the module's to_qkv.
    bound = 1.0 / math.sqrt(d)
    w_torch_layout = jax.random.uniform(
        kw, (3 * inner, d), dtype=jnp.float32, minval=-bound, maxval=bound)
    w_qkv = w_torch_layout.T  # (d, 3*inner)

    ok = True
    for attn_type in ("space", "time"):
        out = attention_forward(x, w_qkv, heads=heads, dim_head=dim_head,
                                attn_type=attn_type)
        out = jax.block_until_ready(out)
        ref = attention_reference(x, w_qkv, heads=heads, dim_head=dim_head,
                                  attn_type=attn_type)
        assert out.shape == (b, t, n, inner), out.shape
        # bf16 MXU inputs + approx reciprocal -> compare with a loose tolerance.
        if not jnp.allclose(out, ref, atol=5e-2, rtol=5e-2):
            ok = False
            print(f"{attn_type}: MISMATCH max abs err = "
                  f"{float(jnp.max(jnp.abs(out - ref))):.4e}")

    if ok:
        print("KERNEL_OK")
</pallas_src>

<mosaic_0001>
module attributes {stable_mosaic.version = 11 : i64} {
  func.func @_space_kernel(%arg0: i32, %arg1: memref<8x8x32xf32, #tpu.memory_space<vmem>>, %arg2: memref<32x1536xbf16, #tpu.memory_space<vmem>>, %arg3: memref<8x8x512xf32, #tpu.memory_space<vmem>>) attributes {dimension_semantics = [#tpu.dimension_semantics<parallel>], iteration_bounds = array<i64: 2>, scalar_prefetch = 0 : i64, scratch_operands = 0 : i64, tpu.core_type = #tpu.core_type<tc>, window_params = [{transform_indices = @transform_0, window_bounds = array<i64: 8, 8, 32>}, {pipeline_mode = #tpu.pipeline_mode<synchronous>, transform_indices = @transform_1, window_bounds = array<i64: 32, 1536>}, {transform_indices = @transform_2, window_bounds = array<i64: 8, 8, 512>}]} {
    %c0 = arith.constant 0 : index
    %c0_0 = arith.constant 0 : index
    %c0_1 = arith.constant 0 : index
    %0 = vector.load %arg1[%c0, %c0_0, %c0_1] : memref<8x8x32xf32, #tpu.memory_space<vmem>>, vector<8x8x32xf32>
    %c0_2 = arith.constant 0 : index
    %c0_3 = arith.constant 0 : index
    %1 = vector.load %arg2[%c0_2, %c0_3] : memref<32x1536xbf16, #tpu.memory_space<vmem>>, vector<32x1536xbf16>
    %2 = vector.shape_cast %0 : vector<8x8x32xf32> to vector<64x32xf32>
    %3 = arith.truncf %2 : vector<64x32xf32> to vector<64x32xbf16>
    %cst = arith.constant dense<0.000000e+00> : vector<64x1536xf32>
    %4 = tpu.matmul %3, %1, %cst {dimension_numbers = #tpu.dot_dimension_numbers<[1], [0], [0], [1], [0, 0, 1, 1], [], []>} : vector<64x32xbf16>, vector<32x1536xbf16>, vector<64x1536xf32> -> vector<64x1536xf32>
    %5 = vector.extract_strided_slice %4 {offsets = [0, 0], sizes = [64, 512], strides = [1, 1]} : vector<64x1536xf32> to vector<64x512xf32>
    %cst_4 = arith.constant 0.0883883461 : f32
    %6 = vector.broadcast %cst_4 : f32 to vector<64x512xf32>
    %7 = arith.mulf %5, %6 : vector<64x512xf32>
    %8 = arith.truncf %7 : vector<64x512xf32> to vector<64x512xbf16>
    %9 = vector.shape_cast %8 : vector<64x512xbf16> to vector<8x8x4x128xbf16>
    %10 = tpu.transpose %9, [0, 2, 1, 3] : vector<8x8x4x128xbf16> -> vector<8x4x8x128xbf16>
    %11 = vector.shape_cast %10 : vector<8x4x8x128xbf16> to vector<32x8x128xbf16>
    %12 = vector.extract_strided_slice %4 {offsets = [0, 512], sizes = [64, 512], strides = [1, 1]} : vector<64x1536xf32> to vector<64x512xf32>
    %13 = arith.truncf %12 : vector<64x512xf32> to vector<64x512xbf16>
    %14 = vector.shape_cast %13 : vector<64x512xbf16> to vector<8x8x4x128xbf16>
    %15 = tpu.transpose %14, [0, 2, 1, 3] : vector<8x8x4x128xbf16> -> vector<8x4x8x128xbf16>
    %16 = vector.shape_cast %15 : vector<8x4x8x128xbf16> to vector<32x8x128xbf16>
    %17 = vector.extract_strided_slice %4 {offsets = [0, 1024], sizes = [64, 512], strides = [1, 1]} : vector<64x1536xf32> to vector<64x512xf32>
    %18 = arith.truncf %17 : vector<64x512xf32> to vector<64x512xbf16>
    %19 = vector.shape_cast %18 : vector<64x512xbf16> to vector<8x8x4x128xbf16>
    %20 = tpu.transpose %19, [0, 2, 1, 3] : vector<8x8x4x128xbf16> -> vector<8x4x8x128xbf16>
    %21 = vector.shape_cast %20 : vector<8x4x8x128xbf16> to vector<32x8x128xbf16>
    "tpu.trace_start"() <{level = 10 : i32, message = "bnd,bmd->bnm"}> : () -> ()
    %cst_5 = arith.constant dense<0.000000e+00> : vector<32x8x8xf32>
    %22 = tpu.matmul %11, %16, %cst_5 {dimension_numbers = #tpu.dot_dimension_numbers<[2], [2], [1], [1], [0, 0, 0, 1, 1, 1], [0], [0]>} : vector<32x8x128xbf16>, vector<32x8x128xbf16>, vector<32x8x8xf32> -> vector<32x8x8xf32>
    "tpu.trace_stop"() : () -> ()
    %cst_6 = arith.constant dense<0xFF800000> : vector<32x8xf32>
    %23 = vector.multi_reduction <maximumf>, %22, %cst_6 [2] : vector<32x8x8xf32> to vector<32x8xf32>
    %24 = vector.shape_cast %23 : vector<32x8xf32> to vector<32x8x1xf32>
    %25 = vector.broadcast %24 : vector<32x8x1xf32> to vector<32x8x8xf32>
    %26 = arith.subf %22, %25 : vector<32x8x8xf32>
    %27 = math.exp %26 : vector<32x8x8xf32>
    %cst_7 = arith.constant dense<0.000000e+00> : vector<32x8xf32>
    %28 = vector.multi_reduction <add>, %27, %cst_7 [2] : vector<32x8x8xf32> to vector<32x8xf32>
    %29 = vector.shape_cast %28 : vector<32x8xf32> to vector<32x8x1xf32>
    %30 = arith.truncf %27 : vector<32x8x8xf32> to vector<32x8x8xbf16>
    "tpu.trace_start"() <{level = 10 : i32, message = "bnm,bmd->bnd"}> : () -> ()
    %cst_8 = arith.constant dense<0.000000e+00> : vector<32x8x128xf32>
    %31 = tpu.matmul %30, %21, %cst_8 {dimension_numbers = #tpu.dot_dimension_numbers<[2], [1], [1], [2], [0, 0, 0, 1, 1, 2], [0], [0]>} : vector<32x8x8xbf16>, vector<32x8x128xbf16>, vector<32x8x128xf32> -> vector<32x8x128xf32>
    "tpu.trace_stop"() : () -> ()
    %32 = tpu.reciprocal %29 {approx = true} : vector<32x8x1xf32> -> vector<32x8x1xf32>
    %33 = vector.broadcast %32 : vector<32x8x1xf32> to vector<32x8x128xf32>
    %34 = arith.mulf %31, %33 : vector<32x8x128xf32>
    %35 = vector.shape_cast %34 : vector<32x8x128xf32> to vector<8x4x8x128xf32>
    %36 = tpu.transpose %35, [0, 2, 1, 3] : vector<8x4x8x128xf32> -> vector<8x8x4x128xf32>
    %37 = vector.shape_cast %36 : vector<8x8x4x128xf32> to vector<8x8x512xf32>
    %c0_9 = arith.constant 0 : index
    %c0_10 = arith.constant 0 : index
    %c0_11 = arith.constant 0 : index
    %38 = vector.load %arg3[%c0_9, %c0_10, %c0_11] : memref<8x8x512xf32, #tpu.memory_space<vmem>>, vector<8x8x512xf32>
    tpu.vector_store %arg3[%c0_9, %c0_10, %c0_11], %37 {strides = array<i32>} : memref<8x8x512xf32, #tpu.memory_space<vmem>>, vector<8x8x512xf32>,
    return
  }
  func.func @transform_0(%arg0: i32) -> (i32, i32, i32) {
    %c0_i32 = arith.constant 0 : i32
    %c0_i32_0 = arith.constant 0 : i32
    %c0_i32_1 = arith.constant 0 : i32
    return %arg0, %c0_i32, %c0_i32_0 : i32, i32, i32
  }
  func.func @transform_1(%arg0: i32) -> (i32, i32) {
    %c0_i32 = arith.constant 0 : i32
    %c0_i32_0 = arith.constant 0 : i32
    %c0_i32_1 = arith.constant 0 : i32
    return %c0_i32, %c0_i32_0 : i32, i32
  }
  func.func @transform_2(%arg0: i32) -> (i32, i32, i32) {
    %c0_i32 = arith.constant 0 : i32
    %c0_i32_0 = arith.constant 0 : i32
    %c0_i32_1 = arith.constant 0 : i32
    return %arg0, %c0_i32, %c0_i32_0 : i32, i32, i32
  }
}

</mosaic_0001>

<bundles_post_ra>
// kernel: tpu_custom_call.1
= control target key start
LH: loop header
LB: loop body
LE: loop exit
PB: predicated region body
PF: predicated region fallthrough
CT: control target
= control target key end

     0   :  { %7 = vsyncpa [#allocation3], 0  ;;  %s12236_s0 = inlined_call_operand.hbm [shape: f32[16,8,32], index: 0, kind: input, shape index: {}]   ;;  %s12237_s1 = inlined_call_operand.hbm [shape: bf16[32,1536], index: 1, kind: input, shape index: {}]   ;;  %s12238_s2 = inlined_call_operand.hbm [shape: f32[16,8,512], index: 2, kind: output, shape index: {}]  }
   0x1   :  { %9 = vsyncpa [#allocation3 + $0x1], 0 }
   0x2   :  { %10 = vsyncpa [#allocation6], 0 }
   0x3   :  { %11 = vsyncpa [#allocation4], 0 }
   0x4   :  { %13 = vsyncpa [#allocation4 + $0x1], 0  ;;  %s9624_s9 = smov 0   ;;  %s9626_s10 = smov 0  }
   0x5   :  { %s9628_s11 = smov 0   ;;  %s9630_s12 = smov 0  }
   0x6 LB: > { %s9645_s13 = sadd.s32 4294967295, %s9593_s12   ;;  %s8557_s14 = sadd.s32 4294967294, %s9593_s12   ;;  %s9593_s12 = sphi %s9630_s12, %s12490_s12   ;;  %s9589_s11 = sphi %s9628_s11, %s12489_s11   ;;  %s9585_s10 = sphi %s9626_s10, %s12488_s10   ;;  %s9581_s9 = sphi %s9624_s9, %s12487_s9  }
   0x7   : > { %p39_p0 = scmp.ne.s32.totalorder %s9585_s10, %s9581_s9  ;;  %p12239_p1 = scmp.eq.s32.totalorder %s9645_s13, 0 }
   0x8   : > { %p90_p3 = scmp.eq.s32.totalorder %s8557_s14, 1  ;;  %p8558_p5 = scmp.ge.s32.totalorder %s9593_s12, 1 }
   0x9   : > { %p9654_p4 = por %p12239_p1, %p39_p0  ;;  %p97_p7 = scmp.lt.s32.totalorder %s9593_s12, 3 }
   0xa   : > { %p9659_p6 = por %p90_p3, %p39_p0  ;;  %s9595_s18 = smov [#allocation5]  }
   0xb   : > { %s12295_s15 = scalar_select %p9654_p4, 1, 0 }
   0xc   : > { %s12296_s16 = scalar_select %p9659_p6, 1, 0 }
   0xd   : > { %p9664_p8 = pnand %p8558_p5, %p97_p7  ;;  %s109_s19 = sshll.u32 %s9595_s18, 4  ;;  %s9668_s19 = int_to_ptr.vmem [resolvable:$true] %s109_s19 }
   0xe   : > { %s9680_s21 = sadd.s32 1, %s9593_s12   ;;  %s26_s22 = sadd.s32 1, %s9589_s11 }
   0xf   : > { %s12297_s17 = scalar_select %p9664_p8, 1, 0 }
  0x10   : > { %p9241_p9 = pneg %p9664_p8  ;;  %s23_s23 = ssub.s32 %s9593_s12, %s9680_s21 }
  0x11   : > { %s9465_s26 = scalar_lea.hbm %s12237_s1, 3072 }
  0x12   : > { %p9675_p11 = pnand %p9241_p9, %p12239_p1  ;;  %p9466_p12 = scmp.ne.s32.totalorder %s12237_s1, %s9465_s26 }
  0x13   : > { %p9472_p5 = scmp.lt.u32.totalorder %s9465_s26, %s12237_s1 }
  0x14   : > { %p9467_p13 = pneg %p9675_p11 }
  0x16   : > { %p9468_p0 = pnand %p9467_p13, %p9466_p12 }
  0x18   : > { %p9469_p3 = pneg %p9468_p0 }
  0x1a   : > { %p9474_p7 = pnand %p9472_p5, %p9469_p3 }
  0x1c   : > { %9477 = shalt.err (!%p9474_p7)
}
  0x1d   : > { %s9478_s3 = scalar_lea.vmem %s9668_s19, 3072  ;;  %p9486_p2 = scmp.lt.s32.totalorder %s9668_s19, %s9668_s19 }
  0x1e   : > { %p9479_p9 = scmp.ne.s32.totalorder %s9668_s19, %s9478_s3  ;;  %p9487_p6 = scmp.lt.s32.totalorder %s9478_s3, %s9478_s3 }
  0x20   : > { %p9481_p10 = pnand %p9479_p9, %p9467_p13  ;;  %p9488_p4 = por %p9487_p6, %p9486_p2 }
  0x22   : > { %p9482_p1 = pneg %p9481_p10 }
  0x24   : > { %p9489_p8 = pnand %p9488_p4, %p9482_p1 }
  0x26   : > { %9492 = shalt.err (!%p9489_p8)
}
  0x27   : > { %s9596_s4 = smov 768   ;;  %s9597_s5 = smov 48  }
  0x28   : > { %9244 = dma.hbm_to_vmem [thread:$0]  (!%p9675_p11), %s12237_s1, 3072, %s9668_s19, [#allocation6], %s9596_s4, %s9596_s4, %s9597_s5  }
  0x29   : > { %p24_p2 = scmp.eq.s32.totalorder %s23_s23, 0  ;;  %p33_p1 = scmp.ne.s32.totalorder %s9589_s11, %s9585_s10 }
  0x2a   : > { %p34_p4 = scmp.eq.s32.totalorder %s9593_s12, 0  ;;  %p9254_p6 = scmp.lt.s32.totalorder %s9593_s12, 2 }
  0x2b   : > { %s9711_s8 = scalar_select %p24_p2, %s9589_s11, %s26_s22  }
  0x2c   : > { %p35_p8 = por %p34_p4, %p33_p1  ;;  %p12299_p10 = scmp.eq.s32.totalorder %s9645_s13, 1 }
  0x2d   : > { %s123_s18 = sand.u32 1, %s9589_s11   ;;  %s8718_s24 = sshll.u32 %s9593_s12, 10 }
  0x2e   : > { %p9715_p12 = por %p12299_p10, %p33_p1  ;;  %s8561_s25 = sshll.u32 %s123_s18, 6 }
  0x2f   : > { %s9724_s27 = scalar_lea.hbm %s12236_s0, %s8718_s24  ;;  %s127_s19 = scalar_lea.vmem [#allocation2], %s8561_s25 }
  0x30   : > { %s134_s22 = sshll.u32 %s127_s19, 4  ;;  %p9726_p11 = pnand %p9254_p6, %p35_p8  ;;  %s9730_s22 = int_to_ptr.vmem [resolvable:$true] %s134_s22 }
  0x31   : > { %s9732_s28 = scalar_lea.sflag [#allocation3], %s123_s18  ;;  %s9493_s29 = scalar_lea.hbm %s9724_s27, 1024 }
  0x32   : > { %p9494_p13 = scmp.ne.s32.totalorder %s9724_s27, %s9493_s29  ;;  %p9495_p0 = pneg %p9726_p11 }
  0x33   : > { %s9498_s4 = scalar_lea.hbm %s12236_s0, 2048  ;;  %p9499_p7 = scmp.lt.u32.totalorder %s9724_s27, %s12236_s0 }
  0x34   : > { %p9496_p3 = pnand %p9495_p0, %p9494_p13  ;;  %p9500_p9 = scmp.lt.u32.totalorder %s9498_s4, %s9493_s29 }
  0x35   : > { %p9502_p1 = scmp.lt.u32.totalorder %s9493_s29, %s9724_s27 }
  0x36   : > { %p9497_p5 = pneg %p9496_p3  ;;  %p9501_p2 = por %p9500_p9, %p9499_p7 }
  0x38   : > { %p9503_p4 = por %p9502_p1, %p9501_p2 }
  0x3a   : > { %p9504_p6 = pnand %p9503_p4, %p9497_p5 }
  0x3c   : > { %9507 = shalt.err (!%p9504_p6)
}
  0x3d   : > { %s9508_s7 = scalar_lea.vmem %s9730_s22, 1024  ;;  %s9598_s18 = smov [#allocation2]  }
  0x3e   : > { %p9509_p8 = scmp.ne.s32.totalorder %s9730_s22, %s9508_s7  ;;  %s9513_s24 = sshll.u32 %s9598_s18, 4  ;;  %s9514_s24 = int_to_ptr.vmem [resolvable:$false] %s9513_s24 }
  0x3f   : > { %s9515_s25 = scalar_lea.vmem %s9514_s24, 2048  ;;  %p9516_p3 = scmp.lt.s32.totalorder %s9730_s22, %s9514_s24 }
  0x40   : > { %p9511_p10 = pnand %p9509_p8, %p9495_p0  ;;  %p9517_p7 = scmp.lt.s32.totalorder %s9515_s25, %s9508_s7 }
  0x42   : > { %p9512_p13 = pneg %p9511_p10  ;;  %p9518_p9 = por %p9517_p7, %p9516_p3 }
  0x44   : > { %p9519_p2 = pnand %p9518_p9, %p9512_p13 }
  0x46   : > { %9522 = shalt.err (!%p9519_p2)
}
  0x47   : > { %s9599_s20 = smov 128   ;;  %s9600_s26 = smov 8  }
  0x48   : > { %9248 = dma.hbm_to_vmem [thread:$0]  (!%p9726_p11), %s9724_s27, 1024, %s9730_s22, %s9732_s28, %s9599_s20, %s9599_s20, %s9600_s26  }
  0x49   : > { %p12302_p0 = scmp.ne.s32.totalorder %s12297_s17, 0 }
  0x4b   : > { %146 = sbr.rel (%p12302_p0) target bundleno = 1155 (0x483), region = 28 }
  0x52   : > { %s9763_s19 = sand.u32 1, %s9585_s10   ;;  %p12303_p5 = scmp.ne.s32.totalorder %s12295_s15, 0 }
  0x53   : > { %s8565_s29 = sshll.u32 %s9763_s19, 6  ;;  %s149_s30 = scalar_lea.sflag [#allocation3], %s9763_s19 }
  0x54   : > { %s9767_s3 = scalar_lea.vmem [#allocation2], %s8565_s29 }
  0x55   : > { %9568 = dma.done.wait (%p12303_p5), %s149_s30, 1024  }
  0x56   : > { %9570 = vsyncadd (%p12303_p5), %s149_s30, 4294966272  ;;  %p12304_p11 = scmp.eq.s32.totalorder %s9645_s13, 0 }
  0x58   : > { %9572 = dma.done.wait (%p12304_p11), [#allocation6], 3072   ;;  %p12305_p1 = pmov %p12304_p11 }
  0x59   : > { %v12244_v0 = vmov 0   ;;  %v9301_v1 = vld [vmem:[#allocation5 + $0x4] ss:$48 sps:$4 sm:$0xff]   ;;  %v9303_v2 = vld [vmem:[#allocation5 + $0xc] ss:$48 sps:$4 sm:$0xff]   ;;  %vm336_vm0 = vcmask 261120   ;;  %v909_v38 = vlaneseq }
  0x5a   : > { %9574 = vsyncadd (%p12305_p1), [#allocation6], 4294964224  ;;  %381 = vmatprep.mubr.bf16.mxu0 %v12244_v0  ;;  %454 = vmatprep.mubr.bf16.mxu1 %v12244_v0  ;;  %v9305_v3 = vld [vmem:[#allocation5] ss:$48 sps:$4 sm:$0xff]   ;;  %v9306_v4 = vld [vmem:[#allocation5 + $0x8] ss:$48 sps:$4 sm:$0xff]  }
  0x5b   : > { %349 = vmatprep.subr.bf16.mxu0 %v9301_v1  ;;  %422 = vmatprep.subr.bf16.mxu1 %v9303_v2  ;;  %v9307_v5 = vld [vmem:[#allocation5 + $0x64] ss:$48 sps:$4 sm:$0xff]   ;;  %v9309_v6 = vld [vmem:[#allocation5 + $0x6c] ss:$48 sps:$4 sm:$0xff]   ;;  %v9311_v7 = vld [vmem:[#allocation5 + $0x60] ss:$48 sps:$4 sm:$0xff]   ;;  %v9849_v2 = vpack.i.b16 %v12244_v0, %v12244_v0 }
  0x5c   : > { %350 = vmatpush1.bf16.msra.mxu0 %v9305_v3  ;;  %423 = vmatpush1.bf16.msra.mxu1 %v9306_v4  ;;  %v9312_v8 = vld [vmem:[#allocation5 + $0x68] ss:$48 sps:$4 sm:$0xff]   ;;  %v180_v9 = vld [vmem:[%s9767_s3] sm:$0xff]  ;;  %v182_v14 = vld [vmem:[%s9767_s3 + $0x10] sm:$0xff]  ;;  %v12242_v37 = vmov 0.0   ;;  %vm9603_vm1 = vmmov 0  }
  0x5d   : > { %351 = vmatprep.subr.bf16.mxu0 %v9307_v5  ;;  %v181_v10 = vld [vmem:[%s9767_s3 + $0x8] sm:$0xff]  ;;  %424 = vmatprep.subr.bf16.mxu1 %v9309_v6  ;;  %v9313_v12 = vld [vmem:[#allocation5 + $0x10] ss:$48 sps:$4 sm:$0xff]   ;;  %v9315_v13 = vld [vmem:[#allocation5 + $0x14] ss:$48 sps:$4 sm:$0xff]   ;;  %v910_v46 = vshrl.u32 %v909_v38, 7 }
  0x5e   : > { %v9781_v11 = vpack.c.bf16 %v181_v10, %v180_v9  ;;  %v9316_v15 = vld [vmem:[#allocation5 + $0x18] ss:$48 sps:$4 sm:$0xff]   ;;  %v9318_v16 = vld [vmem:[#allocation5 + $0x1c] ss:$48 sps:$4 sm:$0xff]   ;;  %v9321_v18 = vld [vmem:[#allocation5 + $0x74] ss:$48 sps:$4 sm:$0xff]  }
  0x5f   : > { %v183_v17 = vld [vmem:[%s9767_s3 + $0x18] sm:$0xff]  ;;  %v9319_v19 = vld [vmem:[#allocation5 + $0x70] ss:$48 sps:$4 sm:$0xff]   ;;  %v185_v24 = vld [vmem:[%s9767_s3 + $0x28] sm:$0xff]  ;;  %v9604_v39 = vmov 1983009808  }
  0x60   : > { %352 = vmatpush1.bf16.msra.mxu0 %v9311_v7  ;;  %425 = vmatpush1.bf16.msra.mxu1 %v9312_v8  ;;  %v9322_v20 = vld [vmem:[#allocation5 + $0x78] ss:$48 sps:$4 sm:$0xff]   ;;  %v9324_v21 = vld [vmem:[#allocation5 + $0x7c] ss:$48 sps:$4 sm:$0xff]   ;;  %v213_v22 = vpack.c.bf16 %v183_v17, %v182_v14  ;;  %v184_v23 = vld [vmem:[%s9767_s3 + $0x20] sm:$0xff]  ;;  %v907_v40 = vunpack.c.l.s4 %v9604_v39  ;;  %vm5805_vm2 = vcmask 1043456  }
  0x61   : > { %495 = vmatprep.subr.bf16.mxu0 %v9315_v13  ;;  %568 = vmatprep.subr.bf16.mxu1 %v9318_v16  ;;  %v214_v25 = vpack.c.bf16 %v185_v24, %v184_v23  ;;  %v186_v26 = vld [vmem:[%s9767_s3 + $0x30] sm:$0xff]  ;;  %v187_v27 = vld [vmem:[%s9767_s3 + $0x38] sm:$0xff]  ;;  %v9605_v47 = vmov 1934713408   ;;  %vm5481_vm3 = vcmask 64512   ;;  %s8567_s15 = sshll.u32 %s9763_s19, 8 }
  0x62   : > { %v215_v28 = vpack.c.bf16 %v187_v27, %v186_v26  ;;  %v9327_v29 = vld [vmem:[#allocation5 + $0x24] ss:$48 sps:$4 sm:$0xff]   ;;  %v9325_v30 = vld [vmem:[#allocation5 + $0x20] ss:$48 sps:$4 sm:$0xff]   ;;  %v9330_v31 = vld [vmem:[#allocation5 + $0x2c] ss:$48 sps:$4 sm:$0xff]   ;;  %v938_v48 = vunpack.c.l.s4 %v9605_v47  ;;  %v908_v53 = vunpack.c.0.s8 %v907_v40 }
  0x63   : > { %8592 = vmatmul.mubr.msk.bf16.vlgmr.msra.gmra.mrb[0].mxu0 %vm336_vm0, %v9781_v11  ;;  %8596 = vmatmul.mubr.msk.bf16.vlgmr.msra.gmra.mrb[0].mxu1 %vm336_vm0, %v9781_v11  ;;  %v9328_v32 = vld [vmem:[#allocation5 + $0x28] ss:$48 sps:$4 sm:$0xff]   ;;  %v9333_v33 = vld [vmem:[#allocation5 + $0x84] ss:$48 sps:$4 sm:$0xff]   ;;  %v9336_v34 = vld [vmem:[#allocation5 + $0x8c] ss:$48 sps:$4 sm:$0xff]  }
  0x64   : > { %391 = vmatprep.mubr.bf16.mxu0 %v12244_v0  ;;  %464 = vmatprep.mubr.bf16.mxu1 %v12244_v0  ;;  %v9331_v35 = vld [vmem:[#allocation5 + $0x80] ss:$48 sps:$4 sm:$0xff]   ;;  %v9334_v36 = vld [vmem:[#allocation5 + $0x88] ss:$48 sps:$4 sm:$0xff]   ;;  %v939_v63 = vunpack.c.0.s8 %v938_v48  ;;  %v9851_v3 = vsub.s32 %v908_v53, %v910_v46  ;;  %s12039_s17 = scalar_lea.vmem [#allocation7], %s8567_s15  ;;  %s8720_s27 = sshll.u32 %s9645_s13, 12 }
  0x65   : > { %496 = vmatpush1.bf16.msra.mxu0 %v9313_v12  ;;  %569 = vmatpush1.bf16.msra.mxu1 %v9316_v15  ;;  %s8474_s22 = sshll.u32 %s12039_s17, 4  ;;  %s12186_s4 = scalar_lea.hbm %s12238_s2, %s8720_s27  ;;  %s12188_s22 = int_to_ptr.vmem [resolvable:$true] %s8474_s22 }
  0x66   : > { %497 = vmatprep.subr.bf16.mxu0 %v9321_v18  ;;  %570 = vmatprep.subr.bf16.mxu1 %v9324_v21  ;;  %12306 = vst [vmem:[#allocation11_spill] sm:$0xff] %v9851_v3  ;;  %v9853_v13 = vsub.s32 %v939_v63, %v910_v46  ;;  %s8460_s13 = scalar_lea.sflag [#allocation4], %s9763_s19  ;;  %s9523_s5 = scalar_lea.vmem %s12188_s22, 4096 }
  0x67   : > { %p9524_p4 = scmp.ne.s32.totalorder %s12188_s22, %s9523_s5  ;;  %s9606_s6 = smov [#allocation7]  }
  0x68   : > { %12307 = vst [vmem:[#allocation12_spill] sm:$0xff] %v9853_v13  ;;  %s9527_s7 = sshll.u32 %s9606_s6, 4  ;;  %s9528_s7 = int_to_ptr.vmem [resolvable:$false] %s9527_s7 }
  0x69   : > { %498 = vmatpush1.bf16.msra.mxu0 %v9319_v19  ;;  %571 = vmatpush1.bf16.msra.mxu1 %v9322_v20  ;;  %p9525_p6 = pnand %p9524_p4, %p9715_p12  ;;  %s9529_s18 = scalar_lea.vmem %s9528_s7, 8192 }
  0x6a   : > { %641 = vmatprep.subr.bf16.mxu0 %v9327_v29  ;;  %714 = vmatprep.subr.bf16.mxu1 %v9330_v31  ;;  %p9530_p10 = scmp.lt.s32.totalorder %s12188_s22, %s9528_s7  ;;  %p9531_p13 = scmp.lt.s32.totalorder %s9529_s18, %s9523_s5 }
  0x6b   : > { %8593 = vmatmul.mubr.msk.bf16.gmra.mrb[4].mxu0 %vm336_vm0, %v213_v22  ;;  %8597 = vmatmul.mubr.msk.bf16.gmra.mrb[4].mxu1 %vm336_vm0, %v213_v22  ;;  %p9526_p8 = pneg %p9525_p6 }
  0x6c   : > { %401 = vmatprep.mubr.bf16.mxu0 %v12244_v0  ;;  %474 = vmatprep.mubr.bf16.mxu1 %v12244_v0  ;;  %p9532_p3 = por %p9531_p13, %p9530_p10 }
  0x6e   : > { %p9533_p7 = pnand %p9532_p3, %p9526_p8 }
  0x73   : > { %8594 = vmatmul.mubr.msk.bf16.gmra.mrb[8].mxu0 %vm336_vm0, %v214_v25  ;;  %8598 = vmatmul.mubr.msk.bf16.gmra.mrb[8].mxu1 %vm336_vm0, %v214_v25 }
  0x74   : > { %411 = vmatprep.mubr.bf16.mxu0 %v12244_v0  ;;  %484 = vmatprep.mubr.bf16.mxu1 %v12244_v0 }
  0x7b   : > { %8595 = vmatmul.mubr.msk.bf16.gmra.mrb[12].mxu0 %vm336_vm0, %v215_v28  ;;  %8599 = vmatmul.mubr.msk.bf16.gmra.mrb[12].mxu1 %vm336_vm0, %v215_v28 }
  0x7c   : > { %527 = vmatprep.mubr.bf16.mxu0 %v12244_v0  ;;  %600 = vmatprep.mubr.bf16.mxu1 %v12244_v0 }
  0x83   : > { %8600 = vmatmul.mubr.msk.bf16.vlgmr.msra.gmra.mrb[16].mxu0 %vm336_vm0, %v9781_v11  ;;  %8604 = vmatmul.mubr.msk.bf16.vlgmr.msra.gmra.mrb[16].mxu1 %vm336_vm0, %v9781_v11 }
  0x84   : > { %537 = vmatprep.mubr.bf16.mxu0 %v12244_v0  ;;  %610 = vmatprep.mubr.bf16.mxu1 %v12244_v0 }
  0x85   : > { %642 = vmatpush1.bf16.msra.mxu0 %v9325_v30  ;;  %715 = vmatpush1.bf16.msra.mxu1 %v9328_v32 }
  0x86   : > { %643 = vmatprep.subr.bf16.mxu0 %v9333_v33  ;;  %716 = vmatprep.subr.bf16.mxu1 %v9336_v34 }
  0x89   : > { %644 = vmatpush1.bf16.msra.mxu0 %v9331_v35  ;;  %717 = vmatpush1.bf16.msra.mxu1 %v9334_v36 }
  0x8a   : > { %8849 = vmatprep.subr.bf16.mxu0 %v12242_v37  ;;  %8855 = vmatprep.subr.bf16.mxu1 %v12242_v37 }
  0x8b   : > { %8601 = vmatmul.mubr.msk.bf16.gmra.mrb[20].mxu0 %vm336_vm0, %v213_v22  ;;  %8605 = vmatmul.mubr.msk.bf16.gmra.mrb[20].mxu1 %vm336_vm0, %v213_v22 }
  0x8c   : > { %547 = vmatprep.mubr.bf16.mxu0 %v12244_v0  ;;  %620 = vmatprep.mubr.bf16.mxu1 %v12244_v0 }
  0x93   : > { %8602 = vmatmul.mubr.msk.bf16.gmra.mrb[24].mxu0 %vm336_vm0, %v214_v25  ;;  %8606 = vmatmul.mubr.msk.bf16.gmra.mrb[24].mxu1 %vm336_vm0, %v214_v25 }
  0x94   : > { %557 = vmatprep.mubr.bf16.mxu0 %v12244_v0  ;;  %630 = vmatprep.mubr.bf16.mxu1 %v12244_v0 }
  0x9b   : > { %8603 = vmatmul.mubr.msk.bf16.gmra.mrb[28].mxu0 %vm336_vm0, %v215_v28  ;;  %8607 = vmatmul.mubr.msk.bf16.gmra.mrb[28].mxu1 %vm336_vm0, %v215_v28 }
  0x9c   : > { %673 = vmatprep.mubr.bf16.mxu0 %v12244_v0  ;;  %746 = vmatprep.mubr.bf16.mxu1 %v12244_v0 }
  0xa3   : > { %8608 = vmatmul.mubr.msk.bf16.vlgmr.msra.gmra.mrb[32].mxu0 %vm336_vm0, %v9781_v11  ;;  %8612 = vmatmul.mubr.msk.bf16.vlgmr.msra.gmra.mrb[32].mxu1 %vm336_vm0, %v9781_v11 }
  0xa4   : > { %683 = vmatprep.mubr.bf16.mxu0 %v12244_v0  ;;  %756 = vmatprep.mubr.bf16.mxu1 %v12244_v0 }
  0xab   : > { %8609 = vmatmul.mubr.msk.bf16.gmra.mrb[36].mxu0 %vm336_vm0, %v213_v22  ;;  %8613 = vmatmul.mubr.msk.bf16.gmra.mrb[36].mxu1 %vm336_vm0, %v213_v22 }
  0xac   : > { %693 = vmatprep.mubr.bf16.mxu0 %v12244_v0  ;;  %766 = vmatprep.mubr.bf16.mxu1 %v12244_v0 }
  0xb3   : > { %8610 = vmatmul.mubr.msk.bf16.gmra.mrb[40].mxu0 %vm336_vm0, %v214_v25  ;;  %8614 = vmatmul.mubr.msk.bf16.gmra.mrb[40].mxu1 %vm336_vm0, %v214_v25 }
  0xb4   : > { %703 = vmatprep.mubr.bf16.mxu0 %v12244_v0  ;;  %776 = vmatprep.mubr.bf16.mxu1 %v12244_v0 }
  0xbb   : > { %8611 = vmatmul.mubr.msk.bf16.gmra.mrb[44].mxu0 %vm336_vm0, %v215_v28  ;;  %8615 = vmatmul.mubr.msk.bf16.gmra.mrb[44].mxu1 %vm336_vm0, %v215_v28 }
  0xbc   : > { %8851 = vmatprep.mubr.msk.bf16.mxu0 %vm9603_vm1, %v12242_v37  ;;  %8857 = vmatprep.mubr.msk.bf16.mxu1 %vm9603_vm1, %v12242_v37 }
 0x136   : > { %v383_v41 = vpop.f32.mrb[0].mxu0  ;;  %v456_v42 = vpop.f32.mrb[0].mxu1 }
 0x137   : > { %v787_v43 = vmul.f32 0.088388346, %v383_v41  ;;  %v385_v44 = vpop.f32.mrb[1].mxu0  ;;  %v458_v45 = vpop.f32.mrb[1].mxu1  ;;  %v789_v49 = vmul.f32 0.088388346, %v456_v42 }
 0x138   : > { %v788_v50 = vmul.f32 0.088388346, %v385_v44  ;;  %v387_v51 = vpop.f32.mrb[2].mxu0  ;;  %v460_v52 = vpop.f32.mrb[2].mxu1  ;;  %v790_v58 = vmul.f32 0.088388346, %v458_v45 }
 0x139   : > { %v791_v54 = vmul.f32 0.088388346, %v387_v51  ;;  %v793_v55 = vmul.f32 0.088388346, %v460_v52  ;;  %v389_v56 = vpop.f32.mrb[3].mxu0  ;;  %v462_v57 = vpop.f32.mrb[3].mxu1 }
 0x13a   : > { %v792_v59 = vmul.f32 0.088388346, %v389_v56  ;;  %v794_v60 = vmul.f32 0.088388346, %v462_v57 }
 0x13b   : > { %v819_v61 = vpack.c.bf16 %v791_v54, %v787_v43  ;;  %v821_v62 = vpack.c.bf16 %v793_v55, %v789_v49 }
 0x13c   : > { %v820_v1 = vpack.c.bf16 %v792_v59, %v788_v50  ;;  %v822_v4 = vpack.c.bf16 %v794_v60, %v790_v58 }
 0x13d   : > { %v839_v5 = vshrl.u32 %v819_v61, 16  ;;  %v847_v6 = vshrl.u32 %v821_v62, 16 }
 0x13e   : > { %v837_v7 = vpack.i.b16 %v820_v1, %v819_v61  ;;  %v840_v8 = vshrl.u32 %v820_v1, 16  ;;  %v845_v9 = vpack.i.b16 %v822_v4, %v821_v62  ;;  %v848_v10 = vshrl.u32 %v822_v4, 16  ;;  %v393_v11 = vpop.f32.mrb[4].mxu0  ;;  %v466_v12 = vpop.f32.mrb[4].mxu1 }
 0x13f   : > { %v795_v14 = vmul.f32 0.088388346, %v393_v11  ;;  %v395_v15 = vpop.f32.mrb[5].mxu0  ;;  %v9855_v16 = vpop.f32.mrb[5].mxu1  ;;  %v797_v25 = vmul.f32 0.088388346, %v466_v12 }
 0x140   : > { %v841_v17 = vpack.i.b16 %v840_v8, %v839_v5  ;;  %v905_v18 = vcombine.high %v837_v7, %v9849_v2  ;;  %v912_v19 = vrot.slane %v837_v7, %v9851_v3  ;;  %v849_v20 = vpack.i.b16 %v848_v10, %v847_v6  ;;  %v397_v21 = vpop.f32.mrb[6].mxu0  ;;  %v470_v22 = vpop.f32.mrb[6].mxu1 }
 0x141   : > { %v920_v23 = vcombine.high %v845_v9, %v9849_v2  ;;  %v927_v24 = vrot.slane %v845_v9, %v9851_v3  ;;  %v796_v26 = vmul.f32 0.088388346, %v395_v15  ;;  %v399_v27 = vpop.f32.mrb[7].mxu0  ;;  %v472_v28 = vpop.f32.mrb[7].mxu1  ;;  %v799_v40 = vmul.f32 0.088388346, %v397_v21 }
 0x142   : > { %v919_v29 = vrot.slane %v905_v18, %v9851_v3  ;;  %v971_v30 = vcombine.high %v841_v17, %v9849_v2  ;;  %v978_v31 = vrot.slane %v841_v17, %v9851_v3  ;;  %v986_v32 = vcombine.high %v849_v20, %v9849_v2 }
 0x143   : > { %v934_v33 = vrot.slane %v920_v23, %v9851_v3  ;;  %v935_v34 = vcombine.low %v912_v19, %v927_v24  ;;  %v936_v35 = vcombine.high %v912_v19, %v927_v24  ;;  %v993_v36 = vrot.slane %v849_v20, %v9851_v3 }
 0x144   : > { %v985_v38 = vrot.slane %v971_v30, %v9851_v3  ;;  %v1000_v39 = vrot.slane %v986_v32, %v9851_v3  ;;  %v801_v41 = vmul.f32 0.088388346, %v470_v22  ;;  %v823_v17 = vpack.c.bf16 %v799_v40, %v795_v14 }
 0x145   : > { %v943_v42 = vrot.slane %v935_v34, %v9853_v13  ;;  %v950_v43 = vrot.slane %v936_v35, %v9853_v13  ;;  %v951_v44 = vcombine.low %v919_v29, %v934_v33  ;;  %v952_v45 = vcombine.high %v919_v29, %v934_v33 }
 0x146   : > { %v1001_v46 = vcombine.low %v978_v31, %v993_v36  ;;  %v1002_v47 = vcombine.high %v978_v31, %v993_v36  ;;  %v1017_v48 = vcombine.low %v985_v38, %v1000_v39  ;;  %v1018_v49 = vcombine.high %v985_v38, %v1000_v39  ;;  %v403_v50 = vpop.f32.mrb[8].mxu0  ;;  %v476_v51 = vpop.f32.mrb[8].mxu1 }
 0x147   : > { %v9872_v52 = vrot.slane %v951_v44, %v9853_v13  ;;  %v9875_v53 = vrot.slane %v952_v45, %v9853_v13  ;;  %v1433_v54 = vcombine.low %v943_v42, %v950_v43  ;;  %v8616_v55 = vcombine.high %v943_v42, %v950_v43  ;;  %v405_v56 = vpop.f32.mrb[9].mxu0  ;;  %v478_v57 = vpop.f32.mrb[9].mxu1 }
 0x148   : > { %v1009_v58 = vrot.slane %v1001_v46, %v9853_v13  ;;  %v1016_v59 = vrot.slane %v1002_v47, %v9853_v13  ;;  %v9880_v60 = vrot.slane %v1017_v48, %v9853_v13  ;;  %v9883_v61 = vrot.slane %v1018_v49, %v9853_v13  ;;  %v407_v62 = vpop.f32.mrb[10].mxu0  ;;  %v480_v63 = vpop.f32.mrb[10].mxu1 }
 0x149   : > { %v9886_v1 = vrot.slane %v1433_v54, %v9851_v3  ;;  %v9889_v4 = vrot.slane %v8616_v55, %v9851_v3  ;;  %v409_v7 = vpop.f32.mrb[11].mxu0  ;;  %v482_v8 = vpop.f32.mrb[11].mxu1  ;;  %v825_v18 = vpack.c.bf16 %v801_v41, %v797_v25  ;;  %v800_v19 = vmul.f32 0.088388346, %v399_v27 }
 0x14a   : > { %v1458_v9 = vcombine.low %v1009_v58, %v1016_v59  ;;  %v8617_v10 = vcombine.high %v1009_v58, %v1016_v59  ;;  %v798_v22 = vmul.f32 0.088388346, %v9855_v16  ;;  %v802_v23 = vmul.f32 0.088388346, %v472_v28 }
 0x14b   : > { %v861_v24 = vshrl.u32 %v823_v17, 16  ;;  %v869_v29 = vshrl.u32 %v825_v18, 16  ;;  %v824_v30 = vpack.c.bf16 %v800_v19, %v796_v26  ;;  %v803_v31 = vmul.f32 0.088388346, %v403_v50 }
 0x14c   : > { %v9902_v20 = vrot.slane %v1458_v9, %v9851_v3  ;;  %v9905_v21 = vrot.slane %v8617_v10, %v9851_v3  ;;  %v826_v32 = vpack.c.bf16 %v802_v23, %v798_v22  ;;  %v805_v33 = vmul.f32 0.088388346, %v476_v51 }
 0x14d   : > { %v804_v34 = vmul.f32 0.088388346, %v405_v56  ;;  %v807_v35 = vmul.f32 0.088388346, %v407_v62  ;;  %v859_v14 = vpack.i.b16 %v824_v30, %v823_v17  ;;  %v862_v25 = vshrl.u32 %v824_v30, 16 }
 0x14e   : > { %v809_v27 = vmul.f32 0.088388346, %v480_v63  ;;  %v808_v36 = vmul.f32 0.088388346, %v409_v7  ;;  %v9908_v38 = vpop.f32.mrb[12].mxu0  ;;  %v867_v39 = vpack.i.b16 %v826_v32, %v825_v18  ;;  %v870_v40 = vshrl.u32 %v826_v32, 16 }
 0x14f   : > { %v9910_v41 = vpack.c.bf16 %v807_v35, %v803_v31  ;;  %v810_v16 = vmul.f32 0.088388346, %v482_v8  ;;  %v9912_v28 = vpop.f32.mrb[12].mxu1  ;;  %v9914_v42 = vpop.f32.mrb[13].mxu0  ;;  %v863_v26 = vpack.i.b16 %v862_v25, %v861_v24  ;;  %v1037_v43 = vcombine.high %v859_v14, %v9849_v2 }
 0x150   : > { %v1044_v44 = vrot.slane %v859_v14, %v9851_v3  ;;  %v9918_v45 = vpack.c.bf16 %v809_v27, %v805_v33  ;;  %v9920_v46 = vpop.f32.mrb[13].mxu1  ;;  %v9922_v47 = vpop.f32.mrb[14].mxu0  ;;  %v871_v48 = vpack.i.b16 %v870_v40, %v869_v29  ;;  %v1052_v49 = vcombine.high %v867_v39, %v9849_v2 }
 0x151   : > { %v1059_v50 = vrot.slane %v867_v39, %v9851_v3  ;;  %v806_v51 = vmul.f32 0.088388346, %v478_v57  ;;  %v9926_v54 = vpop.f32.mrb[14].mxu1  ;;  %v9928_v55 = vpop.f32.mrb[15].mxu0  ;;  %v1051_v56 = vrot.slane %v1037_v43, %v9851_v3  ;;  %v1103_v58 = vcombine.high %v863_v26, %v9849_v2 }
 0x152   : > { %v1110_v59 = vrot.slane %v863_v26, %v9851_v3  ;;  %v877_v62 = vshrl.u32 %v9910_v41, 16  ;;  %v9934_v63 = vpop.f32.mrb[15].mxu1  ;;  %v1066_v7 = vrot.slane %v1052_v49, %v9851_v3  ;;  %v1118_v57 = vcombine.high %v871_v48, %v9849_v2 }
 0x153   : > { %v1067_v8 = vcombine.low %v1044_v44, %v1059_v50  ;;  %v1068_v9 = vcombine.high %v1044_v44, %v1059_v50  ;;  %v1117_v10 = vrot.slane %v1103_v58, %v9851_v3  ;;  %v1125_v17 = vrot.slane %v871_v48, %v9851_v3 }
 0x154   : > { %v828_v18 = vpack.c.bf16 %v808_v36, %v804_v34  ;;  %v830_v19 = vpack.c.bf16 %v810_v16, %v806_v51  ;;  %v1083_v24 = vcombine.low %v1051_v56, %v1066_v7  ;;  %v1084_v29 = vcombine.high %v1051_v56, %v1066_v7 }
 0x155   : > { %v1075_v22 = vrot.slane %v1067_v8, %v9853_v13  ;;  %v1082_v23 = vrot.slane %v1068_v9, %v9853_v13  ;;  %v1132_v32 = vrot.slane %v1118_v57, %v9851_v3  ;;  %v1133_v33 = vcombine.low %v1110_v59, %v1125_v17 }
 0x156   : > { %v9942_v30 = vpop.f32.mrb[16].mxu0  ;;  %v9944_v31 = vpop.f32.mrb[16].mxu1  ;;  %v1134_v35 = vcombine.high %v1110_v59, %v1125_v17  ;;  %v875_v14 = vpack.i.b16 %v828_v18, %v9910_v41  ;;  %v9953_v27 = vrot.slane %v1083_v24, %v9853_v13  ;;  %v9956_v36 = vrot.slane %v1084_v29, %v9853_v13 }
 0x157   : > { %v9948_v25 = vpop.f32.mrb[17].mxu0  ;;  %v9950_v34 = vpop.f32.mrb[17].mxu1  ;;  %v1533_v39 = vcombine.low %v1075_v22, %v1082_v23  ;;  %v8620_v40 = vcombine.high %v1075_v22, %v1082_v23  ;;  %v9963_v43 = vrot.slane %v1133_v33, %v9853_v13  ;;  %v1149_v44 = vcombine.low %v1117_v10, %v1132_v32 }
 0x158   : > { %v9958_v16 = vpop.f32.mrb[18].mxu0  ;;  %v9960_v26 = vpop.f32.mrb[18].mxu1  ;;  %v9966_v41 = vrot.slane %v1134_v35, %v9853_v13  ;;  %v1150_v48 = vcombine.high %v1117_v10, %v1132_v32  ;;  %v885_v59 = vshrl.u32 %v9918_v45, 16  ;;  %v878_v10 = vshrl.u32 %v828_v18, 16 }
 0x159   : > { %v9968_v49 = vpop.f32.mrb[19].mxu0  ;;  %v9970_v50 = vpop.f32.mrb[19].mxu1  ;;  %v9973_v51 = vrot.slane %v1533_v39, %v9851_v3  ;;  %v9981_v7 = vrot.slane %v1149_v44, %v9853_v13  ;;  %v1169_v17 = vcombine.high %v875_v14, %v9849_v2  ;;  %v1176_v22 = vrot.slane %v875_v14, %v9851_v3 }
 0x15a   : > { %v9984_v8 = vrot.slane %v1150_v48, %v9853_v13  ;;  %v883_v23 = vpack.i.b16 %v830_v19, %v9918_v45  ;;  %v9994_v24 = vrot.slane %v8620_v40, %v9851_v3  ;;  %v886_v33 = vshrl.u32 %v830_v19, 16 }
 0x15b   : > { %v879_v35 = vpack.i.b16 %v878_v10, %v877_v62  ;;  %v1183_v39 = vrot.slane %v1169_v17, %v9851_v3  ;;  %v811_v48 = vmul.f32 0.088388346, %v9908_v38  ;;  %v813_v29 = vmul.f32 0.088388346, %v9912_v28 }
 0x15c   : > { %v1184_v18 = vcombine.high %v883_v23, %v9849_v2  ;;  %v1191_v44 = vrot.slane %v883_v23, %v9851_v3  ;;  %v887_v40 = vpack.i.b16 %v886_v33, %v885_v59  ;;  %v812_v58 = vmul.f32 0.088388346, %v9914_v42 }
 0x15d   : > { %v1235_v19 = vcombine.high %v879_v35, %v9849_v2  ;;  %v1242_v62 = vrot.slane %v879_v35, %v9851_v3  ;;  %v815_v28 = vmul.f32 0.088388346, %v9922_v47 }
 0x15e   : > { %v10003_v14 = vpop.f32.mrb[20].mxu0  ;;  %v10005_v45 = vpop.f32.mrb[20].mxu1  ;;  %v1198_v10 = vrot.slane %v1184_v18, %v9851_v3  ;;  %v1199_v17 = vcombine.low %v1176_v22, %v1191_v44  ;;  %v1200_v56 = vcombine.high %v1176_v22, %v1191_v44  ;;  %v1250_v59 = vcombine.high %v887_v40, %v9849_v2 }
 0x15f   : > { %v10013_v32 = vpop.f32.mrb[21].mxu0  ;;  %v10015_v23 = vpop.f32.mrb[21].mxu1  ;;  %v1257_v38 = vrot.slane %v887_v40, %v9851_v3  ;;  %v1249_v35 = vrot.slane %v1235_v19, %v9851_v3  ;;  %v831_v19 = vpack.c.bf16 %v815_v28, %v811_v48  ;;  %v816_v28 = vmul.f32 0.088388346, %v9928_v55 }
 0x160   : > { %v10020_v33 = vpop.f32.mrb[22].mxu0  ;;  %v10022_v42 = vpop.f32.mrb[22].mxu1  ;;  %v1207_v18 = vrot.slane %v1199_v17, %v9853_v13  ;;  %v1215_v57 = vcombine.low %v1183_v39, %v1198_v10  ;;  %v1216_v9 = vcombine.high %v1183_v39, %v1198_v10  ;;  %v1214_v22 = vrot.slane %v1200_v56, %v9853_v13 }
 0x161   : > { %v10026_v12 = vpop.f32.mrb[23].mxu0  ;;  %v10028_v11 = vpop.f32.mrb[23].mxu1  ;;  %v1264_v44 = vrot.slane %v1250_v59, %v9851_v3  ;;  %v1265_v40 = vcombine.low %v1242_v62, %v1257_v38  ;;  %v1266_v47 = vcombine.high %v1242_v62, %v1257_v38  ;;  %v817_v17 = vmul.f32 0.088388346, %v9926_v54 }
 0x162   : > { %v10033_v6 = vrot.slane %v1215_v57, %v9853_v13  ;;  %v10036_v5 = vrot.slane %v1216_v9, %v9853_v13  ;;  %v1633_v59 = vcombine.low %v1207_v18, %v1214_v22  ;;  %v8624_v0 = vcombine.high %v1207_v18, %v1214_v22 }
 0x163   : > { %v10040_v39 = vrot.slane %v1265_v40, %v9853_v13  ;;  %v10043_v10 = vrot.slane %v1266_v47, %v9853_v13  ;;  %v1281_v56 = vcombine.low %v1249_v35, %v1264_v44  ;;  %v1282_v37 = vcombine.high %v1249_v35, %v1264_v44 }
 0x164   : > { %12308 = vst [vmem:[#allocation13_spill] sm:$0xff] %v10033_v6  ;;  %12309 = vst [vmem:[#allocation14_spill] sm:$0xff] %v10036_v5  ;;  %v10068_v44 = vrot.slane %v1633_v59, %v9851_v3  ;;  %v10071_v40 = vrot.slane %v8624_v0, %v9851_v3  ;;  %v814_v47 = vmul.f32 0.088388346, %v9920_v46  ;;  %v818_v59 = vmul.f32 0.088388346, %v9934_v63 }
 0x165   : > { %12310 = vst [vmem:[#allocation15_spill] sm:$0xff] %v10043_v10  ;;  %v10054_v54 = vrot.slane %v1281_v56, %v9853_v13  ;;  %v10057_v38 = vrot.slane %v1282_v37, %v9853_v13  ;;  %v833_v37 = vpack.c.bf16 %v817_v17, %v813_v29  ;;  %v893_v46 = vshrl.u32 %v831_v19, 16 }
 0x166   : > { %v10049_v62 = vpop.f32.mrb[24].mxu0  ;;  %v10051_v48 = vpop.f32.mrb[24].mxu1  ;;  %v1961_v29 = vpack.c.bf16 %v9958_v16, %v9942_v30  ;;  %v10092_v17 = vpack.c.bf16 %v9960_v26, %v9944_v31  ;;  %v1962_v57 = vpack.c.bf16 %v9968_v49, %v9948_v25  ;;  %v834_v55 = vpack.c.bf16 %v818_v59, %v814_v47 }
 0x167   : > { %12311 = vst [vmem:[#allocation16_spill] sm:$0xff] %v10054_v54  ;;  %12312 = vst [vmem:[#allocation17_spill] sm:$0xff] %v10057_v38  ;;  %v10063_v18 = vpop.f32.mrb[25].mxu0  ;;  %v10065_v22 = vpop.f32.mrb[25].mxu1  ;;  %v901_v35 = vshrl.u32 %v833_v37, 16  ;;  %v832_v38 = vpack.c.bf16 %v816_v28, %v812_v58  ;;  %v10098_v63 = vpack.c.bf16 %v9970_v50, %v9950_v34  ;;  %v12313_v30 = vcombine.low %v9886_v1, %v9889_v4 }
 0x168   : > { %v10074_v56 = vpop.f32.mrb[26].mxu0  ;;  %v10076_v9 = vpop.f32.mrb[26].mxu1  ;;  %v1981_v54 = vshrl.u32 %v1961_v29, 16  ;;  %v1979_v5 = vpack.i.b16 %v1962_v57, %v1961_v29  ;;  %v1982_v6 = vshrl.u32 %v1962_v57, 16  ;;  %v899_v10 = vpack.i.b16 %v834_v55, %v833_v37 }
 0x169   : > { %v10084_v15 = vpop.f32.mrb[27].mxu0  ;;  %v10086_v0 = vpop.f32.mrb[27].mxu1  ;;  %v10104_v16 = vrot.slane %v12313_v30, %v9853_v13  ;;  %v891_v31 = vpack.i.b16 %v832_v38, %v831_v19  ;;  %v894_v26 = vshrl.u32 %v832_v38, 16  ;;  %v902_v25 = vshrl.u32 %v834_v55, 16 }
 0x16a   : > { %v1983_v58 = vpack.i.b16 %v1982_v6, %v1981_v54  ;;  %v2041_v28 = vcombine.high %v1979_v5, %v9849_v2  ;;  %v10110_v34 = vpack.i.b16 %v10098_v63, %v10092_v17  ;;  %v1316_v6 = vcombine.high %v899_v10, %v9849_v2 }
 0x16b   : > { %v895_v1 = vpack.i.b16 %v894_v26, %v893_v46  ;;  %v1301_v4 = vcombine.high %v891_v31, %v9849_v2  ;;  %v1308_v19 = vrot.slane %v891_v31, %v9851_v3  ;;  %v903_v38 = vpack.i.b16 %v902_v25, %v901_v35 }
 0x16c   : > { %v1323_v54 = vrot.slane %v899_v10, %v9851_v3  ;;  %v2048_v59 = vrot.slane %v1979_v5, %v9851_v3  ;;  %v10126_v29 = vrot.slane %v2041_v28, %v9851_v3  ;;  %v1330_v5 = vrot.slane %v1316_v6, %v9851_v3 }
 0x16d   : > { %v1315_v30 = vrot.slane %v1301_v4, %v9851_v3  ;;  %v1367_v35 = vcombine.high %v895_v1, %v9849_v2  ;;  %v1374_v31 = vrot.slane %v895_v1, %v9851_v3  ;;  %v1382_v26 = vcombine.high %v903_v38, %v9849_v2 }
 0x16e   : > { %v10112_v50 = vpop.f32.mrb[28].mxu0  ;;  %v10114_v57 = vpop.f32.mrb[28].mxu1  ;;  %v1331_v28 = vcombine.low %v1308_v19, %v1323_v54  ;;  %v1332_v49 = vcombine.high %v1308_v19, %v1323_v54  ;;  %v10146_v1 = vrot.slane %v1983_v58, %v9851_v3 }
 0x16f   : > { %12314 = vst [vmem:[#allocation18_spill] sm:$0xff] %v10114_v57  ;;  %v10118_v47 = vpop.f32.mrb[29].mxu0  ;;  %v10120_v37 = vpop.f32.mrb[29].mxu1  ;;  %v1396_v4 = vrot.slane %v1382_v26, %v9851_v3  ;;  %v1347_v6 = vcombine.low %v1315_v30, %v1330_v5 }
 0x170   : > { %12315 = vst [vmem:[#allocation19_spill] sm:$0xff] %v10118_v47  ;;  %12316 = vst [vmem:[#allocation20_spill] sm:$0xff] %v10120_v37  ;;  %v10128_v55 = vpop.f32.mrb[30].mxu0  ;;  %v10130_v46 = vpop.f32.mrb[30].mxu1  ;;  %v1389_v37 = vrot.slane %v903_v38, %v9851_v3  ;;  %v1381_v47 = vrot.slane %v1367_v35, %v9851_v3  ;;  %v10149_v57 = vrot.slane %v1331_v28, %v9853_v13 }
 0x171   : > { %12317 = vst [vmem:[#allocation21_spill] sm:$0xff] %v10128_v55  ;;  %12318 = vst [vmem:[#allocation22_spill] sm:$0xff] %v10130_v46  ;;  %v10136_v25 = vpop.f32.mrb[31].mxu0  ;;  %v10138_v10 = vpop.f32.mrb[31].mxu1  ;;  %v2107_v46 = vcombine.high %v1983_v58, %v9849_v2  ;;  %v10155_v35 = vrot.slane %v1347_v6, %v9853_v13 }
 0x172   : > { %12319 = vst [vmem:[#allocation23_spill] sm:$0xff] %v10136_v25  ;;  %12320 = vst [vmem:[#allocation24_spill] sm:$0xff] %v10138_v10  ;;  %v10152_v10 = vrot.slane %v1332_v49, %v9853_v13  ;;  %v1348_v25 = vcombine.high %v1315_v30, %v1330_v5  ;;  %v1397_v19 = vcombine.low %v1374_v31, %v1389_v37 }
 0x173   : > { %v1398_v54 = vcombine.high %v1374_v31, %v1389_v37  ;;  %v1413_v38 = vcombine.low %v1381_v47, %v1396_v4  ;;  %v1414_v55 = vcombine.high %v1381_v47, %v1396_v4  ;;  %12322 = vst [vmem:[#allocation26_spill] sm:$0xff] %v10155_v35  ;;  %v2121_v4 = vrot.slane %v2107_v46, %v9851_v3 }
 0x174   : > { %12321 = vst [vmem:[#allocation25_spill] sm:$0xff] %v10152_v10  ;;  %v10158_v26 = vrot.slane %v1348_v25, %v9853_v13  ;;  %v1733_v58 = vcombine.low %v10149_v57, %v10152_v10  ;;  %v10165_v49 = vrot.slane %v1397_v19, %v9853_v13  ;;  %v2063_v46 = vrot.slane %v10110_v34, %v9851_v3 }
 0x175   : > { %v10168_v30 = vrot.slane %v1398_v54, %v9853_v13  ;;  %v10171_v47 = vrot.slane %v1413_v38, %v9853_v13  ;;  %v10174_v37 = vrot.slane %v1414_v55, %v9853_v13  ;;  %v1990_v38 = vshrl.u32 %v10098_v63, 16 }
 0x176   : > { %12323 = vst [vmem:[#allocation27_spill] sm:$0xff] %v10158_v26  ;;  %12324 = vst [vmem:[#allocation28_spill] sm:$0xff] %v10165_v49  ;;  %v10177_v31 = vrot.slane %v1733_v58, %v9851_v3  ;;  %v2056_v58 = vcombine.high %v10110_v34, %v9849_v2  ;;  %v1474_v5 = vcombine.low %v9902_v20, %v9905_v21  ;;  %v12329_v19 = vshrl.u32 %v10092_v17, 16 }
 0x177   : > { %12325 = vst [vmem:[#allocation29_spill] sm:$0xff] %v10168_v30  ;;  %12326 = vst [vmem:[#allocation30_spill] sm:$0xff] %v10171_v47  ;;  %v1965_v25 = vpack.c.bf16 %v10020_v33, %v10003_v14  ;;  %v10203_v55 = vpack.c.bf16 %v10022_v42, %v10005_v45  ;;  %v1966_v54 = vpack.c.bf16 %v10026_v12, %v10013_v32 }
 0x178   : > { %12327 = vst [vmem:[#allocation31_spill] sm:$0xff] %v10174_v37  ;;  %12328 = vst [vmem:[#allocation32_spill] sm:$0xff] %v10177_v31  ;;  %v10209_v63 = vpack.c.bf16 %v10028_v11, %v10015_v23  ;;  %v1991_v34 = vpack.i.b16 %v1990_v38, %v12329_v19  ;;  %v2070_v6 = vrot.slane %v2056_v58, %v9851_v3 }
 0x179   : > { %v2071_v20 = vcombine.low %v2048_v59, %v2063_v46  ;;  %v2072_v21 = vcombine.high %v2048_v59, %v2063_v46  ;;  %v10215_v14 = vrot.slane %v1474_v5, %v9853_v13  ;;  %v1997_v33 = vshrl.u32 %v1965_v25, 16 }
 0x17a   : > { %v2005_v45 = vshrl.u32 %v10203_v55, 16  ;;  %v1995_v42 = vpack.i.b16 %v1966_v54, %v1965_v25  ;;  %v2087_v11 = vcombine.low %v10126_v29, %v2070_v6  ;;  %v2088_v23 = vcombine.high %v10126_v29, %v2070_v6 }
 0x17b   : > { %v2079_v12 = vrot.slane %v2071_v20, %v9853_v13  ;;  %v2086_v32 = vrot.slane %v2072_v21, %v9853_v13  ;;  %v2122_v17 = vcombine.high %v1991_v34, %v9849_v2  ;;  %v2129_v19 = vrot.slane %v1991_v34, %v9851_v3 }
 0x17c   : > { %v1998_v5 = vshrl.u32 %v1966_v54, 16  ;;  %v2095_v38 = vrot.slane %v2087_v11, %v9853_v13  ;;  %v2102_v25 = vrot.slane %v2088_v23, %v9853_v13 }
 0x17d   : > { %v2569_v58 = vcombine.low %v2079_v12, %v2086_v32  ;;  %v8632_v46 = vcombine.high %v2079_v12, %v2086_v32  ;;  %v2136_v20 = vrot.slane %v2122_v17, %v9851_v3  ;;  %v2137_v21 = vcombine.low %v10146_v1, %v2129_v19 }
 0x17e   : > { %v2138_v29 = vcombine.high %v10146_v1, %v2129_v19  ;;  %v1999_v6 = vpack.i.b16 %v1998_v5, %v1997_v33  ;;  %v2619_v37 = vcombine.low %v2095_v38, %v2102_v25  ;;  %v8634_v59 = vcombine.high %v2095_v38, %v2102_v25 }
 0x17f   : > { %v2576_v28 = vrot.slane %v2569_v58, %v9851_v3  ;;  %v2584_v34 = vrot.slane %v8632_v46, %v9851_v3  ;;  %v2145_v54 = vrot.slane %v2137_v21, %v9853_v13  ;;  %v2153_v23 = vcombine.low %v2121_v4, %v2136_v20 }
 0x180   : > { %v2152_v11 = vrot.slane %v2138_v29, %v9853_v13  ;;  %v2154_v47 = vcombine.high %v2121_v4, %v2136_v20  ;;  %v10236_v12 = vrot.slane %v2619_v37, %v9851_v3  ;;  %v10239_v32 = vrot.slane %v8634_v59, %v9851_v3 }
 0x181   : > { %v2585_v1 = vcombine.low %v2576_v28, %v2584_v34  ;;  %v2173_v33 = vcombine.high %v1995_v42, %v9849_v2  ;;  %v10243_v17 = vrot.slane %v2153_v23, %v9853_v13  ;;  %v2180_v4 = vrot.slane %v1995_v42, %v9851_v3 }
 0x182   : > { %v10246_v19 = vrot.slane %v2154_v47, %v9853_v13  ;;  %v2594_v5 = vcombine.low %v2145_v54, %v2152_v11  ;;  %v8633_v38 = vcombine.high %v2145_v54, %v2152_v11  ;;  %v2239_v59 = vcombine.high %v1999_v6, %v9849_v2 }
 0x183   : > { %v2592_v25 = vrot.slane %v2585_v1, %v9853_v13  ;;  %v2187_v37 = vrot.slane %v2173_v33, %v9851_v3  ;;  %v12330_v21 = vmov 0   ;;  %v2246_v42 = vrot.slane %v1999_v6, %v9851_v3 }
 0x184   : > { %v2601_v28 = vrot.slane %v2594_v5, %v9851_v3  ;;  %v2609_v58 = vrot.slane %v8633_v38, %v9851_v3  ;;  %v2644_v46 = vcombine.low %v10243_v17, %v10246_v19  ;;  %v2253_v34 = vrot.slane %v2239_v59, %v9851_v3 }
 0x185   : > { %v2973_v20 = vshrl.u32 %v2592_v25, 16  ;;  %v10259_v29 = vcombine.high %v2592_v25, %v12330_v21  ;;  %v2003_v11 = vpack.i.b16 %v10209_v63, %v10203_v55  ;;  %v2006_v23 = vshrl.u32 %v10209_v63, 16 }
 0x186   : > { %v2610_v54 = vcombine.low %v2601_v28, %v2609_v58  ;;  %v1837_v1 = vshrl.u32 %v10104_v16, 16  ;;  %v1838_v33 = vshrl.u32 %v10215_v14, 16  ;;  %v10271_v38 = vcombine.high %v10104_v16, %v12330_v21 }
 0x187   : > { %v2981_v5 = vshrl.u32 %v10259_v29, 16  ;;  %v10275_v6 = vcombine.high %v10215_v14, %v12330_v21  ;;  %v2007_v28 = vpack.i.b16 %v2006_v23, %v2005_v45  ;;  %v2188_v55 = vcombine.high %v2003_v11, %v9849_v2 }
 0x188   : > { %v2617_v59 = vrot.slane %v2610_v54, %v9853_v13  ;;  %v2195_v63 = vrot.slane %v2003_v11, %v9851_v3  ;;  %v1839_v58 = vpack.i.b16 %v1838_v33, %v1837_v1  ;;  %v2635_v26 = vcombine.low %v10236_v12, %v10239_v32 }
 0x189   : > { %v10285_v35 = vrot.slane %v2644_v46, %v9851_v3  ;;  %v2202_v45 = vrot.slane %v2188_v55, %v9851_v3  ;;  %v2254_v11 = vcombine.high %v2007_v28, %v9849_v2  ;;  %v2261_v1 = vrot.slane %v2007_v28, %v9851_v3 }
 0x18a   : > { %v2971_v30 = vpack.i.b16 %v2617_v59, %v2592_v25  ;;  %v2974_v49 = vshrl.u32 %v2617_v59, 16  ;;  %v2618_v31 = vcombine.high %v2617_v59, %v12330_v21  ;;  %v2203_v54 = vcombine.low %v2180_v4, %v2195_v63 }
 0x18b   : > { %v2204_v23 = vcombine.high %v2180_v4, %v2195_v63  ;;  %v2219_v12 = vcombine.low %v2187_v37, %v2202_v45  ;;  %v2220_v32 = vcombine.high %v2187_v37, %v2202_v45  ;;  %v12331_v46 = vmov 0.0  }
 0x18c   : > { %8850 = vmatpush3.bf16.xpose.msra.mxu0 %v2971_v30  ;;  %v2975_v33 = vpack.i.b16 %v2974_v49, %v2973_v20  ;;  %v2979_v47 = vpack.i.b16 %v2618_v31, %v10259_v29  ;;  %v2211_v25 = vrot.slane %v2203_v54, %v9853_v13  ;;  %v2268_v55 = vrot.slane %v2254_v11, %v9851_v3 }
 0x18d   : > { %8861 = vmatprep.subr.bf16.mxu0 %v12331_v46  ;;  %v2218_v59 = vrot.slane %v2204_v23, %v9853_v13  ;;  %v2269_v10 = vcombine.low %v2246_v42, %v2261_v1  ;;  %v2227_v4 = vrot.slane %v2219_v12, %v9853_v13  ;;  %v2234_v28 = vrot.slane %v2220_v32, %v9853_v13 }
 0x18e   : > { %8856 = vmatpush3.bf16.xpose.msra.mxu1 %v2975_v33  ;;  %v2270_v30 = vcombine.high %v2246_v42, %v2261_v1  ;;  %v2982_v49 = vshrl.u32 %v2618_v31, 16  ;;  %v2285_v29 = vcombine.low %v2253_v34, %v2268_v55  ;;  %v2286_v37 = vcombine.high %v2253_v34, %v2268_v55 }
 0x18f   : > { %v2277_v20 = vrot.slane %v2269_v10, %v9853_v13  ;;  %v2669_v63 = vcombine.low %v2211_v25, %v2218_v59  ;;  %8867 = vmatprep.subr.bf16.mxu1 %v12331_v46  ;;  %v8636_v54 = vcombine.high %v2211_v25, %v2218_v59  ;;  %v2719_v23 = vcombine.low %v2227_v4, %v2234_v28 }
 0x190   : > { %v2284_v45 = vrot.slane %v2270_v30, %v9853_v13  ;;  %v8638_v11 = vcombine.high %v2227_v4, %v2234_v28  ;;  %v10302_v33 = vrot.slane %v2285_v29, %v9853_v13  ;;  %v10305_v12 = vrot.slane %v2286_v37, %v9853_v13 }
 0x191   : > { %v2676_v31 = vrot.slane %v2669_v63, %v9851_v3  ;;  %v2983_v42 = vpack.i.b16 %v2982_v49, %v2981_v5  ;;  %v2684_v10 = vrot.slane %v8636_v54, %v9851_v3  ;;  %v10310_v32 = vrot.slane %v2719_v23, %v9851_v3 }
 0x192   : > { %v2694_v34 = vcombine.low %v2277_v20, %v2284_v45  ;;  %v8637_v1 = vcombine.high %v2277_v20, %v2284_v45  ;;  %v12332_v25 = vpack.i.b16 %v10215_v14, %v10104_v16  ;;  %v10316_v59 = vrot.slane %v8638_v11, %v9851_v3 }
 0x193   : > { %v2744_v55 = vcombine.low %v10302_v33, %v10305_v12  ;;  %v8639_v5 = vcombine.high %v10302_v33, %v10305_v12  ;;  %v2642_v4 = vrot.slane %v2635_v26, %v9853_v13  ;;  %v12333_v16 = vcombine.high %v10243_v17, %v10246_v19 }
 0x194   : > { %8852 = vmatmul.mubr.bf16.vlgmr.msra.gmra.mrb[48].mxu0 %v12332_v25  ;;  %v2701_v28 = vrot.slane %v2694_v34, %v9851_v3  ;;  %v2709_v30 = vrot.slane %v8637_v1, %v9851_v3  ;;  %v1845_v49 = vshrl.u32 %v10271_v38, 16  ;;  %v1846_v26 = vshrl.u32 %v10275_v6, 16 }
 0x195   : > { %8862 = vmatpush3.bf16.xpose.msra.mxu0 %v2979_v47  ;;  %8863 = vmatprep.mubr.msk.bf16.mxu0 %vm9603_vm1, %v12331_v46  ;;  %v2659_v14 = vrot.slane %v12333_v16, %v9851_v3  ;;  %v12334_v47 = vcombine.low %v9872_v52, %v9875_v53  ;;  %v12335_v29 = vcombine.high %v9872_v52, %v9875_v53  ;;  %v2989_v19 = vshrl.u32 %v2642_v4, 16 }
 0x196   : > { %8858 = vmatmul.mubr.bf16.vlgmr.msra.gmra.mrb[48].mxu1 %v1839_v58  ;;  %8873 = vmatprep.subr.bf16.mxu0 %v12331_v46  ;;  %v12336_v58 = vcombine.low %v9880_v60, %v9883_v61  ;;  %v12337_v45 = vcombine.high %v9880_v60, %v9883_v61  ;;  %v1847_v23 = vpack.i.b16 %v1846_v26, %v1845_v49 }
 0x197   : > { %v1490_v20 = vrot.slane %v12334_v47, %v9851_v3  ;;  %v1498_v37 = vrot.slane %v12335_v29, %v9851_v3  ;;  %8868 = vmatpush3.bf16.xpose.msra.mxu1 %v2983_v42  ;;  %8869 = vmatprep.mubr.msk.bf16.mxu1 %vm9603_vm1, %v12331_v46  ;;  %v2660_v17 = vcombine.low %v10285_v35, %v2659_v14 }
 0x198   : > { %v1515_v63 = vrot.slane %v12336_v58, %v9851_v3  ;;  %v1523_v54 = vrot.slane %v12337_v45, %v9851_v3  ;;  %8879 = vmatprep.subr.bf16.mxu1 %v12331_v46  ;;  %v2643_v53 = vcombine.high %v2642_v4, %v12330_v21  ;;  %v2685_v11 = vcombine.low %v2676_v31, %v2684_v10 }
 0x199   : > { %v1499_v52 = vcombine.low %v1490_v20, %v1498_v37  ;;  %v2667_v35 = vrot.slane %v2660_v17, %v9853_v13  ;;  %v2710_v34 = vcombine.low %v2701_v28, %v2709_v30  ;;  %v1549_v1 = vcombine.low %v9973_v51, %v9994_v24 }
 0x19a   : > { %v1524_v42 = vcombine.low %v1515_v63, %v1523_v54  ;;  %v2997_v16 = vshrl.u32 %v2643_v53, 16  ;;  %v10360_v60 = vrot.slane %v2685_v11, %v9853_v13  ;;  %v12338_v61 = vcombine.low %v9963_v43, %v9966_v41 }
 0x19b   : > { %v1506_v25 = vrot.slane %v1499_v52, %v9853_v13  ;;  %v2987_v49 = vpack.i.b16 %v2667_v35, %v2642_v4  ;;  %v2990_v31 = vshrl.u32 %v2667_v35, 16  ;;  %v2668_v28 = vcombine.high %v2667_v35, %v12330_v21 }
 0x19c   : > { %v1565_v14 = vrot.slane %v12338_v61, %v9851_v3  ;;  %v1531_v10 = vrot.slane %v1524_v42, %v9853_v13  ;;  %v12339_v51 = vpack.i.b16 %v10275_v6, %v10271_v38  ;;  %v10375_v26 = vrot.slane %v2710_v34, %v9853_v13 }
 0x19d   : > { %v1853_v24 = vshrl.u32 %v1506_v25, 16  ;;  %v10372_v30 = vcombine.high %v1506_v25, %v12330_v21  ;;  %v3005_v47 = vshrl.u32 %v10360_v60, 16  ;;  %v2991_v4 = vpack.i.b16 %v2990_v31, %v2989_v19 }
 0x19e   : > { %8864 = vmatmul.mubr.bf16.vlgmr.msra.gmra.mrb[52].mxu0 %v12339_v51  ;;  %v1851_v20 = vpack.i.b16 %v1531_v10, %v1506_v25  ;;  %v2995_v29 = vpack.i.b16 %v2668_v28, %v2643_v53  ;;  %v1854_v37 = vshrl.u32 %v1531_v10, 16  ;;  %8870 = vmatmul.mubr.bf16.vlgmr.msra.gmra.mrb[52].mxu1 %v1847_v23  ;;  %v2998_v38 = vshrl.u32 %v2668_v28, 16 }
 0x19f   : > { %8874 = vmatpush3.bf16.xpose.msra.mxu0 %v2987_v49  ;;  %8875 = vmatprep.mubr.msk.bf16.mxu0 %vm9603_vm1, %v12331_v46  ;;  %v10382_v6 = vcombine.high %v1531_v10, %v12330_v21  ;;  %v3003_v17 = vpack.i.b16 %v10375_v26, %v10360_v60  ;;  %v1861_v58 = vshrl.u32 %v10372_v30, 16  ;;  %v3006_v63 = vshrl.u32 %v10375_v26, 16 }
 0x1a0   : > { %8885 = vmatprep.subr.bf16.mxu0 %v12331_v46  ;;  %8880 = vmatpush3.bf16.xpose.msra.mxu1 %v2991_v4  ;;  %v1855_v19 = vpack.i.b16 %v1854_v37, %v1853_v24  ;;  %v10391_v45 = vrot.slane %v1549_v1, %v9853_v13  ;;  %v12340_v54 = vcombine.high %v9963_v43, %v9966_v41 }
 0x1a1   : > { %8881 = vmatprep.mubr.msk.bf16.mxu1 %vm9603_vm1, %v12331_v46  ;;  %8891 = vmatprep.subr.bf16.mxu1 %v12331_v46  ;;  %v2999_v52 = vpack.i.b16 %v2998_v38, %v2997_v16  ;;  %v1859_v53 = vpack.i.b16 %v10382_v6, %v10372_v30  ;;  %v1862_v11 = vshrl.u32 %v10382_v6, 16  ;;  %v1969_v35 = vpack.c.bf16 %v10074_v56, %v10049_v62 }
 0x1a2   : > { %v1573_v23 = vrot.slane %v12340_v54, %v9851_v3  ;;  %v10403_v42 = vpack.i.b16 %v3006_v63, %v3005_v47  ;;  %v1971_v1 = vpack.c.bf16 %v10076_v9, %v10051_v48  ;;  %v10409_v43 = vcombine.high %v10360_v60, %v12330_v21 }
 0x1a3   : > { %v1863_v41 = vpack.i.b16 %v1862_v11, %v1861_v58  ;;  %v2013_v25 = vshrl.u32 %v1969_v35, 16  ;;  %v10413_v16 = vcombine.high %v10375_v26, %v12330_v21  ;;  %v1970_v61 = vpack.c.bf16 %v10084_v15, %v10063_v18 }
 0x1a4   : > { %v1574_v34 = vcombine.low %v1565_v14, %v1573_v23  ;;  %v2021_v56 = vshrl.u32 %v1971_v1, 16  ;;  %v1972_v9 = vpack.c.bf16 %v10086_v0, %v10065_v22  ;;  %v1869_v48 = vshrl.u32 %v10391_v45, 16 }
 0x1a5   : > { %v3011_v14 = vpack.i.b16 %v10413_v16, %v10409_v43  ;;  %v2011_v49 = vpack.i.b16 %v1970_v61, %v1969_v35  ;;  %v2014_v31 = vshrl.u32 %v1970_v61, 16  ;;  %v3013_v10 = vshrl.u32 %v10409_v43, 16 }
 0x1a6   : > { %v10418_v62 = vrot.slane %v1574_v34, %v9853_v13  ;;  %8876 = vmatmul.mubr.bf16.vlgmr.msra.gmra.mrb[56].mxu0 %v1851_v20  ;;  %v2019_v18 = vpack.i.b16 %v1972_v9, %v1971_v1  ;;  %v2022_v28 = vshrl.u32 %v1972_v9, 16  ;;  %v3014_v30 = vshrl.u32 %v10413_v16, 16 }
 0x1a7   : > { %8886 = vmatpush3.bf16.xpose.msra.mxu0 %v2995_v29  ;;  %8887 = vmatprep.mubr.msk.bf16.mxu0 %vm9603_vm1, %v12331_v46  ;;  %v2015_v0 = vpack.i.b16 %v2014_v31, %v2013_v25  ;;  %v2305_v51 = vcombine.high %v2011_v49, %v9849_v2  ;;  %v2312_v24 = vrot.slane %v2011_v49, %v9851_v3 }
 0x1a8   : > { %v1867_v15 = vpack.i.b16 %v10418_v62, %v10391_v45  ;;  %v1870_v22 = vshrl.u32 %v10418_v62, 16  ;;  %8882 = vmatmul.mubr.bf16.vlgmr.msra.gmra.mrb[56].mxu1 %v1855_v19  ;;  %8897 = vmatprep.subr.bf16.mxu0 %v12331_v46  ;;  %v2023_v47 = vpack.i.b16 %v2022_v28, %v2021_v56  ;;  %v2320_v4 = vcombine.high %v2019_v18, %v9849_v2 }
 0x1a9   : > { %8892 = vmatpush3.bf16.xpose.msra.mxu1 %v2999_v52  ;;  %8893 = vmatprep.mubr.msk.bf16.mxu1 %vm9603_vm1, %v12331_v46  ;;  %v2327_v20 = vrot.slane %v2019_v18, %v9851_v3  ;;  %v2319_v29 = vrot.slane %v2305_v51, %v9851_v3  ;;  %v2371_v37 = vcombine.high %v2015_v0, %v9849_v2 }
 0x1aa   : > { %8903 = vmatprep.subr.bf16.mxu1 %v12331_v46  ;;  %v2378_v38 = vrot.slane %v2015_v0, %v9851_v3  ;;  %v1871_v6 = vpack.i.b16 %v1870_v22, %v1869_v48  ;;  %v2334_v58 = vrot.slane %v2320_v4, %v9851_v3  ;;  %v2386_v54 = vcombine.high %v2023_v47, %v9849_v2 }
 0x1ab   : > { %v2335_v19 = vcombine.low %v2312_v24, %v2327_v20  ;;  %v2336_v63 = vcombine.high %v2312_v24, %v2327_v20  ;;  %v2385_v23 = vrot.slane %v2371_v37, %v9851_v3  ;;  %v2393_v52 = vrot.slane %v2023_v47, %v9851_v3 }
 0x1ac   : > { %v3015_v11 = vpack.i.b16 %v3014_v30, %v3013_v10  ;;  %v10449_v35 = vcombine.high %v10391_v45, %v12330_v21  ;;  %v2351_v25 = vcombine.low %v2319_v29, %v2334_v58  ;;  %v2352_v61 = vcombine.high %v2319_v29, %v2334_v58 }
 0x1ad   : > { %v2343_v34 = vrot.slane %v2335_v19, %v9853_v13  ;;  %v2350_v1 = vrot.slane %v2336_v63, %v9853_v13  ;;  %v2400_v56 = vrot.slane %v2386_v54, %v9851_v3  ;;  %v2401_v9 = vcombine.low %v2378_v38, %v2393_v52 }
 0x1ae   : > { %8888 = vmatmul.mubr.bf16.vlgmr.msra.gmra.mrb[60].mxu0 %v1859_v53  ;;  %v2402_v48 = vcombine.high %v2378_v38, %v2393_v52  ;;  %v10456_v49 = vcombine.high %v10418_v62, %v12330_v21  ;;  %v2359_v31 = vrot.slane %v2351_v25, %v9853_v13  ;;  %v2366_v10 = vrot.slane %v2352_v61, %v9853_v13 }
 0x1af   : > { %8898 = vmatpush3.bf16.xpose.msra.mxu0 %v3003_v17  ;;  %8899 = vmatprep.mubr.msk.bf16.mxu0 %vm9603_vm1, %v12331_v46  ;;  %v2769_v53 = vcombine.low %v2343_v34, %v2350_v1  ;;  %v2409_v18 = vrot.slane %v2401_v9, %v9853_v13  ;;  %v2417_v22 = vcombine.low %v2385_v23, %v2400_v56  ;;  %v1877_v0 = vshrl.u32 %v10449_v35, 16 }
 0x1b0   : > { %8894 = vmatmul.mubr.bf16.vlgmr.msra.gmra.mrb[60].mxu1 %v1863_v41  ;;  %8909 = vmatprep.subr.bf16.mxu0 %v12331_v46  ;;  %v2416_v28 = vrot.slane %v2402_v48, %v9853_v13  ;;  %v2418_v60 = vcombine.high %v2385_v23, %v2400_v56  ;;  %v8640_v17 = vcombine.high %v2343_v34, %v2350_v1  ;;  %v1878_v41 = vshrl.u32 %v10456_v49, 16  ;;  %v12345_v48 = vld [vmem:[#allocation15_spill] sm:$0xff] }
 0x1b1   : > { %8904 = vmatpush3.bf16.xpose.msra.mxu1 %v10403_v42  ;;  %8905 = vmatprep.mubr.msk.bf16.mxu1 %vm9603_vm1, %v12331_v46  ;;  %v2776_v26 = vrot.slane %v2769_v53, %v9851_v3  ;;  %v10475_v51 = vrot.slane %v2417_v22, %v9853_v13  ;;  %v2819_v47 = vcombine.low %v2359_v31, %v2366_v10 }
 0x1b2   : > { %v2794_v24 = vcombine.low %v2409_v18, %v2416_v28  ;;  %v8641_v30 = vcombine.high %v2409_v18, %v2416_v28  ;;  %8915 = vmatprep.subr.bf16.mxu1 %v12331_v46  ;;  %v10479_v4 = vrot.slane %v2418_v60, %v9853_v13  ;;  %v2784_v42 = vrot.slane %v8640_v17, %v9851_v3 }
 0x1b3   : > { %v8642_v20 = vcombine.high %v2359_v31, %v2366_v10  ;;  %v1875_v29 = vpack.i.b16 %v10456_v49, %v10449_v35  ;;  %v10487_v58 = vrot.slane %v2819_v47, %v9851_v3  ;;  %v2735_v19 = vcombine.low %v10310_v32, %v10316_v59 }
 0x1b4   : > { %v2801_v37 = vrot.slane %v2794_v24, %v9851_v3  ;;  %v2809_v38 = vrot.slane %v8641_v30, %v9851_v3  ;;  %v2751_v52 = vrot.slane %v2744_v55, %v9851_v3  ;;  %v2759_v59 = vrot.slane %v8639_v5, %v9851_v3  ;;  %v10563_v24 = vpop.f32.mrb[32].mxu0  ;;  %v10565_v30 = vpop.f32.mrb[32].mxu1 }
 0x1b5   : > { %v10492_v63 = vrot.slane %v8642_v20, %v9851_v3  ;;  %v2742_v32 = vrot.slane %v2735_v19, %v9853_v13  ;;  %v1879_v35 = vpack.i.b16 %v1878_v41, %v1877_v0  ;;  %v12341_v34 = vcombine.low %v9953_v27, %v9956_v36 }
 0x1b6   : > { %8900 = vmatmul.mubr.bf16.vlgmr.msra.gmra.mrb[64].mxu0 %v1867_v15  ;;  %v12342_v55 = vcombine.high %v9953_v27, %v9956_v36  ;;  %v12343_v33 = vcombine.low %v9981_v7, %v9984_v8  ;;  %v12344_v5 = vcombine.high %v9981_v7, %v9984_v8  ;;  %v2760_v43 = vcombine.low %v2751_v52, %v2759_v59 }
 0x1b7   : > { %v1590_v1 = vrot.slane %v12341_v34, %v9851_v3  ;;  %8910 = vmatpush3.bf16.xpose.msra.mxu0 %v3011_v14  ;;  %8911 = vmatprep.mubr.msk.bf16.mxu0 %vm9603_vm1, %v12331_v46  ;;  %v10533_v16 = vcombine.high %v2742_v32, %v12330_v21  ;;  %v2785_v14 = vcombine.low %v2776_v26, %v2784_v42  ;;  %v3021_v27 = vshrl.u32 %v2742_v32, 16 }
 0x1b8   : > { %v1598_v45 = vrot.slane %v12342_v55, %v9851_v3  ;;  %v1615_v12 = vrot.slane %v12343_v33, %v9851_v3  ;;  %v1623_v62 = vrot.slane %v12344_v5, %v9851_v3  ;;  %8906 = vmatmul.mubr.bf16.vlgmr.msra.gmra.mrb[64].mxu1 %v1871_v6  ;;  %8921 = vmatprep.subr.bf16.mxu0 %v12331_v46  ;;  %v12348_v33 = vld [vmem:[#allocation21_spill] sm:$0xff] }
 0x1b9   : > { %8916 = vmatpush3.bf16.xpose.msra.mxu1 %v3015_v11  ;;  %8917 = vmatprep.mubr.msk.bf16.mxu1 %vm9603_vm1, %v12331_v46  ;;  %v2810_v25 = vcombine.low %v2801_v37, %v2809_v38  ;;  %v2767_v61 = vrot.slane %v2760_v43, %v9853_v13  ;;  %v3029_v7 = vshrl.u32 %v10533_v16, 16  ;;  %v10541_v8 = vrot.slane %v2785_v14, %v9853_v13  ;;  %v10573_v37 = vpop.f32.mrb[33].mxu0  ;;  %v10575_v38 = vpop.f32.mrb[33].mxu1  ;;  %v12350_v14 = vld [vmem:[#allocation22_spill] sm:$0xff] }
 0x1ba   : > { %v1599_v36 = vcombine.low %v1590_v1, %v1598_v45  ;;  %v1624_v15 = vcombine.low %v1615_v12, %v1623_v62  ;;  %8927 = vmatprep.subr.bf16.mxu1 %v12331_v46  ;;  %v1649_v6 = vcombine.low %v10068_v44, %v10071_v40  ;;  %v12346_v49 = vcombine.low %v10040_v39, %v12345_v48  ;;  %v10584_v34 = vpop.f32.mrb[34].mxu0  ;;  %v10586_v1 = vpop.f32.mrb[34].mxu1 }
 0x1bb   : > { %v10548_v9 = vrot.slane %v2810_v25, %v9853_v13  ;;  %v3019_v10 = vpack.i.b16 %v2767_v61, %v2742_v32  ;;  %v3022_v53 = vshrl.u32 %v2767_v61, 16  ;;  %v2768_v18 = vcombine.high %v2767_v61, %v12330_v21  ;;  %v10598_v5 = vpop.f32.mrb[35].mxu0  ;;  %v10600_v62 = vpop.f32.mrb[35].mxu1  ;;  %v12351_v25 = vld [vmem:[#allocation19_spill] sm:$0xff] }
 0x1bc   : > { %v1606_v11 = vrot.slane %v1599_v36, %v9853_v13  ;;  %v1631_v56 = vrot.slane %v1624_v15, %v9853_v13  ;;  %v1665_v31 = vrot.slane %v12346_v49, %v9851_v3  ;;  %v3037_v28 = vshrl.u32 %v10541_v8, 16  ;;  %v12352_v61 = vld [vmem:[#allocation23_spill] sm:$0xff] }
 0x1bd   : > { %v3023_v60 = vpack.i.b16 %v3022_v53, %v3021_v27  ;;  %v3027_v26 = vpack.i.b16 %v2768_v18, %v10533_v16  ;;  %v3030_v17 = vshrl.u32 %v2768_v18, 16  ;;  %v3035_v42 = vpack.i.b16 %v10548_v9, %v10541_v8  ;;  %v12349_v16 = vld [vmem:[#allocation18_spill] sm:$0xff] }
 0x1be   : > { %v1883_v22 = vpack.i.b16 %v1631_v56, %v1606_v11  ;;  %v1885_v44 = vshrl.u32 %v1606_v11, 16  ;;  %v1886_v40 = vshrl.u32 %v1631_v56, 16  ;;  %v10557_v0 = vcombine.high %v1606_v11, %v12330_v21  ;;  %8912 = vmatmul.mubr.bf16.vlgmr.msra.gmra.mrb[68].mxu0 %v1875_v29  ;;  %v12354_v11 = vld [vmem:[#allocation24_spill] sm:$0xff] }
 0x1bf   : > { %v10561_v41 = vcombine.high %v1631_v56, %v12330_v21  ;;  %8922 = vmatpush3.bf16.xpose.msra.mxu0 %v3019_v10  ;;  %8923 = vmatprep.mubr.msk.bf16.mxu0 %vm9603_vm1, %v12331_v46  ;;  %v3038_v29 = vshrl.u32 %v10548_v9, 16  ;;  %v3031_v19 = vpack.i.b16 %v3030_v17, %v3029_v7  ;;  %v10582_v59 = vrot.slane %v1649_v6, %v9853_v13  ;;  %v12353_v6 = vld [vmem:[#allocation20_spill] sm:$0xff] }
 0x1c0   : > { %v1887_v47 = vpack.i.b16 %v1886_v40, %v1885_v44  ;;  %v1893_v20 = vshrl.u32 %v10557_v0, 16  ;;  %8918 = vmatmul.mubr.bf16.vlgmr.msra.gmra.mrb[68].mxu1 %v1879_v35  ;;  %8933 = vmatprep.subr.bf16.mxu0 %v12331_v46  ;;  %v12347_v55 = vcombine.high %v10040_v39, %v12345_v48  ;;  %v1973_v12 = vpack.c.bf16 %v12348_v33, %v10112_v50  ;;  %v12355_v48 = vld [vmem:[#allocation25_spill] sm:$0xff] }
 0x1c1   : > { %v1891_v52 = vpack.i.b16 %v10561_v41, %v10557_v0  ;;  %v1894_v32 = vshrl.u32 %v10561_v41, 16  ;;  %8928 = vmatpush3.bf16.xpose.msra.mxu1 %v3023_v60  ;;  %8929 = vmatprep.mubr.msk.bf16.mxu1 %vm9603_vm1, %v12331_v46  ;;  %v10590_v35 = vpack.i.b16 %v3038_v29, %v3037_v28  ;;  %v1975_v27 = vpack.c.bf16 %v12350_v14, %v12349_v16 }
 0x1c2   : > { %v1673_v45 = vrot.slane %v12347_v55, %v9851_v3  ;;  %8939 = vmatprep.subr.bf16.mxu1 %v12331_v46  ;;  %v10609_v36 = vcombine.high %v10541_v8, %v12330_v21  ;;  %v10613_v39 = vcombine.high %v10548_v9, %v12330_v21  ;;  %v2029_v15 = vshrl.u32 %v1973_v12, 16  ;;  %v10640_v55 = vpop.f32.mrb[36].mxu1 }
 0x1c3   : > { %v10603_v43 = vpack.i.b16 %v1894_v32, %v1893_v20  ;;  %v1974_v7 = vpack.c.bf16 %v12352_v61, %v12351_v25  ;;  %v1976_v56 = vpack.c.bf16 %v12354_v11, %v12353_v6  ;;  %v12356_v49 = vcombine.high %v10149_v57, %v12355_v48  ;;  %v10638_v32 = vpop.f32.mrb[36].mxu0  ;;  %v10650_v14 = vpop.f32.mrb[37].mxu1 }
 0x1c4   : > { %v1674_v50 = vcombine.low %v1665_v31, %v1673_v45  ;;  %v2037_v53 = vshrl.u32 %v1975_v27, 16  ;;  %v3045_v28 = vshrl.u32 %v10609_v36, 16  ;;  %v3046_v20 = vshrl.u32 %v10613_v39, 16  ;;  %v10648_v16 = vpop.f32.mrb[37].mxu0  ;;  %v10657_v61 = vpop.f32.mrb[38].mxu1 }
 0x1c5   : > { %v10623_v10 = vrot.slane %v12356_v49, %v9851_v3  ;;  %v2027_v44 = vpack.i.b16 %v1974_v7, %v1973_v12  ;;  %v2030_v40 = vshrl.u32 %v1974_v7, 16  ;;  %v2035_v60 = vpack.i.b16 %v1976_v56, %v1975_v27  ;;  %v10655_v25 = vpop.f32.mrb[38].mxu0 }
 0x1c6   : > { %v10629_v31 = vrot.slane %v1674_v50, %v9853_v13  ;;  %8924 = vmatmul.mubr.bf16.vlgmr.msra.gmra.mrb[72].mxu0 %v1883_v22  ;;  %v2038_v17 = vshrl.u32 %v1976_v56, 16  ;;  %v10634_v57 = vcombine.high %v10582_v59, %v12330_v21  ;;  %v2835_v29 = vcombine.low %v10487_v58, %v10492_v63  ;;  %v10665_v11 = vpop.f32.mrb[39].mxu0  ;;  %v10667_v56 = vpop.f32.mrb[39].mxu1 }
 0x1c7   : > { %8934 = vmatpush3.bf16.xpose.msra.mxu0 %v3027_v26  ;;  %8935 = vmatprep.mubr.msk.bf16.mxu0 %vm9603_vm1, %v12331_v46  ;;  %v2031_v45 = vpack.i.b16 %v2030_v40, %v2029_v15  ;;  %v2437_v33 = vcombine.high %v2027_v44, %v9849_v2  ;;  %v2444_v26 = vrot.slane %v2027_v44, %v9851_v3  ;;  %v1901_v6 = vshrl.u32 %v10582_v59, 16 }
 0x1c8   : > { %v1902_v12 = vshrl.u32 %v10629_v31, 16  ;;  %8930 = vmatmul.mubr.bf16.vlgmr.msra.gmra.mrb[72].mxu1 %v1887_v47  ;;  %8945 = vmatprep.subr.bf16.mxu0 %v12331_v46  ;;  %v2039_v27 = vpack.i.b16 %v2038_v17, %v2037_v53  ;;  %v2452_v50 = vcombine.high %v2035_v60, %v9849_v2  ;;  %v2459_v48 = vrot.slane %v2035_v60, %v9851_v3 }
 0x1c9   : > { %8940 = vmatpush3.bf16.xpose.msra.mxu1 %v3031_v19  ;;  %8941 = vmatprep.mubr.msk.bf16.mxu1 %vm9603_vm1, %v12331_v46  ;;  %v2451_v15 = vrot.slane %v2437_v33, %v9851_v3  ;;  %v2503_v7 = vcombine.high %v2031_v45, %v9849_v2  ;;  %v2510_v47 = vrot.slane %v2031_v45, %v9851_v3 }
 0x1ca   : > { %8951 = vmatprep.subr.bf16.mxu1 %v12331_v46  ;;  %v2466_v19 = vrot.slane %v2452_v50, %v9851_v3  ;;  %v2518_v49 = vcombine.high %v2039_v27, %v9849_v2  ;;  %v2525_v53 = vrot.slane %v2039_v27, %v9851_v3  ;;  %v10675_v40 = vpack.i.b16 %v1902_v12, %v1901_v6  ;;  %v12365_v27 = vld [vmem:[#allocation17_spill] sm:$0xff] }
 0x1cb   : > { %v2517_v44 = vrot.slane %v2503_v7, %v9851_v3  ;;  %v10677_v17 = vpack.i.b16 %v3046_v20, %v3045_v28  ;;  %v10681_v45 = vcombine.high %v10629_v31, %v12330_v21  ;;  %v2467_v33 = vcombine.low %v2444_v26, %v2459_v48  ;;  %v10695_v7 = vpop.f32.mrb[40].mxu1 }
 0x1cc   : > { %v2468_v18 = vcombine.high %v2444_v26, %v2459_v48  ;;  %v2483_v22 = vcombine.low %v2451_v15, %v2466_v19  ;;  %v2484_v60 = vcombine.high %v2451_v15, %v2466_v19  ;;  %v2532_v50 = vrot.slane %v2518_v49, %v9851_v3  ;;  %v10693_v15 = vpop.f32.mrb[40].mxu0 }
 0x1cd   : > { %v2533_v23 = vcombine.low %v2510_v47, %v2525_v53  ;;  %v2534_v54 = vcombine.high %v2510_v47, %v2525_v53  ;;  %v2475_v28 = vrot.slane %v2467_v33, %v9853_v13  ;;  %v1909_v33 = vshrl.u32 %v10634_v57, 16 }
 0x1ce   : > { %8936 = vmatmul.mubr.bf16.vlgmr.msra.gmra.mrb[76].mxu0 %v1891_v52  ;;  %v2482_v20 = vrot.slane %v2468_v18, %v9853_v13  ;;  %v2491_v12 = vrot.slane %v2483_v22, %v9853_v13  ;;  %v2498_v26 = vrot.slane %v2484_v60, %v9853_v13  ;;  %v2549_v52 = vcombine.low %v2517_v44, %v2532_v50  ;;  %v10704_v18 = vpop.f32.mrb[41].mxu0  ;;  %v10706_v22 = vpop.f32.mrb[41].mxu1 }
 0x1cf   : > { %8946 = vmatpush3.bf16.xpose.msra.mxu0 %v3035_v42  ;;  %8947 = vmatprep.mubr.msk.bf16.mxu0 %vm9603_vm1, %v12331_v46  ;;  %v2541_v0 = vrot.slane %v2533_v23, %v9853_v13  ;;  %v2548_v41 = vrot.slane %v2534_v54, %v9853_v13  ;;  %v2550_v47 = vcombine.high %v2517_v44, %v2532_v50  ;;  %v10710_v9 = vpop.f32.mrb[42].mxu0  ;;  %v10712_v42 = vpop.f32.mrb[42].mxu1 }
 0x1d0   : > { %8942 = vmatmul.mubr.bf16.vlgmr.msra.gmra.mrb[76].mxu1 %v10603_v43  ;;  %8957 = vmatprep.subr.bf16.mxu0 %v12331_v46  ;;  %v2869_v6 = vcombine.low %v2475_v28, %v2482_v20  ;;  %v8644_v8 = vcombine.high %v2475_v28, %v2482_v20  ;;  %v10718_v54 = vrot.slane %v2549_v52, %v9853_v13  ;;  %v1910_v43 = vshrl.u32 %v10681_v45, 16  ;;  %v10721_v19 = vpop.f32.mrb[43].mxu0  ;;  %v10723_v49 = vpop.f32.mrb[43].mxu1 }
 0x1d1   : > { %8952 = vmatpush3.bf16.xpose.msra.mxu1 %v10590_v35  ;;  %8953 = vmatprep.mubr.msk.bf16.mxu1 %vm9603_vm1, %v12331_v46  ;;  %v2894_v23 = vcombine.low %v2541_v0, %v2548_v41  ;;  %v8645_v48 = vcombine.high %v2541_v0, %v2548_v41  ;;  %v10726_v53 = vrot.slane %v2550_v47, %v9853_v13  ;;  %v12364_v41 = vld [vmem:[#allocation16_spill] sm:$0xff] }
 0x1d2   : > { %v2876_v44 = vrot.slane %v2869_v6, %v9851_v3  ;;  %v2919_v35 = vcombine.low %v2491_v12, %v2498_v26  ;;  %8963 = vmatprep.subr.bf16.mxu1 %v12331_v46  ;;  %v2884_v60 = vrot.slane %v8644_v8, %v9851_v3  ;;  %v8646_v28 = vcombine.high %v2491_v12, %v2498_v26 }
 0x1d3   : > { %v2901_v50 = vrot.slane %v2894_v23, %v9851_v3  ;;  %v2842_v20 = vrot.slane %v2835_v29, %v9853_v13  ;;  %v2909_v0 = vrot.slane %v8645_v48, %v9851_v3  ;;  %v12357_v47 = vcombine.low %v10475_v51, %v10479_v4  ;;  %v12360_v23 = vld [vmem:[#allocation13_spill] sm:$0xff]  ;;  %v12361_v48 = vld [vmem:[#allocation14_spill] sm:$0xff] }
 0x1d4   : > { %v10747_v12 = vrot.slane %v2919_v35, %v9851_v3  ;;  %v10750_v26 = vrot.slane %v8646_v28, %v9851_v3  ;;  %v12358_v58 = vcombine.high %v10475_v51, %v10479_v4  ;;  %v1911_v29 = vpack.i.b16 %v1910_v43, %v1909_v33  ;;  %v10775_v43 = vpop.f32.mrb[44].mxu0  ;;  %v10777_v33 = vpop.f32.mrb[44].mxu1 }
 0x1d5   : > { %v2851_v6 = vrot.slane %v12357_v47, %v9851_v3  ;;  %v12359_v8 = vpack.i.b16 %v10629_v31, %v10582_v59  ;;  %v12362_v47 = vcombine.low %v12360_v23, %v12361_v48  ;;  %v12363_v35 = vcombine.high %v12360_v23, %v12361_v48  ;;  %12368 = vst [vmem:[#allocation15_spill] sm:$0xff] %v10775_v43 }
 0x1d6   : > { %v2859_v63 = vrot.slane %v12358_v58, %v9851_v3  ;;  %v12366_v51 = vcombine.low %v12364_v41, %v12365_v27  ;;  %v12367_v59 = vcombine.high %v12364_v41, %v12365_v27  ;;  %12369 = vst [vmem:[#allocation21_spill] sm:$0xff] %v10777_v33  ;;  %v12370_v58 = vpack.i.b16 %v10613_v39, %v10609_v36  ;;  %v10789_v27 = vpop.f32.mrb[45].mxu1 }
 0x1d7   : > { %8948 = vmatmul.mubr.bf16.vlgmr.msra.gmra.mrb[80].mxu0 %v12359_v8  ;;  %v1690_v52 = vrot.slane %v12362_v47, %v9851_v3  ;;  %v1698_v28 = vrot.slane %v12363_v35, %v9851_v3  ;;  %v10785_v23 = vcombine.high %v2842_v20, %v12330_v21  ;;  %v2885_v48 = vcombine.low %v2876_v44, %v2884_v60  ;;  %v10787_v47 = vpop.f32.mrb[45].mxu0 }
 0x1d8   : > { %v1715_v4 = vrot.slane %v12366_v51, %v9851_v3  ;;  %v1723_v31 = vrot.slane %v12367_v59, %v9851_v3  ;;  %8958 = vmatpush3.bf16.xpose.msra.mxu0 %v12370_v58  ;;  %8959 = vmatprep.mubr.msk.bf16.mxu0 %vm9603_vm1, %v12331_v46  ;;  %v2860_v8 = vcombine.low %v2851_v6, %v2859_v63  ;;  %v3053_v41 = vshrl.u32 %v2842_v20, 16  ;;  %v10793_v51 = vpop.f32.mrb[46].mxu0  ;;  %v10795_v59 = vpop.f32.mrb[46].mxu1 }
 0x1d9   : > { %12371 = vst [vmem:[#allocation18_spill] sm:$0xff] %v10787_v47  ;;  %12372 = vst [vmem:[#allocation22_spill] sm:$0xff] %v10789_v27  ;;  %8954 = vmatmul.mubr.bf16.vlgmr.msra.gmra.mrb[80].mxu1 %v10675_v40  ;;  %8969 = vmatprep.subr.bf16.mxu0 %v12331_v46  ;;  %v1699_v35 = vcombine.low %v1690_v52, %v1698_v28  ;;  %v2910_v39 = vcombine.low %v2901_v50, %v2909_v0  ;;  %v3061_v60 = vshrl.u32 %v10785_v23, 16  ;;  %v12375_v52 = vld [vmem:[#allocation32_spill] sm:$0xff]  ;;  %v10807_v50 = vpop.f32.mrb[47].mxu0 }
 0x1da   : > { %v1724_v36 = vcombine.low %v1715_v4, %v1723_v31  ;;  %12373 = vst [vmem:[#allocation19_spill] sm:$0xff] %v10793_v51  ;;  %12374 = vst [vmem:[#allocation23_spill] sm:$0xff] %v10795_v59  ;;  %8964 = vmatpush3.bf16.xpose.msra.mxu1 %v10677_v17  ;;  %8965 = vmatprep.mubr.msk.bf16.mxu1 %vm9603_vm1, %v12331_v46  ;;  %v2867_v44 = vrot.slane %v2860_v8, %v9853_v13  ;;  %v12377_v28 = vld [vmem:[#allocation28_spill] sm:$0xff]  ;;  %v12378_v4 = vld [vmem:[#allocation29_spill] sm:$0xff] }
 0x1db   : > { %v10803_v40 = vrot.slane %v2885_v48, %v9853_v13  ;;  %v1749_v6 = vcombine.low %v12375_v52, %v10623_v10  ;;  %12376 = vst [vmem:[#allocation20_spill] sm:$0xff] %v10807_v50  ;;  %8975 = vmatprep.subr.bf16.mxu1 %v12331_v46  ;;  %v1706_v0 = vrot.slane %v1699_v35, %v9853_v13 }
 0x1dc   : > { %v1731_v17 = vrot.slane %v1724_v36, %v9853_v13  ;;  %v10813_v63 = vrot.slane %v2910_v39, %v9853_v13  ;;  %v12379_v31 = vcombine.low %v12377_v28, %v12378_v4  ;;  %v3051_v8 = vpack.i.b16 %v2867_v44, %v2842_v20 }
 0x1dd   : > { %v3054_v48 = vshrl.u32 %v2867_v44, 16  ;;  %v2868_v10 = vcombine.high %v2867_v44, %v12330_v21  ;;  %v3069_v52 = vshrl.u32 %v10803_v40, 16  ;;  %v1917_v59 = vshrl.u32 %v1706_v0, 16 }
 0x1de   : > { %v1765_v58 = vrot.slane %v12379_v31, %v9851_v3  ;;  %v1915_v27 = vpack.i.b16 %v1731_v17, %v1706_v0  ;;  %v1918_v33 = vshrl.u32 %v1731_v17, 16  ;;  %v10822_v35 = vcombine.high %v1706_v0, %v12330_v21 }
 0x1df   : > { %v3055_v36 = vpack.i.b16 %v3054_v48, %v3053_v41  ;;  %v3059_v39 = vpack.i.b16 %v2868_v10, %v10785_v23  ;;  %v3062_v50 = vshrl.u32 %v2868_v10, 16  ;;  %v10826_v47 = vcombine.high %v1731_v17, %v12330_v21 }
 0x1e0   : > { %v12380_v20 = vpack.i.b16 %v10681_v45, %v10634_v57  ;;  %v1919_v44 = vpack.i.b16 %v1918_v33, %v1917_v59  ;;  %v1925_v51 = vshrl.u32 %v10822_v35, 16  ;;  %v3070_v0 = vshrl.u32 %v10813_v63, 16 }
 0x1e1   : > { %v3063_v23 = vpack.i.b16 %v3062_v50, %v3061_v60  ;;  %v1926_v17 = vshrl.u32 %v10826_v47, 16  ;;  %v10841_v57 = vrot.slane %v1749_v6, %v9853_v13  ;;  %8966 = vmatmul.mubr.bf16.vlgmr.msra.gmra.mrb[84].mxu1 %v1911_v29  ;;  %v12381_v33 = vcombine.high %v12377_v28, %v12378_v4 }
 0x1e2   : > { %8960 = vmatmul.mubr.bf16.vlgmr.msra.gmra.mrb[84].mxu0 %v12380_v20  ;;  %v10844_v45 = vpack.i.b16 %v3070_v0, %v3069_v52  ;;  %v10852_v60 = vcombine.high %v10803_v40, %v12330_v21  ;;  %8976 = vmatpush3.bf16.xpose.msra.mxu1 %v3055_v36  ;;  %v10860_v29 = vcombine.high %v10813_v63, %v12330_v21 }
 0x1e3   : > { %8970 = vmatpush3.bf16.xpose.msra.mxu0 %v3051_v8  ;;  %8971 = vmatprep.mubr.msk.bf16.mxu0 %vm9603_vm1, %v12331_v46  ;;  %v1773_v59 = vrot.slane %v12381_v33, %v9851_v3  ;;  %v10856_v6 = vpack.i.b16 %v1926_v17, %v1925_v51  ;;  %v10864_v50 = vcombine.high %v10841_v57, %v12330_v21  ;;  %v1933_v52 = vshrl.u32 %v10841_v57, 16  ;;  %v12385_v17 = vld [vmem:[#allocation27_spill] sm:$0xff] }
 0x1e4   : > { %8981 = vmatprep.subr.bf16.mxu0 %v12331_v46  ;;  %8977 = vmatprep.mubr.msk.bf16.mxu1 %vm9603_vm1, %v12331_v46  ;;  %v3077_v4 = vshrl.u32 %v10852_v60, 16  ;;  %v2935_v8 = vcombine.low %v10747_v12, %v10750_v26  ;;  %v12382_v51 = vcombine.low %v10718_v54, %v10726_v53  ;;  %v3078_v36 = vshrl.u32 %v10860_v29, 16  ;;  %v12384_v26 = vld [vmem:[#allocation26_spill] sm:$0xff] }
 0x1e5   : > { %8987 = vmatprep.subr.bf16.mxu1 %v12331_v46  ;;  %v1774_v28 = vcombine.low %v1765_v58, %v1773_v59  ;;  %v12383_v58 = vcombine.high %v10718_v54, %v10726_v53  ;;  %v12386_v33 = vcombine.low %v12384_v26, %v12385_v17  ;;  %v12388_v53 = vld [vmem:[#allocation30_spill] sm:$0xff] }
 0x1e6   : > { %v2951_v48 = vrot.slane %v12382_v51, %v9851_v3  ;;  %v10886_v12 = vrot.slane %v2935_v8, %v9853_v13  ;;  %v12387_v51 = vcombine.high %v12384_v26, %v12385_v17  ;;  %v10896_v31 = vpack.i.b16 %v3078_v36, %v3077_v4 }
 0x1e7   : > { %v2959_v20 = vrot.slane %v12383_v58, %v9851_v3  ;;  %v10883_v0 = vrot.slane %v1774_v28, %v9853_v13  ;;  %v1790_v59 = vrot.slane %v12386_v33, %v9851_v3  ;;  %v12389_v28 = vld [vmem:[#allocation31_spill] sm:$0xff] }
 0x1e8   : > { %v1798_v10 = vrot.slane %v12387_v51, %v9851_v3  ;;  %v12390_v58 = vcombine.low %v12388_v53, %v12389_v28  ;;  %v12391_v8 = vcombine.high %v12388_v53, %v12389_v28  ;;  %v10928_v28 = vcombine.high %v10886_v12, %v12330_v21 }
 0x1e9   : > { %v2960_v54 = vcombine.low %v2951_v48, %v2959_v20  ;;  %v1934_v26 = vshrl.u32 %v10883_v0, 16  ;;  %v10911_v4 = vcombine.high %v10883_v0, %v12330_v21  ;;  %v1941_v48 = vshrl.u32 %v10864_v50, 16  ;;  %8978 = vmatmul.mubr.bf16.vlgmr.msra.gmra.mrb[88].mxu1 %v1919_v44 }
 0x1ea   : > { %v1815_v41 = vrot.slane %v12390_v58, %v9851_v3  ;;  %v1823_v43 = vrot.slane %v12391_v8, %v9851_v3  ;;  %8972 = vmatmul.mubr.bf16.vlgmr.msra.gmra.mrb[88].mxu0 %v1915_v27  ;;  %v3085_v27 = vshrl.u32 %v10886_v12, 16  ;;  %v1799_v20 = vcombine.low %v1790_v59, %v1798_v10  ;;  %8988 = vmatpush3.bf16.xpose.msra.mxu1 %v3063_v23 }
 0x1eb   : > { %8982 = vmatpush3.bf16.xpose.msra.mxu0 %v3059_v39  ;;  %8983 = vmatprep.mubr.msk.bf16.mxu0 %vm9603_vm1, %v12331_v46  ;;  %v10917_v36 = vrot.slane %v2960_v54, %v9853_v13  ;;  %v10921_v51 = vpack.i.b16 %v1934_v26, %v1933_v52  ;;  %v1942_v39 = vshrl.u32 %v10911_v4, 16  ;;  %v10941_v52 = vpop.f32.mrb[47].mxu1  ;;  %v3093_v54 = vshrl.u32 %v10928_v28, 16 }
 0x1ec   : > { %v1824_v17 = vcombine.low %v1815_v41, %v1823_v43  ;;  %8993 = vmatprep.subr.bf16.mxu0 %v12331_v46  ;;  %8989 = vmatprep.mubr.msk.bf16.mxu1 %vm9603_vm1, %v12331_v46  ;;  %v10936_v41 = vrot.slane %v1799_v20, %v9853_v13  ;;  %v3097_v58 = vpack.c.bf16 %v10584_v34, %v10563_v24 }
 0x1ed   : > { %v3086_v44 = vshrl.u32 %v10917_v36, 16  ;;  %8999 = vmatprep.subr.bf16.mxu1 %v12331_v46  ;;  %v10944_v59 = vpack.i.b16 %v1942_v39, %v1941_v48  ;;  %v10948_v23 = vcombine.high %v10917_v36, %v12330_v21  ;;  %v3099_v26 = vpack.c.bf16 %v10586_v1, %v10565_v30 }
 0x1ee   : > { %v10939_v10 = vrot.slane %v1824_v17, %v9853_v13  ;;  %v1949_v20 = vshrl.u32 %v10936_v41, 16  ;;  %v10964_v43 = vcombine.high %v10936_v41, %v12330_v21  ;;  %v12392_v48 = vpack.i.b16 %v10826_v47, %v10822_v35 }
 0x1ef   : > { %v10953_v8 = vpack.i.b16 %v3086_v44, %v3085_v27  ;;  %v3094_v39 = vshrl.u32 %v10948_v23, 16  ;;  %v3117_v27 = vshrl.u32 %v3097_v58, 16  ;;  %v3098_v44 = vpack.c.bf16 %v10598_v5, %v10573_v37 }
 0x1f0   : > { %v1950_v17 = vshrl.u32 %v10939_v10, 16  ;;  %v10968_v24 = vcombine.high %v10939_v10, %v12330_v21  ;;  %v1957_v21 = vshrl.u32 %v10964_v43, 16  ;;  %v3125_v1 = vshrl.u32 %v3099_v26, 16 }
 0x1f1   : > { %v10979_v53 = vpack.i.b16 %v3094_v39, %v3093_v54  ;;  %v3115_v30 = vpack.i.b16 %v3098_v44, %v3097_v58  ;;  %v3118_v37 = vshrl.u32 %v3098_v44, 16  ;;  %v3100_v5 = vpack.c.bf16 %v10600_v62, %v10575_v38  ;;  %8990 = vmatmul.mubr.bf16.vlgmr.msra.gmra.mrb[92].mxu1 %v10856_v6 }
 0x1f2   : > { %v10970_v34 = vpack.i.b16 %v1950_v17, %v1949_v20  ;;  %8984 = vmatmul.mubr.bf16.vlgmr.msra.gmra.mrb[92].mxu0 %v12392_v48  ;;  %v1955_v33 = vpack.i.b16 %v10968_v24, %v10964_v43  ;;  %v1958_v20 = vshrl.u32 %v10968_v24, 16  ;;  %v12393_v17 = vpack.i.b16 %v10813_v63, %v10803_v40  ;;  %9000 = vmatpush3.bf16.xpose.msra.mxu1 %v10844_v45 }
 0x1f3   : > { %8995 = vmatprep.mubr.msk.bf16.mxu0 %vm9603_vm1, %v12331_v46  ;;  %v3101_v35 = vpack.c.bf16 %v10655_v25, %v10638_v32  ;;  %v3102_v40 = vpack.c.bf16 %v10665_v11, %v10648_v16  ;;  %9001 = vmatprep.mubr.msk.bf16.mxu1 %vm9603_vm1, %v12331_v46  ;;  %v3119_v63 = vpack.i.b16 %v3118_v37, %v3117_v27  ;;  %v3126_v6 = vshrl.u32 %v3100_v5, 16 }
 0x1f4   : > { %8994 = vmatpush3.bf16.xpose.msra.mxu0 %v12393_v17  ;;  %v10994_v47 = vpack.i.b16 %v1958_v20, %v1957_v21  ;;  %v3177_v38 = vcombine.high %v3115_v30, %v9849_v2  ;;  %v3184_v62 = vrot.slane %v3115_v30, %v9851_v3  ;;  %9011 = vmatprep.subr.bf16.mxu1 %v12331_v46 }
 0x1f5   : > { %9005 = vmatprep.subr.bf16.mxu0 %v12331_v46  ;;  %v3123_v21 = vpack.i.b16 %v3100_v5, %v3099_v26  ;;  %v3133_v54 = vshrl.u32 %v3101_v35, 16  ;;  %v3131_v58 = vpack.i.b16 %v3102_v40, %v3101_v35  ;;  %v3134_v32 = vshrl.u32 %v3102_v40, 16 }
 0x1f6   : > { %v3243_v25 = vcombine.high %v3119_v63, %v9849_v2  ;;  %v3250_v16 = vrot.slane %v3119_v63, %v9851_v3  ;;  %v3127_v11 = vpack.i.b16 %v3126_v6, %v3125_v1  ;;  %v3191_v45 = vrot.slane %v3177_v38, %v9851_v3 }
 0x1f7   : > { %v3192_v48 = vcombine.high %v3123_v21, %v9849_v2  ;;  %v3199_v39 = vrot.slane %v3123_v21, %v9851_v3  ;;  %v11011_v27 = vpack.i.b16 %v3134_v32, %v3133_v54  ;;  %v3309_v17 = vcombine.high %v3131_v58, %v9849_v2 }
 0x1f8   : > { %v3257_v44 = vrot.slane %v3243_v25, %v9851_v3  ;;  %v3258_v26 = vcombine.high %v3127_v11, %v9849_v2  ;;  %v3265_v20 = vrot.slane %v3127_v11, %v9851_v3  ;;  %v12394_v30 = vpack.i.b16 %v10883_v0, %v10841_v57 }
 0x1f9   : > { %v3206_v37 = vrot.slane %v3192_v48, %v9851_v3  ;;  %v3207_v1 = vcombine.low %v3184_v62, %v3199_v39  ;;  %v3208_v5 = vcombine.high %v3184_v62, %v3199_v39  ;;  %v11022_v35 = vrot.slane %v3131_v58, %v9851_v3  ;;  %9002 = vmatmul.mubr.bf16.vlgmr.msra.gmra.mrb[96].mxu1 %v10921_v51 }
 0x1fa   : > { %v12395_v40 = vpack.i.b16 %v10860_v29, %v10852_v60  ;;  %v3272_v63 = vrot.slane %v3258_v26, %v9851_v3  ;;  %v3273_v38 = vcombine.low %v3250_v16, %v3265_v20  ;;  %v3274_v6 = vcombine.high %v3250_v16, %v3265_v20  ;;  %9012 = vmatpush3.bf16.xpose.msra.mxu1 %v10896_v31 }
 0x1fb   : > { %8996 = vmatmul.mubr.bf16.vlgmr.msra.gmra.mrb[96].mxu0 %v12394_v30  ;;  %v3215_v57 = vrot.slane %v3207_v1, %v9853_v13  ;;  %v3222_v0 = vrot.slane %v3208_v5, %v9853_v13  ;;  %v3223_v62 = vcombine.low %v3191_v45, %v3206_v37  ;;  %9013 = vmatprep.mubr.msk.bf16.mxu1 %vm9603_vm1, %v12331_v46 }
 0x1fc   : > { %9006 = vmatpush3.bf16.xpose.msra.mxu0 %v12395_v40  ;;  %9007 = vmatprep.mubr.msk.bf16.mxu0 %vm9603_vm1, %v12331_v46  ;;  %v3224_v60 = vcombine.high %v3191_v45, %v3206_v37  ;;  %v11038_v29 = vrot.slane %v3273_v38, %v9853_v13  ;;  %v11041_v21 = vrot.slane %v3274_v6, %v9853_v13 }
 0x1fd   : > { %9017 = vmatprep.subr.bf16.mxu0 %v12331_v46  ;;  %9023 = vmatprep.subr.bf16.mxu1 %v12331_v46  ;;  %v11045_v51 = vrot.slane %v3223_v62, %v9853_v13  ;;  %v3289_v54 = vcombine.low %v3257_v44, %v3272_v63  ;;  %v3290_v58 = vcombine.high %v3257_v44, %v3272_v63 }
 0x1fe   : > { %v3705_v32 = vcombine.low %v3215_v57, %v3222_v0  ;;  %v11048_v31 = vrot.slane %v3224_v60, %v9853_v13  ;;  %v8648_v25 = vcombine.high %v3215_v57, %v3222_v0  ;;  %v3730_v16 = vcombine.low %v11038_v29, %v11041_v21 }
 0x1ff   : > { %v8649_v11 = vcombine.high %v11038_v29, %v11041_v21  ;;  %v11055_v45 = vrot.slane %v3289_v54, %v9853_v13  ;;  %v11058_v48 = vrot.slane %v3290_v58, %v9853_v13  ;;  %v11064_v44 = vrot.slane %v3309_v17, %v9851_v3 }
 0x200   : > { %v11061_v39 = vrot.slane %v3705_v32, %v9851_v3  ;;  %v11067_v26 = vrot.slane %v8648_v25, %v9851_v3  ;;  %v3755_v20 = vcombine.low %v11045_v51, %v11048_v31  ;;  %v8650_v30 = vcombine.high %v11045_v51, %v11048_v31 }
 0x201   : > { %v3375_v37 = vcombine.high %v11011_v27, %v9849_v2  ;;  %v12396_v1 = vpack.i.b16 %v10911_v4, %v10864_v50  ;;  %v3780_v17 = vcombine.low %v11055_v45, %v11058_v48  ;;  %v8651_v5 = vcombine.high %v11055_v45, %v11058_v48  ;;  %9014 = vmatmul.mubr.bf16.vlgmr.msra.gmra.mrb[100].mxu1 %v10944_v59 }
 0x202   : > { %v3382_v40 = vrot.slane %v11011_v27, %v9851_v3  ;;  %v3103_v63 = vpack.c.bf16 %v10657_v61, %v10640_v55  ;;  %v12397_v38 = vpack.i.b16 %v10917_v36, %v10886_v12  ;;  %v3104_v50 = vpack.c.bf16 %v10667_v56, %v10650_v14  ;;  %v12398_v36 = vld [vmem:[#allocation15_spill] sm:$0xff]  ;;  %9024 = vmatpush3.bf16.xpose.msra.mxu1 %v10953_v8 }
 0x203   : > { %9008 = vmatmul.mubr.bf16.vlgmr.msra.gmra.mrb[100].mxu0 %v12396_v1  ;;  %v3105_v4 = vpack.c.bf16 %v10710_v9, %v10693_v15  ;;  %v3106_v6 = vpack.c.bf16 %v10721_v19, %v10704_v18  ;;  %v3107_v61 = vpack.c.bf16 %v10712_v42, %v10695_v7  ;;  %v3108_v12 = vpack.c.bf16 %v10723_v49, %v10706_v22  ;;  %v12399_v27 = vld [vmem:[#allocation19_spill] sm:$0xff] }
 0x204   : > { %9018 = vmatpush3.bf16.xpose.msra.mxu0 %v12397_v38  ;;  %9019 = vmatprep.mubr.msk.bf16.mxu0 %vm9603_vm1, %v12331_v46  ;;  %v3141_v55 = vshrl.u32 %v3103_v63, 16  ;;  %v11105_v14 = vpack.c.bf16 %v12399_v27, %v12398_v36  ;;  %v3139_v56 = vpack.i.b16 %v3104_v50, %v3103_v63  ;;  %v3142_v15 = vshrl.u32 %v3104_v50, 16 }
 0x205   : > { %9029 = vmatprep.subr.bf16.mxu0 %v12331_v46  ;;  %9025 = vmatprep.mubr.msk.bf16.mxu1 %vm9603_vm1, %v12331_v46  ;;  %v3149_v18 = vshrl.u32 %v3105_v4, 16  ;;  %v3147_v9 = vpack.i.b16 %v3106_v6, %v3105_v4  ;;  %v3150_v19 = vshrl.u32 %v3106_v6, 16  ;;  %v3157_v7 = vshrl.u32 %v3107_v61, 16 }
 0x206   : > { %9035 = vmatprep.subr.bf16.mxu1 %v12331_v46  ;;  %v3155_v42 = vpack.i.b16 %v3108_v12, %v3107_v61  ;;  %v3158_v59 = vshrl.u32 %v3108_v12, 16  ;;  %v3143_v22 = vpack.i.b16 %v3142_v15, %v3141_v55  ;;  %v3324_v49 = vcombine.high %v3139_v56, %v9849_v2 }
 0x207   : > { %v3331_v57 = vrot.slane %v3139_v56, %v9851_v3  ;;  %v3441_v8 = vcombine.high %v3147_v9, %v9849_v2  ;;  %v3389_v0 = vrot.slane %v3375_v37, %v9851_v3  ;;  %v3151_v62 = vpack.i.b16 %v3150_v19, %v3149_v18 }
 0x208   : > { %v3448_v60 = vrot.slane %v3147_v9, %v9851_v3  ;;  %v3159_v54 = vpack.i.b16 %v3158_v59, %v3157_v7  ;;  %v3338_v58 = vrot.slane %v3324_v49, %v9851_v3  ;;  %v3390_v1 = vcombine.high %v3143_v22, %v9849_v2 }
 0x209   : > { %v3339_v32 = vcombine.low %v11022_v35, %v3331_v57  ;;  %v3340_v25 = vcombine.high %v11022_v35, %v3331_v57  ;;  %v12400_v63 = vpack.i.b16 %v10939_v10, %v10936_v41  ;;  %v3397_v38 = vrot.slane %v3143_v22, %v9851_v3  ;;  %9026 = vmatmul.mubr.bf16.vlgmr.msra.gmra.mrb[104].mxu1 %v10970_v34 }
 0x20a   : > { %v3455_v37 = vrot.slane %v3441_v8, %v9851_v3  ;;  %v3507_v50 = vcombine.high %v3151_v62, %v9849_v2  ;;  %v3456_v4 = vcombine.high %v3155_v42, %v9849_v2  ;;  %v12401_v6 = vpack.i.b16 %v10948_v23, %v10928_v28  ;;  %9036 = vmatpush3.bf16.xpose.msra.mxu1 %v10979_v53 }
 0x20b   : > { %9020 = vmatmul.mubr.bf16.vlgmr.msra.gmra.mrb[104].mxu0 %v12400_v63  ;;  %v11133_v35 = vrot.slane %v3339_v32, %v9853_v13  ;;  %v11136_v41 = vrot.slane %v3340_v25, %v9853_v13  ;;  %v3355_v10 = vcombine.low %v11064_v44, %v3338_v58  ;;  %v3356_v55 = vcombine.high %v11064_v44, %v3338_v58  ;;  %v12402_v32 = vld [vmem:[#allocation18_spill] sm:$0xff]  ;;  %v12403_v25 = vld [vmem:[#allocation20_spill] sm:$0xff]  ;;  %v12404_v63 = vld [vmem:[#allocation21_spill] sm:$0xff] }
 0x20c   : > { %9030 = vmatpush3.bf16.xpose.msra.mxu0 %v12401_v6  ;;  %9031 = vmatprep.mubr.msk.bf16.mxu0 %vm9603_vm1, %v12331_v46  ;;  %v3404_v61 = vrot.slane %v3390_v1, %v9851_v3  ;;  %v3405_v12 = vcombine.low %v3382_v40, %v3397_v38  ;;  %v3406_v28 = vcombine.high %v3382_v40, %v3397_v38  ;;  %v3165_v9 = vshrl.u32 %v11105_v14, 16  ;;  %v12405_v38 = vld [vmem:[#allocation23_spill] sm:$0xff] }
 0x20d   : > { %9037 = vmatprep.mubr.msk.bf16.mxu1 %vm9603_vm1, %v12331_v46  ;;  %v11146_v23 = vrot.slane %v3355_v10, %v9853_v13  ;;  %v3805_v36 = vcombine.low %v11133_v35, %v11136_v41  ;;  %v8652_v34 = vcombine.high %v11133_v35, %v11136_v41  ;;  %v11153_v44 = vrot.slane %v3356_v55, %v9853_v13 }
 0x20e   : > { %v11156_v27 = vrot.slane %v3405_v12, %v9853_v13  ;;  %v11159_v53 = vrot.slane %v3406_v28, %v9853_v13  ;;  %v3421_v40 = vcombine.low %v3389_v0, %v3404_v61  ;;  %9041 = vmatprep.subr.bf16.mxu0 %v12331_v46  ;;  %v3422_v56 = vcombine.high %v3389_v0, %v3404_v61 }
 0x20f   : > { %v3514_v15 = vrot.slane %v3151_v62, %v9851_v3  ;;  %v3521_v18 = vrot.slane %v3507_v50, %v9851_v3  ;;  %9047 = vmatprep.subr.bf16.mxu1 %v12331_v46  ;;  %v3855_v22 = vcombine.low %v11146_v23, %v11153_v44  ;;  %v8654_v57 = vcombine.high %v11146_v23, %v11153_v44 }
 0x210   : > { %v11167_v19 = vrot.slane %v3421_v40, %v9853_v13  ;;  %v3830_v7 = vcombine.low %v11156_v27, %v11159_v53  ;;  %v8653_v59 = vcombine.high %v11156_v27, %v11159_v53  ;;  %v11176_v49 = vrot.slane %v3422_v56, %v9853_v13 }
 0x211   : > { %v3463_v8 = vrot.slane %v3155_v42, %v9851_v3  ;;  %v3470_v0 = vrot.slane %v3456_v4, %v9851_v3  ;;  %v3522_v62 = vcombine.high %v3159_v54, %v9849_v2  ;;  %v3529_v58 = vrot.slane %v3159_v54, %v9851_v3  ;;  %9038 = vmatmul.mubr.bf16.vlgmr.msra.gmra.mrb[108].mxu1 %v10994_v47 }
 0x212   : > { %v3110_v1 = vpack.c.bf16 %v12403_v25, %v12402_v32  ;;  %v3111_v50 = vpack.c.bf16 %v12405_v38, %v12404_v63  ;;  %v3880_v6 = vcombine.low %v11167_v19, %v11176_v49  ;;  %v8655_v42 = vcombine.high %v11167_v19, %v11176_v49  ;;  %9049 = vmatprep.mubr.msk.bf16.mxu1 %vm9603_vm1, %v12331_v46 }
 0x213   : > { %9032 = vmatmul.mubr.bf16.vlgmr.msra.gmra.mrb[108].mxu0 %v1955_v33  ;;  %v3471_v4 = vcombine.low %v3448_v60, %v3463_v8  ;;  %v3472_v10 = vcombine.high %v3448_v60, %v3463_v8  ;;  %v3487_v33 = vcombine.low %v3455_v37, %v3470_v0  ;;  %v3488_v43 = vcombine.high %v3455_v37, %v3470_v0 }
 0x214   : > { %9043 = vmatprep.mubr.msk.bf16.mxu0 %vm9603_vm1, %v12331_v46  ;;  %v3536_v24 = vrot.slane %v3522_v62, %v9851_v3  ;;  %v3537_v54 = vcombine.low %v3514_v15, %v3529_v58  ;;  %v3538_v12 = vcombine.high %v3514_v15, %v3529_v58  ;;  %v3163_v28 = vpack.i.b16 %v3110_v1, %v11105_v14 }
 0x215   : > { %v11200_v55 = vrot.slane %v3471_v4, %v9853_v13  ;;  %v11203_v61 = vrot.slane %v3472_v10, %v9853_v13  ;;  %v11209_v60 = vrot.slane %v3487_v33, %v9853_v13  ;;  %v11212_v47 = vrot.slane %v3488_v43, %v9853_v13 }
 0x216   : > { %v11215_v37 = vrot.slane %v3537_v54, %v9853_v13  ;;  %v3553_v40 = vcombine.low %v3521_v18, %v3536_v24  ;;  %v11218_v56 = vrot.slane %v3538_v12, %v9853_v13  ;;  %v3554_v8 = vcombine.high %v3521_v18, %v3536_v24 }
 0x217   : > { %v3905_v14 = vcombine.low %v11200_v55, %v11203_v61  ;;  %v8656_v15 = vcombine.high %v11200_v55, %v11203_v61  ;;  %v3955_v62 = vcombine.low %v11209_v60, %v11212_v47  ;;  %v3166_v32 = vshrl.u32 %v3110_v1, 16  ;;  %v12406_v1 = vld [vmem:[#allocation22_spill] sm:$0xff] }
 0x218   : > { %v11225_v0 = vrot.slane %v3553_v40, %v9853_v13  ;;  %v11232_v25 = vrot.slane %v3554_v8, %v9853_v13  ;;  %v3930_v18 = vcombine.low %v11215_v37, %v11218_v56  ;;  %v8657_v63 = vcombine.high %v11215_v37, %v11218_v56 }
 0x219   : > { %v3167_v38 = vpack.i.b16 %v3166_v32, %v3165_v9  ;;  %v3573_v4 = vcombine.high %v3163_v28, %v9849_v2  ;;  %v3173_v43 = vshrl.u32 %v3111_v50, 16  ;;  %v3112_v24 = vpack.c.bf16 %v10941_v52, %v12406_v1 }
 0x21a   : > { %v3580_v54 = vrot.slane %v3163_v28, %v9851_v3  ;;  %v3721_v12 = vcombine.low %v11061_v39, %v11067_v26  ;;  %v3737_v9 = vrot.slane %v3730_v16, %v9851_v3  ;;  %v3745_v32 = vrot.slane %v8649_v11, %v9851_v3 }
 0x21b   : > { %v3171_v40 = vpack.i.b16 %v3112_v24, %v3111_v50  ;;  %v3174_v8 = vshrl.u32 %v3112_v24, 16  ;;  %v3587_v33 = vrot.slane %v3573_v4, %v9851_v3  ;;  %v3639_v52 = vcombine.high %v3167_v38, %v9849_v2 }
 0x21c   : > { %v3746_v26 = vcombine.low %v3737_v9, %v3745_v32  ;;  %v3646_v50 = vrot.slane %v3167_v38, %v9851_v3  ;;  %v3728_v24 = vrot.slane %v3721_v12, %v9853_v13  ;;  %v3820_v51 = vrot.slane %v8652_v34, %v9851_v3 }
 0x21d   : > { %v3175_v28 = vpack.i.b16 %v3174_v8, %v3173_v43  ;;  %v3588_v1 = vcombine.high %v3171_v40, %v9849_v2  ;;  %v3595_v39 = vrot.slane %v3171_v40, %v9851_v3  ;;  %v3653_v21 = vrot.slane %v3639_v52, %v9851_v3 }
 0x21e   : > { %v3753_v4 = vrot.slane %v3746_v26, %v9853_v13  ;;  %v12407_v31 = vmov 0   ;;  %v3912_v27 = vrot.slane %v3905_v14, %v9851_v3  ;;  %v3920_v53 = vrot.slane %v8656_v15, %v9851_v3 }
 0x21f   : > { %v3602_v16 = vrot.slane %v3588_v1, %v9851_v3  ;;  %v3603_v10 = vcombine.low %v3580_v54, %v3595_v39  ;;  %v3604_v58 = vcombine.high %v3580_v54, %v3595_v39  ;;  %v3654_v29 = vcombine.high %v3175_v28, %v9849_v2 }
 0x220   : > { %v3661_v11 = vrot.slane %v3175_v28, %v9851_v3  ;;  %v4107_v2 = vpack.i.b16 %v3753_v4, %v3728_v24  ;;  %v3895_v23 = vrot.slane %v8655_v42, %v9851_v3  ;;  %v3937_v55 = vrot.slane %v3930_v18, %v9851_v3 }
 0x221   : > { %v11268_v43 = vrot.slane %v3603_v10, %v9853_v13  ;;  %v11271_v38 = vrot.slane %v3604_v58, %v9853_v13  ;;  %v3619_v12 = vcombine.low %v3587_v33, %v3602_v16  ;;  %v3620_v40 = vcombine.high %v3587_v33, %v3602_v16 }
 0x222   : > { %v3668_v8 = vrot.slane %v3654_v29, %v9851_v3  ;;  %v3669_v54 = vcombine.low %v3646_v50, %v3661_v11  ;;  %v3670_v9 = vcombine.high %v3646_v50, %v3661_v11  ;;  %v4108_v16 = vshrl.u32 %v3728_v24, 16 }
 0x223   : > { %v11275_v32 = vrot.slane %v3619_v12, %v9853_v13  ;;  %v11278_v52 = vrot.slane %v3620_v40, %v9853_v13  ;;  %v4005_v10 = vcombine.low %v11268_v43, %v11271_v38  ;;  %v8660_v58 = vcombine.high %v11268_v43, %v11271_v38 }
 0x224   : > { %v11285_v28 = vrot.slane %v3669_v54, %v9853_v13  ;;  %v11288_v33 = vrot.slane %v3670_v9, %v9853_v13  ;;  %v3685_v1 = vcombine.low %v3653_v21, %v3668_v8  ;;  %v3686_v39 = vcombine.high %v3653_v21, %v3668_v8 }
 0x225   : > { %v4055_v26 = vcombine.low %v11275_v32, %v11278_v52  ;;  %v8662_v50 = vcombine.high %v11275_v32, %v11278_v52  ;;  %v5807_v21 = vsel %vm5805_vm2, %v4107_v2, 0  ;;  %v4109_v8 = vshrl.u32 %v3753_v4, 16 }
 0x226   : > { %v11295_v29 = vrot.slane %v3685_v1, %v9853_v13  ;;  %v11298_v11 = vrot.slane %v3686_v39, %v9853_v13  ;;  %v4030_v12 = vcombine.low %v11285_v28, %v11288_v33  ;;  %v8661_v40 = vcombine.high %v11285_v28, %v11288_v33  ;;  %9042 = vmatpush3.bf16.msra.mxu0 %v5807_v21 }
 0x227   : > { %v4110_v1 = vpack.i.b16 %v4109_v8, %v4108_v16  ;;  %9053 = vmatprep.subr.bf16.mxu0 %v12331_v46  ;;  %v3762_v2 = vrot.slane %v3755_v20, %v9851_v3  ;;  %v3770_v54 = vrot.slane %v8650_v30, %v9851_v3  ;;  %v3787_v16 = vrot.slane %v3780_v17, %v9851_v3 }
 0x228   : > { %v8663_v9 = vcombine.high %v11295_v29, %v11298_v11  ;;  %v3795_v21 = vrot.slane %v8651_v5, %v9851_v3  ;;  %v3812_v20 = vrot.slane %v3805_v36, %v9851_v3  ;;  %v11337_v30 = vcombine.high %v3728_v24, %v12407_v31 }
 0x229   : > { %v5853_v39 = vsel %vm5805_vm2, %v4110_v1, 0  ;;  %v3771_v8 = vcombine.low %v3762_v2, %v3770_v54  ;;  %v11340_v17 = vcombine.high %v3753_v4, %v12407_v31  ;;  %v3837_v5 = vrot.slane %v3830_v7, %v9851_v3 }
 0x22a   : > { %9048 = vmatpush3.bf16.msra.mxu1 %v5853_v39  ;;  %v3796_v1 = vcombine.low %v3787_v16, %v3795_v21  ;;  %v4114_v36 = vshrl.u32 %v11337_v30, 16  ;;  %v3821_v2 = vcombine.low %v3812_v20, %v3820_v51  ;;  %v3845_v20 = vrot.slane %v8653_v59, %v9851_v3 }
 0x22b   : > { %9059 = vmatprep.subr.bf16.mxu1 %v12331_v46  ;;  %v11343_v45 = vrot.slane %v3771_v8, %v9853_v13  ;;  %v4115_v35 = vshrl.u32 %v11340_v17, 16  ;;  %v3870_v7 = vrot.slane %v8654_v57, %v9851_v3  ;;  %v3887_v59 = vrot.slane %v3880_v6, %v9851_v3 }
 0x22c   : > { %v11346_v48 = vrot.slane %v3796_v1, %v9853_v13  ;;  %v11373_v41 = vrot.slane %v3821_v2, %v9853_v13  ;;  %v3945_v19 = vrot.slane %v8657_v63, %v9851_v3  ;;  %v4062_v28 = vrot.slane %v4055_v26, %v9851_v3 }
 0x22d   : > { %v4120_v34 = vshrl.u32 %v11343_v45, 16  ;;  %v11358_v4 = vcombine.high %v11343_v45, %v12407_v31  ;;  %v11364_v39 = vpack.i.b16 %v4115_v35, %v4114_v36  ;;  %v3862_v36 = vrot.slane %v3855_v22, %v9851_v3 }
 0x22e   : > { %v4121_v24 = vshrl.u32 %v11346_v48, 16  ;;  %v11362_v54 = vcombine.high %v11346_v48, %v12407_v31  ;;  %v3846_v35 = vcombine.low %v3837_v5, %v3845_v20  ;;  %v4132_v22 = vshrl.u32 %v11373_v41, 16 }
 0x22f   : > { %v4126_v8 = vshrl.u32 %v11358_v4, 16  ;;  %v3871_v57 = vcombine.low %v3862_v36, %v3870_v7  ;;  %v3896_v14 = vcombine.low %v3887_v59, %v3895_v23  ;;  %v3921_v5 = vcombine.low %v3912_v27, %v3920_v53 }
 0x230   : > { %v11366_v16 = vpack.i.b16 %v4121_v24, %v4120_v34  ;;  %v4127_v1 = vshrl.u32 %v11362_v54, 16  ;;  %v11391_v34 = vcombine.high %v11373_v41, %v12407_v31  ;;  %v11414_v44 = vrot.slane %v3846_v35, %v9853_v13 }
 0x231   : > { %v11434_v15 = vrot.slane %v3871_v57, %v9853_v13  ;;  %v11437_v18 = vrot.slane %v3896_v14, %v9853_v13  ;;  %v3946_v24 = vcombine.low %v3937_v55, %v3945_v19  ;;  %v11462_v53 = vrot.slane %v3921_v5, %v9853_v13 }
 0x232   : > { %v11383_v51 = vpack.i.b16 %v4127_v1, %v4126_v8  ;;  %v4138_v61 = vshrl.u32 %v11391_v34, 16  ;;  %v4133_v6 = vshrl.u32 %v11414_v44, 16  ;;  %v11431_v42 = vcombine.high %v11414_v44, %v12407_v31 }
 0x233   : > { %v4144_v8 = vshrl.u32 %v11434_v15, 16  ;;  %v4145_v1 = vshrl.u32 %v11437_v18, 16  ;;  %v11450_v20 = vcombine.high %v11434_v15, %v12407_v31  ;;  %v11456_v35 = vcombine.high %v11437_v18, %v12407_v31 }
 0x234   : > { %v11439_v2 = vpack.i.b16 %v4133_v6, %v4132_v22  ;;  %v4139_v56 = vshrl.u32 %v11431_v42, 16  ;;  %v3962_v59 = vrot.slane %v3955_v62, %v9851_v3  ;;  %v4012_v23 = vrot.slane %v4005_v10, %v9851_v3 }
 0x235   : > { %v11458_v7 = vpack.i.b16 %v4145_v1, %v4144_v8  ;;  %v4150_v27 = vshrl.u32 %v11450_v20, 16  ;;  %v4151_v57 = vshrl.u32 %v11456_v35, 16  ;;  %v11476_v55 = vrot.slane %v3946_v24, %v9853_v13 }
 0x236   : > { %v11452_v36 = vpack.i.b16 %v4139_v56, %v4138_v61  ;;  %v4020_v61 = vrot.slane %v8660_v58, %v9851_v3  ;;  %v4156_v62 = vshrl.u32 %v11462_v53, 16  ;;  %v11485_v14 = vcombine.high %v11462_v53, %v12407_v31 }
 0x237   : > { %v12408_v10 = vcombine.high %v11209_v60, %v11212_v47  ;;  %v11491_v6 = vpack.i.b16 %v4151_v57, %v4150_v27  ;;  %v4157_v24 = vshrl.u32 %v11476_v55, 16  ;;  %v11498_v43 = vcombine.high %v11476_v55, %v12407_v31 }
 0x238   : > { %v4162_v38 = vshrl.u32 %v11485_v14, 16  ;;  %v12409_v56 = vcombine.low %v11225_v0, %v11232_v25  ;;  %v12410_v8 = vcombine.high %v11225_v0, %v11232_v25  ;;  %v4045_v0 = vrot.slane %v8661_v40, %v9851_v3 }
 0x239   : > { %v3970_v19 = vrot.slane %v12408_v10, %v9851_v3  ;;  %v11505_v47 = vpack.i.b16 %v4157_v24, %v4156_v62  ;;  %v4163_v57 = vshrl.u32 %v11498_v43, 16  ;;  %v4037_v62 = vrot.slane %v4030_v12, %v9851_v3 }
 0x23a   : > { %v3987_v60 = vrot.slane %v12409_v56, %v9851_v3  ;;  %v3995_v1 = vrot.slane %v12410_v8, %v9851_v3  ;;  %v4070_v40 = vrot.slane %v8662_v50, %v9851_v3  ;;  %v12419_v52 = vcombine.low %v11295_v29, %v11298_v11 }
 0x23b   : > { %v3971_v58 = vcombine.low %v3962_v59, %v3970_v19  ;;  %v4021_v59 = vcombine.low %v4012_v23, %v4020_v61  ;;  %v11525_v25 = vpack.i.b16 %v4163_v57, %v4162_v38  ;;  %v4046_v12 = vcombine.low %v4037_v62, %v4045_v0 }
 0x23c   : > { %v3996_v19 = vcombine.low %v3987_v60, %v3995_v1  ;;  %v4071_v32 = vcombine.low %v4062_v28, %v4070_v40  ;;  %v4087_v50 = vrot.slane %v12419_v52, %v9851_v3  ;;  %v4095_v62 = vrot.slane %v8663_v9, %v9851_v3 }
 0x23d   : > { %v11515_v10 = vrot.slane %v3971_v58, %v9853_v13  ;;  %12412 = vst [vmem:[#allocation25_spill] sm:$0xff] %v11525_v25  ;;  %v11536_v61 = vrot.slane %v4021_v59, %v9853_v13  ;;  %v11555_v8 = vrot.slane %v4046_v12, %v9853_v13 }
 0x23e   : > { %v11533_v23 = vrot.slane %v3996_v19, %v9853_v13  ;;  %v4096_v9 = vcombine.low %v4087_v50, %v4095_v62 }
 0x23f   : > { %12411 = vst [vmem:[#allocation24_spill] sm:$0xff] %v11515_v10  ;;  %v4168_v24 = vshrl.u32 %v11515_v10, 16  ;;  %v11530_v58 = vcombine.high %v11515_v10, %v12407_v31  ;;  %12415 = vst [vmem:[#allocation16_spill] sm:$0xff] %v11536_v61  ;;  %v4180_v26 = vshrl.u32 %v11536_v61, 16  ;;  %v11560_v1 = vcombine.high %v11536_v61, %v12407_v31 }
 0x240   : > { %12414 = vst [vmem:[#allocation14_spill] sm:$0xff] %v11533_v23  ;;  %v4169_v56 = vshrl.u32 %v11533_v23, 16  ;;  %v11552_v60 = vcombine.high %v11533_v23, %v12407_v31  ;;  %12417 = vst [vmem:[#allocation32_spill] sm:$0xff] %v11555_v8  ;;  %v4181_v12 = vshrl.u32 %v11555_v8, 16  ;;  %v11580_v28 = vcombine.high %v11555_v8, %v12407_v31 }
 0x241   : > { %12413 = vst [vmem:[#allocation13_spill] sm:$0xff] %v11530_v58  ;;  %v4174_v33 = vshrl.u32 %v11530_v58, 16  ;;  %12418 = vst [vmem:[#allocation28_spill] sm:$0xff] %v11560_v1 }
 0x242   : > { %12416 = vst [vmem:[#allocation17_spill] sm:$0xff] %v11552_v60  ;;  %v11566_v57 = vpack.i.b16 %v4169_v56, %v4168_v24  ;;  %v4175_v19 = vshrl.u32 %v11552_v60, 16  ;;  %12421 = vst [vmem:[#allocation26_spill] sm:$0xff] %v11580_v28  ;;  %v4186_v24 = vshrl.u32 %v11560_v1, 16  ;;  %v11586_v56 = vrot.slane %v4071_v32, %v9853_v13 }
 0x243   : > { %v11588_v52 = vpack.i.b16 %v4181_v12, %v4180_v26  ;;  %v4187_v11 = vshrl.u32 %v11580_v28, 16 }
 0x244   : > { %12420 = vst [vmem:[#allocation29_spill] sm:$0xff] %v11566_v57  ;;  %v11583_v40 = vpack.i.b16 %v4175_v19, %v4174_v33  ;;  %12423 = vst [vmem:[#allocation30_spill] sm:$0xff] %v11586_v56  ;;  %v11595_v0 = vcombine.high %v11586_v56, %v12407_v31  ;;  %v11600_v33 = vrot.slane %v4096_v9, %v9853_v13  ;;  %v4192_v32 = vshrl.u32 %v11586_v56, 16 }
 0x245   : > { %12424 = vst [vmem:[#allocation31_spill] sm:$0xff] %v11588_v52  ;;  %v11597_v59 = vpack.i.b16 %v4187_v11, %v4186_v24 }
 0x246   : > { %12422 = vst [vmem:[#allocation27_spill] sm:$0xff] %v11583_v40  ;;  %12425 = vst [vmem:[#allocation15_spill] sm:$0xff] %v11595_v0  ;;  %v4193_v19 = vshrl.u32 %v11600_v33, 16  ;;  %v11608_v50 = vcombine.high %v11600_v33, %v12407_v31  ;;  %v4198_v62 = vshrl.u32 %v11595_v0, 16 }
 0x247   : > { %12426 = vst [vmem:[#allocation19_spill] sm:$0xff] %v11597_v59  ;;  %12427 = vst [vmem:[#allocation18_spill] sm:$0xff] %v11600_v33 }
 0x248   : > { %12428 = vst [vmem:[#allocation20_spill] sm:$0xff] %v11608_v50  ;;  %v11613_v24 = vpack.i.b16 %v4193_v19, %v4192_v32  ;;  %v4199_v9 = vshrl.u32 %v11608_v50, 16 }
 0x24a   : > { %12429 = vst [vmem:[#allocation21_spill] sm:$0xff] %v11613_v24  ;;  %v11622_v27 = vpack.i.b16 %v4199_v9, %v4198_v62 }
 0x24c   : > { %12430 = vst [vmem:[#allocation23_spill] sm:$0xff] %v11622_v27 }
 0x267   : > { %v11611_v12 = vpop.f32.mrb[48].mxu0 }
 0x268   : > { %v8853_v29 = vpop.f32.mrb[49].mxu0  ;;  %v5482_v26 = vsel %vm5481_vm3, %v11611_v12, -inf }
 0x269   : > { %v11620_v38 = vpop.f32.mrb[48].mxu1  ;;  %5483 = vmax.xlane.f32.xlu0 %v5482_v26  ;;  %v4238_v31 = vpop.f32.mrb[50].mxu0 }
 0x26a   : > { %v8854_v5 = vpop.f32.mrb[51].mxu0  ;;  %v8859_v22 = vpop.f32.mrb[49].mxu1  ;;  %v5485_v19 = vsel %vm5481_vm3, %v11620_v38, -inf }
 0x26b   : > { %v4278_v63 = vpop.f32.mrb[50].mxu1 }
 0x26c   : > { %v8860_v32 = vpop.f32.mrb[51].mxu1 }
 0x26d   : > { %5486 = vmax.xlane.f32.xlu0 %v5485_v19 }
 0x271   : > { %v11626_v11 = vpop.f32.mrb[52].mxu0  ;;  %v11630_v49 = vpop.f32.mrb[52].mxu1 }
 0x272   : > { %v8865_v29 = vpop.f32.mrb[53].mxu0  ;;  %v5488_v37 = vsel %vm5481_vm3, %v11626_v11, -inf  ;;  %v8871_v9 = vpop.f32.mrb[53].mxu1  ;;  %v5491_v63 = vsel %vm5481_vm3, %v11630_v49, -inf }
 0x273   : > { %5489 = vmax.xlane.f32.xlu1 %v5488_v37  ;;  %v4318_v26 = vpop.f32.mrb[54].mxu0  ;;  %v4358_v5 = vpop.f32.mrb[54].mxu1 }
 0x274   : > { %v8866_v62 = vpop.f32.mrb[55].mxu0  ;;  %v8872_v22 = vpop.f32.mrb[55].mxu1 }
 0x277   : > { %5492 = vmax.xlane.f32.xlu1 %v5491_v63 }
 0x279   : > { %v11634_v31 = vpop.f32.mrb[56].mxu0 }
 0x27a   : > { %v8877_v32 = vpop.f32.mrb[57].mxu0  ;;  %v5494_v19 = vsel %vm5481_vm3, %v11634_v31, -inf }
 0x27b   : > { %v11638_v29 = vpop.f32.mrb[56].mxu1  ;;  %5495 = vmax.xlane.f32.xlu0 %v5494_v19  ;;  %v4398_v21 = vpop.f32.mrb[58].mxu0 }
 0x27c   : > { %v8878_v37 = vpop.f32.mrb[59].mxu0  ;;  %v8883_v26 = vpop.f32.mrb[57].mxu1  ;;  %v5497_v62 = vsel %vm5481_vm3, %v11638_v29, -inf }
 0x27d   : > { %v4438_v9 = vpop.f32.mrb[58].mxu1  ;;  %5498 = vmax.xlane.f32.xlu1 %v5497_v62 }
 0x27e   : > { %v8884_v5 = vpop.f32.mrb[59].mxu1 }
 0x281   : > { %v11642_v22 = vpop.f32.mrb[60].mxu0 }
 0x282   : > { %v8889_v63 = vpop.f32.mrb[61].mxu0  ;;  %v5500_v32 = vsel %vm5481_vm3, %v11642_v22, -inf }
 0x283   : > { %v11646_v13 = vpop.f32.mrb[60].mxu1  ;;  %5501 = vmax.xlane.f32.xlu0 %v5500_v32  ;;  %v4478_v3 = vpop.f32.mrb[62].mxu0 }
 0x284   : > { %v8890_v19 = vpop.f32.mrb[63].mxu0  ;;  %v8895_v21 = vpop.f32.mrb[61].mxu1  ;;  %v5503_v37 = vsel %vm5481_vm3, %v11646_v13, -inf }
 0x285   : > { %v4518_v26 = vpop.f32.mrb[62].mxu1  ;;  %5504 = vmax.xlane.f32.xlu1 %v5503_v37 }
 0x286   : > { %v8896_v9 = vpop.f32.mrb[63].mxu1 }
 0x289   : > { %v11650_v62 = vpop.f32.mrb[64].mxu0 }
 0x28a   : > { %v8901_v5 = vpop.f32.mrb[65].mxu0  ;;  %v5506_v63 = vsel %vm5481_vm3, %v11650_v62, -inf }
 0x28b   : > { %v11654_v27 = vpop.f32.mrb[64].mxu1  ;;  %5507 = vmax.xlane.f32.xlu0 %v5506_v63  ;;  %v4558_v0 = vpop.f32.mrb[66].mxu0 }
 0x28c   : > { %v8902_v32 = vpop.f32.mrb[67].mxu0  ;;  %v8907_v3 = vpop.f32.mrb[65].mxu1  ;;  %v5509_v19 = vsel %vm5481_vm3, %v11654_v27, -inf }
 0x28d   : > { %v4598_v21 = vpop.f32.mrb[66].mxu1  ;;  %5510 = vmax.xlane.f32.xlu1 %v5509_v19 }
 0x28e   : > { %v8908_v26 = vpop.f32.mrb[67].mxu1 }
 0x291   : > { %v11658_v37 = vpop.f32.mrb[68].mxu0 }
 0x292   : > { %v8913_v9 = vpop.f32.mrb[69].mxu0  ;;  %v5512_v5 = vsel %vm5481_vm3, %v11658_v37, -inf }
 0x293   : > { %v11662_v50 = vpop.f32.mrb[68].mxu1  ;;  %5513 = vmax.xlane.f32.xlu0 %v5512_v5  ;;  %v4638_v24 = vpop.f32.mrb[70].mxu0 }
 0x294   : > { %v8914_v63 = vpop.f32.mrb[71].mxu0  ;;  %v8919_v0 = vpop.f32.mrb[69].mxu1  ;;  %v5515_v32 = vsel %vm5481_vm3, %v11662_v50, -inf }
 0x295   : > { %v4678_v3 = vpop.f32.mrb[70].mxu1  ;;  %5516 = vmax.xlane.f32.xlu1 %v5515_v32 }
 0x296   : > { %v8920_v21 = vpop.f32.mrb[71].mxu1 }
 0x299   : > { %v11666_v19 = vpop.f32.mrb[72].mxu0 }
 0x29a   : > { %v8925_v26 = vpop.f32.mrb[73].mxu0  ;;  %v5518_v9 = vsel %vm5481_vm3, %v11666_v19, -inf }
 0x29b   : > { %v11670_v56 = vpop.f32.mrb[72].mxu1  ;;  %5519 = vmax.xlane.f32.xlu0 %v5518_v9  ;;  %v4718_v33 = vpop.f32.mrb[74].mxu0 }
 0x29c   : > { %v8926_v5 = vpop.f32.mrb[75].mxu0  ;;  %v8931_v24 = vpop.f32.mrb[73].mxu1  ;;  %v5521_v63 = vsel %vm5481_vm3, %v11670_v56, -inf }
 0x29d   : > { %v4758_v0 = vpop.f32.mrb[74].mxu1  ;;  %5522 = vmax.xlane.f32.xlu1 %v5521_v63 }
 0x29e   : > { %v8932_v3 = vpop.f32.mrb[75].mxu1 }
 0x2a1   : > { %v11674_v32 = vpop.f32.mrb[76].mxu0 }
 0x2a2   : > { %v8937_v21 = vpop.f32.mrb[77].mxu0  ;;  %v5524_v26 = vsel %vm5481_vm3, %v11674_v32, -inf }
 0x2a3   : > { %v11678_v59 = vpop.f32.mrb[76].mxu1  ;;  %5525 = vmax.xlane.f32.xlu0 %v5524_v26  ;;  %v4798_v1 = vpop.f32.mrb[78].mxu0 }
 0x2a4   : > { %v8938_v9 = vpop.f32.mrb[79].mxu0  ;;  %v8943_v33 = vpop.f32.mrb[77].mxu1  ;;  %v5527_v5 = vsel %vm5481_vm3, %v11678_v59, -inf }
 0x2a5   : > { %v4838_v24 = vpop.f32.mrb[78].mxu1  ;;  %5528 = vmax.xlane.f32.xlu1 %v5527_v5 }
 0x2a6   : > { %v8944_v0 = vpop.f32.mrb[79].mxu1 }
 0x2aa   : > { %v11682_v63 = vpop.f32.mrb[80].mxu0 }
 0x2ab   : > { %v8949_v3 = vpop.f32.mrb[81].mxu0  ;;  %v5530_v21 = vsel %vm5481_vm3, %v11682_v63, -inf }
 0x2ac   : > { %v11686_v28 = vpop.f32.mrb[80].mxu1  ;;  %5531 = vmax.xlane.f32.xlu0 %v5530_v21  ;;  %v4878_v52 = vpop.f32.mrb[82].mxu0 }
 0x2ad   : > { %v8950_v26 = vpop.f32.mrb[83].mxu0  ;;  %v8955_v1 = vpop.f32.mrb[81].mxu1  ;;  %v5533_v9 = vsel %vm5481_vm3, %v11686_v28, -inf }
 0x2ae   : > { %v4918_v33 = vpop.f32.mrb[82].mxu1  ;;  %5534 = vmax.xlane.f32.xlu1 %v5533_v9 }
 0x2af   : > { %v8956_v24 = vpop.f32.mrb[83].mxu1 }
 0x2b4   : > { %v11694_v61 = vpop.f32.mrb[84].mxu1 }
 0x2b5   : > { %v11690_v5 = vpop.f32.mrb[84].mxu0  ;;  %v8967_v52 = vpop.f32.mrb[85].mxu1  ;;  %v5539_v26 = vsel %vm5481_vm3, %v11694_v61, -inf }
 0x2b6   : > { %v8961_v0 = vpop.f32.mrb[85].mxu0  ;;  %v5536_v3 = vsel %vm5481_vm3, %v11690_v5, -inf  ;;  %v4998_v1 = vpop.f32.mrb[86].mxu1  ;;  %5540 = vmax.xlane.f32.xlu1 %v5539_v26 }
 0x2b7   : > { %5537 = vmax.xlane.f32.xlu0 %v5536_v3  ;;  %v4958_v8 = vpop.f32.mrb[86].mxu0  ;;  %v8968_v33 = vpop.f32.mrb[87].mxu1 }
 0x2b8   : > { %v8962_v21 = vpop.f32.mrb[87].mxu0 }
 0x2bc   : > { %v11702_v40 = vpop.f32.mrb[88].mxu1 }
 0x2bd   : > { %v11698_v9 = vpop.f32.mrb[88].mxu0  ;;  %v8979_v8 = vpop.f32.mrb[89].mxu1  ;;  %v5545_v21 = vsel %vm5481_vm3, %v11702_v40, -inf }
 0x2be   : > { %v8973_v24 = vpop.f32.mrb[89].mxu0  ;;  %v5542_v0 = vsel %vm5481_vm3, %v11698_v9, -inf  ;;  %v5078_v52 = vpop.f32.mrb[90].mxu1  ;;  %5546 = vmax.xlane.f32.xlu1 %v5545_v21 }
 0x2bf   : > { %5543 = vmax.xlane.f32.xlu0 %v5542_v0  ;;  %v5038_v58 = vpop.f32.mrb[90].mxu0  ;;  %v8980_v1 = vpop.f32.mrb[91].mxu1 }
 0x2c0   : > { %v8974_v3 = vpop.f32.mrb[91].mxu0 }
 0x2c4   : > { %v11710_v60 = vpop.f32.mrb[92].mxu1 }
 0x2c5   : > { %v11706_v26 = vpop.f32.mrb[92].mxu0  ;;  %12432 = vst [vmem:[#allocation33_spill] sm:$0xff] %v11710_v60  ;;  %v8991_v58 = vpop.f32.mrb[93].mxu1  ;;  %v5551_v3 = vsel %vm5481_vm3, %v11710_v60, -inf }
 0x2c6   : > { %12431 = vst [vmem:[#allocation22_spill] sm:$0xff] %v11706_v26  ;;  %v8985_v33 = vpop.f32.mrb[93].mxu0  ;;  %v5548_v24 = vsel %vm5481_vm3, %v11706_v26, -inf  ;;  %v5158_v8 = vpop.f32.mrb[94].mxu1  ;;  %5552 = vmax.xlane.f32.xlu1 %v5551_v3 }
 0x2c7   : > { %5549 = vmax.xlane.f32.xlu0 %v5548_v24  ;;  %v5118_v57 = vpop.f32.mrb[94].mxu0  ;;  %v8992_v52 = vpop.f32.mrb[95].mxu1 }
 0x2c8   : > { %v8986_v0 = vpop.f32.mrb[95].mxu0 }
 0x2cc   : > { %v11718_v10 = vpop.f32.mrb[96].mxu1 }
 0x2cd   : > { %12434 = vst [vmem:[#allocation35_spill] sm:$0xff] %v11718_v10  ;;  %v9003_v57 = vpop.f32.mrb[97].mxu1  ;;  %v5557_v0 = vsel %vm5481_vm3, %v11718_v10, -inf }
 0x2ce   : > { %v11714_v21 = vpop.f32.mrb[96].mxu0  ;;  %v5238_v58 = vpop.f32.mrb[98].mxu1  ;;  %5558 = vmax.xlane.f32.xlu1 %v5557_v0 }
 0x2cf   : > { %12433 = vst [vmem:[#allocation34_spill] sm:$0xff] %v11714_v21  ;;  %v8997_v1 = vpop.f32.mrb[97].mxu0  ;;  %v5554_v33 = vsel %vm5481_vm3, %v11714_v21, -inf  ;;  %v9004_v8 = vpop.f32.mrb[99].mxu1 }
 0x2d0   : > { %5555 = vmax.xlane.f32.xlu0 %v5554_v33  ;;  %v5198_v23 = vpop.f32.mrb[98].mxu0 }
 0x2d1   : > { %v8998_v24 = vpop.f32.mrb[99].mxu0 }
 0x2d4   : > { %v11726_v60 = vpop.f32.mrb[100].mxu1 }
 0x2d5   : > { %12436 = vst [vmem:[#allocation37_spill] sm:$0xff] %v11726_v60  ;;  %v9015_v23 = vpop.f32.mrb[101].mxu1  ;;  %v5563_v24 = vsel %vm5481_vm3, %v11726_v60, -inf }
 0x2d6   : > { %v11722_v3 = vpop.f32.mrb[100].mxu0  ;;  %v5318_v57 = vpop.f32.mrb[102].mxu1  ;;  %5564 = vmax.xlane.f32.xlu1 %v5563_v24 }
 0x2d7   : > { %12435 = vst [vmem:[#allocation36_spill] sm:$0xff] %v11722_v3  ;;  %v9009_v52 = vpop.f32.mrb[101].mxu0  ;;  %v5560_v1 = vsel %vm5481_vm3, %v11722_v3, -inf  ;;  %v9016_v58 = vpop.f32.mrb[103].mxu1 }
 0x2d8   : > { %5561 = vmax.xlane.f32.xlu0 %v5560_v1  ;;  %v5278_v21 = vpop.f32.mrb[102].mxu0 }
 0x2d9   : > { %v9010_v33 = vpop.f32.mrb[103].mxu0 }
 0x2dc   : > { %v11734_v10 = vpop.f32.mrb[104].mxu1 }
 0x2dd   : > { %12438 = vst [vmem:[#allocation39_spill] sm:$0xff] %v11734_v10  ;;  %v9027_v21 = vpop.f32.mrb[105].mxu1  ;;  %v5569_v33 = vsel %vm5481_vm3, %v11734_v10, -inf }
 0x2de   : > { %v11730_v0 = vpop.f32.mrb[104].mxu0  ;;  %v5398_v23 = vpop.f32.mrb[106].mxu1  ;;  %5570 = vmax.xlane.f32.xlu1 %v5569_v33 }
 0x2df   : > { %12437 = vst [vmem:[#allocation38_spill] sm:$0xff] %v11730_v0  ;;  %v9021_v8 = vpop.f32.mrb[105].mxu0  ;;  %v5566_v52 = vsel %vm5481_vm3, %v11730_v0, -inf  ;;  %v9028_v57 = vpop.f32.mrb[107].mxu1 }
 0x2e0   : > { %5567 = vmax.xlane.f32.xlu0 %v5566_v52  ;;  %v5358_v3 = vpop.f32.mrb[106].mxu0 }
 0x2e1   : > { %v9022_v1 = vpop.f32.mrb[107].mxu0 }
 0x2e4   : > { %v11742_v60 = vpop.f32.mrb[108].mxu1 }
 0x2e5   : > { %v9039_v3 = vpop.f32.mrb[109].mxu1  ;;  %v5575_v1 = vsel %vm5481_vm3, %v11742_v60, -inf }
 0x2e6   : > { %v11738_v24 = vpop.f32.mrb[108].mxu0  ;;  %v5478_v21 = vpop.f32.mrb[110].mxu1  ;;  %5576 = vmax.xlane.f32.xlu1 %v5575_v1 }
 0x2e7   : > { %12439 = vst [vmem:[#allocation40_spill] sm:$0xff] %v11738_v24  ;;  %v9033_v58 = vpop.f32.mrb[109].mxu0  ;;  %v5572_v8 = vsel %vm5481_vm3, %v11738_v24, -inf  ;;  %v9040_v23 = vpop.f32.mrb[111].mxu1 }
 0x2e8   : > { %5573 = vmax.xlane.f32.xlu0 %v5572_v8  ;;  %v5438_v0 = vpop.f32.mrb[110].mxu0 }
 0x2e9   : > { %v9034_v52 = vpop.f32.mrb[111].mxu0 }
 0x2f6   : > { %v5484_v33 = vpop.xlane.xlu0 %5483 }
 0x2f7   : > { %v5578_v57 = vsub.f32 %v11611_v12, %v5484_v33 }
 0x2f9   : > { %v5610_v10 = vmul.f32 1.442695, %v5578_v57 }
 0x2fa   : > { %v5487_v58 = vpop.xlane.xlu0 %5486 }
 0x2fb   : > { %9337 = vpow2.f32 %v5610_v10  ;;  %v5579_v24 = vsub.f32 %v11620_v38, %v5487_v58 }
 0x2fd   : > { %v5612_v26 = vmul.f32 1.442695, %v5579_v24 }
 0x2ff   : > { %9339 = vpow2.f32 %v5612_v26 }
 0x300   : > { %v5490_v25 = vpop.xlane.xlu1 %5489 }
 0x301   : > { %v5580_v0 = vsub.f32 %v11626_v11, %v5490_v25  ;;  %v12440_v25 = vpack.i.b16 %v11340_v17, %v11337_v30  ;;  %v5945_v30 = vsel %vm5805_vm2, %v11364_v39, 0  ;;  %v12441_v39 = vpack.i.b16 %v11346_v48, %v11343_v45 }
 0x302   : > { %v6037_v45 = vsel %vm5805_vm2, %v11366_v16, 0  ;;  %v12442_v16 = vpack.i.b16 %v11362_v54, %v11358_v4  ;;  %v6129_v4 = vsel %vm5805_vm2, %v11383_v51, 0  ;;  %v12443_v51 = vpack.i.b16 %v11414_v44, %v11373_v41 }
 0x303   : > { %v5614_v8 = vmul.f32 1.442695, %v5580_v0  ;;  %v5899_v38 = vsel %vm5805_vm2, %v12440_v25, 0  ;;  %v6221_v41 = vsel %vm5805_vm2, %v11439_v2, 0  ;;  %v12444_v2 = vpack.i.b16 %v11431_v42, %v11391_v34 }
 0x304   : > { %v5493_v52 = vpop.xlane.xlu1 %5492  ;;  %v6313_v34 = vsel %vm5805_vm2, %v11452_v36, 0  ;;  %v12445_v36 = vpack.i.b16 %v11437_v18, %v11434_v15  ;;  %v6405_v15 = vsel %vm5805_vm2, %v11458_v7, 0  ;;  %v12446_v7 = vpack.i.b16 %v11456_v35, %v11450_v20 }
 0x305   : > { %9341 = vpow2.f32 %v5614_v8  ;;  %v5581_v3 = vsub.f32 %v11630_v49, %v5493_v52  ;;  %v9338_v1 = vpop.eup %9337  ;;  %v6497_v20 = vsel %vm5805_vm2, %v11491_v6, 0  ;;  %v12447_v6 = vpack.i.b16 %v11476_v55, %v11462_v53 }
 0x306   : > { %v5674_v12 = vsel %vm5481_vm3, %v9338_v1, 0.0  ;;  %v5770_v33 = vpack.c.bf16 %v9338_v1, %v9338_v1  ;;  %v6589_v53 = vsel %vm5805_vm2, %v11505_v47, 0  ;;  %v12448_v47 = vpack.i.b16 %v11498_v43, %v11485_v14  ;;  %v12449_v14 = vld [vmem:[#allocation25_spill] sm:$0xff] }
 0x307   : > { %v5616_v21 = vmul.f32 1.442695, %v5581_v3  ;;  %5675 = vadd.xlane.f32.xlu0 %v5674_v12  ;;  %v5991_v3 = vsel %vm5805_vm2, %v12441_v39, 0  ;;  %v6175_v39 = vsel %vm5805_vm2, %v12443_v51, 0  ;;  %v6681_v43 = vsel %vm5805_vm2, %v12449_v14, 0 }
 0x308   : > { %v5496_v23 = vpop.xlane.xlu0 %5495  ;;  %9044 = vmatmul.mubr.msk.bf16.vlgmr.msra.gmra.mrb[112].mxu0 %vm5481_vm3, %v5770_v33 }
 0x309   : > { %9343 = vpow2.f32 %v5616_v21  ;;  %v5582_v10 = vsub.f32 %v11634_v31, %v5496_v23  ;;  %v9340_v26 = vpop.eup %9339  ;;  %9054 = vmatpush3.bf16.msra.mxu0 %v5899_v38  ;;  %9055 = vmatprep.mubr.msk.bf16.mxu0 %vm9603_vm1, %v12331_v46 }
 0x30a   : > { %v5499_v11 = vpop.xlane.xlu1 %5498  ;;  %v5677_v57 = vsel %vm5481_vm3, %v9340_v26, 0.0  ;;  %v5771_v31 = vpack.c.bf16 %v9340_v26, %v9340_v26  ;;  %9065 = vmatprep.subr.bf16.mxu0 %v12331_v46 }
 0x30b   : > { %v5618_v49 = vmul.f32 1.442695, %v5582_v10  ;;  %v5583_v24 = vsub.f32 %v11638_v29, %v5499_v11  ;;  %5678 = vadd.xlane.f32.xlu1 %v5677_v57 }
 0x30c   : > { %9050 = vmatmul.mubr.msk.bf16.vlgmr.msra.gmra.mrb[112].mxu1 %vm5481_vm3, %v5771_v31 }
 0x30d   : > { %9345 = vpow2.f32 %v5618_v49  ;;  %v5620_v58 = vmul.f32 1.442695, %v5583_v24  ;;  %9060 = vmatpush3.bf16.msra.mxu1 %v5945_v30  ;;  %9061 = vmatprep.mubr.msk.bf16.mxu1 %vm9603_vm1, %v12331_v46  ;;  %v6083_v24 = vsel %vm5805_vm2, %v12442_v16, 0 }
 0x30e   : > { %9071 = vmatprep.subr.bf16.mxu1 %v12331_v46 }
 0x30f   : > { %v9342_v17 = vpop.eup %9341  ;;  %9347 = vpow2.f32 %v5620_v58 }
 0x310   : > { %v5502_v29 = vpop.xlane.xlu0 %5501  ;;  %v5680_v0 = vsel %vm5481_vm3, %v9342_v17, 0.0  ;;  %v5772_v8 = vpack.c.bf16 %v9342_v17, %v9342_v17 }
 0x311   : > { %v5584_v52 = vsub.f32 %v11642_v22, %v5502_v29  ;;  %5681 = vadd.xlane.f32.xlu0 %v5680_v0 }
 0x312   : > { %9056 = vmatmul.mubr.msk.bf16.vlgmr.msra.gmra.mrb[116].mxu0 %vm5481_vm3, %v5772_v8  ;;  %v5505_v1 = vpop.xlane.xlu1 %5504 }
 0x313   : > { %v9344_v21 = vpop.eup %9343  ;;  %v5622_v23 = vmul.f32 1.442695, %v5584_v52  ;;  %9066 = vmatpush3.bf16.msra.mxu0 %v5991_v3  ;;  %v5585_v12 = vsub.f32 %v11646_v13, %v5505_v1  ;;  %9067 = vmatprep.mubr.msk.bf16.mxu0 %vm9603_vm1, %v12331_v46 }
 0x314   : > { %v5683_v33 = vsel %vm5481_vm3, %v9344_v21, 0.0  ;;  %v5773_v22 = vpack.c.bf16 %v9344_v21, %v9344_v21  ;;  %9077 = vmatprep.subr.bf16.mxu0 %v12331_v46 }
 0x315   : > { %9349 = vpow2.f32 %v5622_v23  ;;  %v5624_v10 = vmul.f32 1.442695, %v5585_v12  ;;  %5684 = vadd.xlane.f32.xlu1 %v5683_v33 }
 0x316   : > { %9062 = vmatmul.mubr.msk.bf16.vlgmr.msra.gmra.mrb[116].mxu1 %vm5481_vm3, %v5773_v22 }
 0x317   : > { %v9346_v48 = vpop.eup %9345  ;;  %9351 = vpow2.f32 %v5624_v10  ;;  %9072 = vmatpush3.bf16.msra.mxu1 %v6037_v45  ;;  %9073 = vmatprep.mubr.msk.bf16.mxu1 %vm9603_vm1, %v12331_v46 }
 0x318   : > { %v5508_v13 = vpop.xlane.xlu0 %5507  ;;  %v5686_v25 = vsel %vm5481_vm3, %v9346_v48, 0.0  ;;  %v5774_v38 = vpack.c.bf16 %v9346_v48, %v9346_v48  ;;  %9083 = vmatprep.subr.bf16.mxu1 %v12331_v46  ;;  %v6267_v48 = vsel %vm5805_vm2, %v12444_v2, 0 }
 0x319   : > { %v9348_v11 = vpop.eup %9347  ;;  %v5586_v26 = vsub.f32 %v11650_v62, %v5508_v13  ;;  %5687 = vadd.xlane.f32.xlu0 %v5686_v25 }
 0x31a   : > { %v5511_v49 = vpop.xlane.xlu1 %5510  ;;  %9068 = vmatmul.mubr.msk.bf16.vlgmr.msra.gmra.mrb[120].mxu0 %vm5481_vm3, %v5774_v38  ;;  %v5689_v57 = vsel %vm5481_vm3, %v9348_v11, 0.0  ;;  %v5775_v30 = vpack.c.bf16 %v9348_v11, %v9348_v11 }
 0x31b   : > { %v5626_v31 = vmul.f32 1.442695, %v5586_v26  ;;  %v5587_v58 = vsub.f32 %v11654_v27, %v5511_v49  ;;  %9078 = vmatpush3.bf16.msra.mxu0 %v6083_v24  ;;  %5690 = vadd.xlane.f32.xlu1 %v5689_v57 }
 0x31c   : > { %9079 = vmatprep.mubr.msk.bf16.mxu0 %vm9603_vm1, %v12331_v46  ;;  %9089 = vmatprep.subr.bf16.mxu0 %v12331_v46 }
 0x31d   : > { %9353 = vpow2.f32 %v5626_v31  ;;  %v5628_v62 = vmul.f32 1.442695, %v5587_v58  ;;  %v6359_v31 = vsel %vm5805_vm2, %v12445_v36, 0  ;;  %v12451_v36 = vld [vmem:[#allocation14_spill] sm:$0xff] }
 0x31e   : > { %9074 = vmatmul.mubr.msk.bf16.vlgmr.msra.gmra.mrb[120].mxu1 %vm5481_vm3, %v5775_v30 }
 0x31f   : > { %v9350_v54 = vpop.eup %9349  ;;  %9355 = vpow2.f32 %v5628_v62  ;;  %9084 = vmatpush3.bf16.msra.mxu1 %v6129_v4  ;;  %9085 = vmatprep.mubr.msk.bf16.mxu1 %vm9603_vm1, %v12331_v46 }
 0x320   : > { %v5514_v27 = vpop.xlane.xlu0 %5513  ;;  %v5692_v17 = vsel %vm5481_vm3, %v9350_v54, 0.0  ;;  %v5776_v29 = vpack.c.bf16 %v9350_v54, %v9350_v54  ;;  %9095 = vmatprep.subr.bf16.mxu1 %v12331_v46 }
 0x321   : > { %v9352_v0 = vpop.eup %9351  ;;  %v5588_v8 = vsub.f32 %v11658_v37, %v5514_v27  ;;  %5693 = vadd.xlane.f32.xlu0 %v5692_v17 }
 0x322   : > { %v5517_v52 = vpop.xlane.xlu1 %5516  ;;  %9080 = vmatmul.mubr.msk.bf16.vlgmr.msra.gmra.mrb[124].mxu0 %vm5481_vm3, %v5776_v29  ;;  %v5695_v3 = vsel %vm5481_vm3, %v9352_v0, 0.0  ;;  %v5777_v23 = vpack.c.bf16 %v9352_v0, %v9352_v0 }
 0x323   : > { %v5630_v1 = vmul.f32 1.442695, %v5588_v8  ;;  %v5589_v21 = vsub.f32 %v11662_v50, %v5517_v52  ;;  %9090 = vmatpush3.bf16.msra.mxu0 %v6175_v39  ;;  %5696 = vadd.xlane.f32.xlu1 %v5695_v3  ;;  %v6451_v8 = vsel %vm5805_vm2, %v12446_v7, 0 }
 0x324   : > { %9091 = vmatprep.mubr.msk.bf16.mxu0 %vm9603_vm1, %v12331_v46  ;;  %9101 = vmatprep.subr.bf16.mxu0 %v12331_v46 }
 0x325   : > { %9357 = vpow2.f32 %v5630_v1  ;;  %v5632_v37 = vmul.f32 1.442695, %v5589_v21 }
 0x326   : > { %9086 = vmatmul.mubr.msk.bf16.vlgmr.msra.gmra.mrb[124].mxu1 %vm5481_vm3, %v5777_v23 }
 0x327   : > { %v9354_v44 = vpop.eup %9353  ;;  %9359 = vpow2.f32 %v5632_v37  ;;  %9096 = vmatpush3.bf16.msra.mxu1 %v6221_v41  ;;  %9097 = vmatprep.mubr.msk.bf16.mxu1 %vm9603_vm1, %v12331_v46 }
 0x328   : > { %v5520_v50 = vpop.xlane.xlu0 %5519  ;;  %v5698_v12 = vsel %vm5481_vm3, %v9354_v44, 0.0  ;;  %v5778_v33 = vpack.c.bf16 %v9354_v44, %v9354_v44  ;;  %9107 = vmatprep.subr.bf16.mxu1 %v12331_v46  ;;  %v6543_v44 = vsel %vm5805_vm2, %v12447_v6, 0  ;;  %v12461_v6 = vld [vmem:[#allocation27_spill] sm:$0xff] }
 0x329   : > { %v9356_v22 = vpop.eup %9355  ;;  %v5590_v10 = vsub.f32 %v11666_v19, %v5520_v50  ;;  %5699 = vadd.xlane.f32.xlu0 %v5698_v12 }
 0x32a   : > { %v5523_v45 = vpop.xlane.xlu1 %5522  ;;  %9092 = vmatmul.mubr.msk.bf16.vlgmr.msra.gmra.mrb[128].mxu0 %vm5481_vm3, %v5778_v33  ;;  %v5701_v13 = vsel %vm5481_vm3, %v9356_v22, 0.0  ;;  %v5779_v11 = vpack.c.bf16 %v9356_v22, %v9356_v22 }
 0x32b   : > { %v5634_v25 = vmul.f32 1.442695, %v5590_v10  ;;  %v5591_v38 = vsub.f32 %v11670_v56, %v5523_v45  ;;  %9102 = vmatpush3.bf16.msra.mxu0 %v6267_v48  ;;  %5702 = vadd.xlane.f32.xlu1 %v5701_v13 }
 0x32c   : > { %9103 = vmatprep.mubr.msk.bf16.mxu0 %vm9603_vm1, %v12331_v46  ;;  %9113 = vmatprep.subr.bf16.mxu0 %v12331_v46 }
 0x32d   : > { %9361 = vpow2.f32 %v5634_v25  ;;  %v5636_v19 = vmul.f32 1.442695, %v5591_v38  ;;  %v6635_v25 = vsel %vm5805_vm2, %v12448_v47, 0 }
 0x32e   : > { %9098 = vmatmul.mubr.msk.bf16.vlgmr.msra.gmra.mrb[128].mxu1 %vm5481_vm3, %v5779_v11 }
 0x32f   : > { %v9358_v42 = vpop.eup %9357  ;;  %9363 = vpow2.f32 %v5636_v19  ;;  %9108 = vmatpush3.bf16.msra.mxu1 %v6313_v34  ;;  %9109 = vmatprep.mubr.msk.bf16.mxu1 %vm9603_vm1, %v12331_v46 }
 0x330   : > { %v5526_v56 = vpop.xlane.xlu0 %5525  ;;  %v5704_v26 = vsel %vm5481_vm3, %v9358_v42, 0.0  ;;  %v5780_v49 = vpack.c.bf16 %v9358_v42, %v9358_v42  ;;  %9119 = vmatprep.subr.bf16.mxu1 %v12331_v46 }
 0x331   : > { %v9360_v16 = vpop.eup %9359  ;;  %v5592_v24 = vsub.f32 %v11674_v32, %v5526_v56  ;;  %5705 = vadd.xlane.f32.xlu0 %v5704_v26 }
 0x332   : > { %v5529_v57 = vpop.xlane.xlu1 %5528  ;;  %9104 = vmatmul.mubr.msk.bf16.vlgmr.msra.gmra.mrb[132].mxu0 %vm5481_vm3, %v5780_v49  ;;  %v5707_v58 = vsel %vm5481_vm3, %v9360_v16, 0.0  ;;  %v5781_v4 = vpack.c.bf16 %v9360_v16, %v9360_v16  ;;  %v12450_v16 = vld [vmem:[#allocation22_spill] sm:$0xff] }
 0x333   : > { %v5638_v30 = vmul.f32 1.442695, %v5592_v24  ;;  %v5593_v62 = vsub.f32 %v11678_v59, %v5529_v57  ;;  %9114 = vmatpush3.bf16.msra.mxu0 %v6359_v31  ;;  %5708 = vadd.xlane.f32.xlu1 %v5707_v58  ;;  %v12452_v31 = vld [vmem:[#allocation24_spill] sm:$0xff] }
 0x334   : > { %9115 = vmatprep.mubr.msk.bf16.mxu0 %vm9603_vm1, %v12331_v46  ;;  %9125 = vmatprep.subr.bf16.mxu0 %v12331_v46  ;;  %v12453_v58 = vpack.i.b16 %v12451_v36, %v12452_v31 }
 0x335   : > { %9365 = vpow2.f32 %v5638_v30  ;;  %v5640_v32 = vmul.f32 1.442695, %v5593_v62 }
 0x336   : > { %9110 = vmatmul.mubr.msk.bf16.vlgmr.msra.gmra.mrb[132].mxu1 %vm5481_vm3, %v5781_v4  ;;  %v6727_v30 = vsel %vm5805_vm2, %v12453_v58, 0 }
 0x337   : > { %v9362_v18 = vpop.eup %9361  ;;  %9367 = vpow2.f32 %v5640_v32  ;;  %9120 = vmatpush3.bf16.msra.mxu1 %v6405_v15  ;;  %9121 = vmatprep.mubr.msk.bf16.mxu1 %vm9603_vm1, %v12331_v46  ;;  %v12454_v32 = vld [vmem:[#allocation33_spill] sm:$0xff] }
 0x338   : > { %v5710_v54 = vsel %vm5481_vm3, %v9362_v18, 0.0  ;;  %v5782_v27 = vpack.c.bf16 %v9362_v18, %v9362_v18  ;;  %9131 = vmatprep.subr.bf16.mxu1 %v12331_v46 }
 0x339   : > { %v5532_v59 = vpop.xlane.xlu0 %5531  ;;  %v9364_v17 = vpop.eup %9363  ;;  %5711 = vadd.xlane.f32.xlu0 %v5710_v54  ;;  %v12455_v54 = vld [vmem:[#allocation29_spill] sm:$0xff] }
 0x33a   : > { %v5594_v29 = vsub.f32 %v11682_v63, %v5532_v59  ;;  %9116 = vmatmul.mubr.msk.bf16.vlgmr.msra.gmra.mrb[136].mxu0 %vm5481_vm3, %v5782_v27  ;;  %v5713_v52 = vsel %vm5481_vm3, %v9364_v17, 0.0  ;;  %v5783_v3 = vpack.c.bf16 %v9364_v17, %v9364_v17  ;;  %v6773_v27 = vsel %vm5805_vm2, %v12455_v54, 0 }
 0x33b   : > { %v5535_v0 = vpop.xlane.xlu1 %5534  ;;  %9126 = vmatpush3.bf16.msra.mxu0 %v6451_v8  ;;  %5714 = vadd.xlane.f32.xlu1 %v5713_v52  ;;  %v12456_v52 = vld [vmem:[#allocation34_spill] sm:$0xff] }
 0x33c   : > { %v5642_v51 = vmul.f32 1.442695, %v5594_v29  ;;  %v5595_v39 = vsub.f32 %v11686_v28, %v5535_v0  ;;  %9127 = vmatprep.mubr.msk.bf16.mxu0 %vm9603_vm1, %v12331_v46  ;;  %9137 = vmatprep.subr.bf16.mxu0 %v12331_v46 }
 0x33e   : > { %9369 = vpow2.f32 %v5642_v51  ;;  %v5644_v63 = vmul.f32 1.442695, %v5595_v39  ;;  %9122 = vmatmul.mubr.msk.bf16.vlgmr.msra.gmra.mrb[136].mxu1 %vm5481_vm3, %v5783_v3  ;;  %v12457_v3 = vld [vmem:[#allocation17_spill] sm:$0xff] }
 0x33f   : > { %v9366_v35 = vpop.eup %9365  ;;  %9132 = vmatpush3.bf16.msra.mxu1 %v6497_v20  ;;  %9133 = vmatprep.mubr.msk.bf16.mxu1 %vm9603_vm1, %v12331_v46 }
 0x340   : > { %9371 = vpow2.f32 %v5644_v63  ;;  %v5716_v1 = vsel %vm5481_vm3, %v9366_v35, 0.0  ;;  %v5784_v21 = vpack.c.bf16 %v9366_v35, %v9366_v35  ;;  %9143 = vmatprep.subr.bf16.mxu1 %v12331_v46  ;;  %v12458_v63 = vld [vmem:[#allocation13_spill] sm:$0xff] }
 0x341   : > { %v9368_v23 = vpop.eup %9367  ;;  %5717 = vadd.xlane.f32.xlu0 %v5716_v1  ;;  %v12459_v20 = vpack.i.b16 %v12457_v3, %v12458_v63 }
 0x342   : > { %9128 = vmatmul.mubr.msk.bf16.vlgmr.msra.gmra.mrb[140].mxu0 %vm5481_vm3, %v5784_v21  ;;  %v5719_v50 = vsel %vm5481_vm3, %v9368_v23, 0.0  ;;  %v5785_v22 = vpack.c.bf16 %v9368_v23, %v9368_v23  ;;  %v12460_v21 = vld [vmem:[#allocation35_spill] sm:$0xff] }
 0x343   : > { %v5541_v41 = vpop.xlane.xlu1 %5540  ;;  %9138 = vmatpush3.bf16.msra.mxu0 %v6543_v44  ;;  %5720 = vadd.xlane.f32.xlu1 %v5719_v50  ;;  %v6819_v35 = vsel %vm5805_vm2, %v12459_v20, 0  ;;  %v6865_v44 = vsel %vm5805_vm2, %v12461_v6, 0 }
 0x344   : > { %v5538_v28 = vpop.xlane.xlu0 %5537  ;;  %v5597_v33 = vsub.f32 %v11694_v61, %v5541_v41  ;;  %9139 = vmatprep.mubr.msk.bf16.mxu0 %vm9603_vm1, %v12331_v46  ;;  %9149 = vmatprep.subr.bf16.mxu0 %v12331_v46 }
 0x345   : > { %v5596_v37 = vsub.f32 %v11690_v5, %v5538_v28 }
 0x346   : > { %v5648_v5 = vmul.f32 1.442695, %v5597_v33  ;;  %9134 = vmatmul.mubr.msk.bf16.vlgmr.msra.gmra.mrb[140].mxu1 %vm5481_vm3, %v5785_v22 }
 0x347   : > { %v5646_v12 = vmul.f32 1.442695, %v5596_v37  ;;  %9144 = vmatpush3.bf16.msra.mxu1 %v6589_v53  ;;  %9145 = vmatprep.mubr.msk.bf16.mxu1 %vm9603_vm1, %v12331_v46  ;;  %v12462_v53 = vld [vmem:[#allocation36_spill] sm:$0xff] }
 0x348   : > { %v9370_v55 = vpop.eup %9369  ;;  %9155 = vmatprep.subr.bf16.mxu1 %v12331_v46 }
 0x349   : > { %9373 = vpow2.f32 %v5646_v12  ;;  %v5722_v10 = vsel %vm5481_vm3, %v9370_v55, 0.0  ;;  %v5786_v45 = vpack.c.bf16 %v9370_v55, %v9370_v55 }
 0x34a   : > { %9375 = vpow2.f32 %v5648_v5  ;;  %v9372_v2 = vpop.eup %9371  ;;  %5723 = vadd.xlane.f32.xlu0 %v5722_v10  ;;  %v12463_v10 = vld [vmem:[#allocation32_spill] sm:$0xff] }
 0x34b   : > { %v5547_v13 = vpop.xlane.xlu1 %5546  ;;  %9140 = vmatmul.mubr.msk.bf16.vlgmr.msra.gmra.mrb[144].mxu0 %vm5481_vm3, %v5786_v45  ;;  %v5725_v38 = vsel %vm5481_vm3, %v9372_v2, 0.0  ;;  %v5787_v34 = vpack.c.bf16 %v9372_v2, %v9372_v2  ;;  %v12464_v45 = vld [vmem:[#allocation16_spill] sm:$0xff] }
 0x34c   : > { %v5544_v61 = vpop.xlane.xlu0 %5543  ;;  %v5599_v19 = vsub.f32 %v11702_v40, %v5547_v13  ;;  %9150 = vmatpush3.bf16.msra.mxu0 %v6635_v25  ;;  %5726 = vadd.xlane.f32.xlu1 %v5725_v38  ;;  %v12465_v2 = vpack.i.b16 %v12463_v10, %v12464_v45  ;;  %v12466_v25 = vld [vmem:[#allocation37_spill] sm:$0xff] }
 0x34d   : > { %v5598_v48 = vsub.f32 %v11698_v9, %v5544_v61  ;;  %9151 = vmatprep.mubr.msk.bf16.mxu0 %vm9603_vm1, %v12331_v46  ;;  %9161 = vmatprep.subr.bf16.mxu0 %v12331_v46 }
 0x34e   : > { %v5652_v9 = vmul.f32 1.442695, %v5599_v19  ;;  %9146 = vmatmul.mubr.msk.bf16.vlgmr.msra.gmra.mrb[144].mxu1 %vm5481_vm3, %v5787_v34  ;;  %v12467_v34 = vld [vmem:[#allocation31_spill] sm:$0xff] }
 0x34f   : > { %v5650_v11 = vmul.f32 1.442695, %v5598_v48  ;;  %9156 = vmatpush3.bf16.msra.mxu1 %v6681_v43  ;;  %9157 = vmatprep.mubr.msk.bf16.mxu1 %vm9603_vm1, %v12331_v46  ;;  %v6911_v48 = vsel %vm5805_vm2, %v12465_v2, 0 }
 0x350   : > { %9167 = vmatprep.subr.bf16.mxu1 %v12331_v46 }
 0x351   : > { %9377 = vpow2.f32 %v5650_v11 }
 0x352   : > { %9379 = vpow2.f32 %v5652_v9  ;;  %v6957_v9 = vsel %vm5805_vm2, %v12467_v34, 0 }
 0x353   : > { %v9374_v42 = vpop.eup %9373  ;;  %v5553_v57 = vpop.xlane.xlu1 %5552 }
 0x354   : > { %v5550_v40 = vpop.xlane.xlu0 %5549  ;;  %v5728_v56 = vsel %vm5481_vm3, %v9374_v42, 0.0  ;;  %v5788_v26 = vpack.c.bf16 %v9374_v42, %v9374_v42  ;;  %v9376_v49 = vpop.eup %9375  ;;  %v5601_v15 = vsub.f32 %v12454_v32, %v5553_v57  ;;  %v12470_v57 = vld [vmem:[#allocation28_spill] sm:$0xff] }
 0x355   : > { %v5600_v24 = vsub.f32 %v12450_v16, %v5550_v40  ;;  %5729 = vadd.xlane.f32.xlu0 %v5728_v56  ;;  %v5731_v62 = vsel %vm5481_vm3, %v9376_v49, 0.0  ;;  %v5789_v18 = vpack.c.bf16 %v9376_v49, %v9376_v49 }
 0x356   : > { %9152 = vmatmul.mubr.msk.bf16.vlgmr.msra.gmra.mrb[148].mxu0 %vm5481_vm3, %v5788_v26  ;;  %5732 = vadd.xlane.f32.xlu1 %v5731_v62  ;;  %v5656_v59 = vmul.f32 1.442695, %v5601_v15  ;;  %v12468_v26 = vld [vmem:[#allocation38_spill] sm:$0xff]  ;;  %v12472_v62 = vld [vmem:[#allocation39_spill] sm:$0xff] }
 0x357   : > { %v5654_v4 = vmul.f32 1.442695, %v5600_v24  ;;  %9162 = vmatpush3.bf16.msra.mxu0 %v6727_v30  ;;  %9163 = vmatprep.mubr.msk.bf16.mxu0 %vm9603_vm1, %v12331_v46  ;;  %v12469_v24 = vld [vmem:[#allocation26_spill] sm:$0xff] }
 0x358   : > { %9173 = vmatprep.subr.bf16.mxu0 %v12331_v46  ;;  %9158 = vmatmul.mubr.msk.bf16.vlgmr.msra.gmra.mrb[148].mxu1 %vm5481_vm3, %v5789_v18  ;;  %v12471_v36 = vpack.i.b16 %v12469_v24, %v12470_v57  ;;  %v12473_v18 = vld [vmem:[#allocation19_spill] sm:$0xff] }
 0x359   : > { %9381 = vpow2.f32 %v5654_v4  ;;  %9168 = vmatpush3.bf16.msra.mxu1 %v6773_v27  ;;  %9169 = vmatprep.mubr.msk.bf16.mxu1 %vm9603_vm1, %v12331_v46 }
 0x35a   : > { %9383 = vpow2.f32 %v5656_v59  ;;  %9179 = vmatprep.subr.bf16.mxu1 %v12331_v46  ;;  %v7003_v31 = vsel %vm5805_vm2, %v12471_v36, 0  ;;  %v7049_v59 = vsel %vm5805_vm2, %v12473_v18, 0 }
 0x35b   : > { %v9378_v17 = vpop.eup %9377  ;;  %v5559_v39 = vpop.xlane.xlu1 %5558 }
 0x35c   : > { %v5734_v0 = vsel %vm5481_vm3, %v9378_v17, 0.0  ;;  %v5790_v7 = vpack.c.bf16 %v9378_v17, %v9378_v17  ;;  %v9380_v8 = vpop.eup %9379  ;;  %v5603_v23 = vsub.f32 %v12460_v21, %v5559_v39  ;;  %v12476_v39 = vld [vmem:[#allocation30_spill] sm:$0xff] }
 0x35d   : > { %v5556_v29 = vpop.xlane.xlu0 %5555  ;;  %5735 = vadd.xlane.f32.xlu0 %v5734_v0  ;;  %v5737_v28 = vsel %vm5481_vm3, %v9380_v8, 0.0  ;;  %v5791_v37 = vpack.c.bf16 %v9380_v8, %v9380_v8 }
 0x35e   : > { %v5602_v51 = vsub.f32 %v12456_v52, %v5556_v29  ;;  %9164 = vmatmul.mubr.msk.bf16.vlgmr.msra.gmra.mrb[152].mxu0 %vm5481_vm3, %v5790_v7  ;;  %5738 = vadd.xlane.f32.xlu1 %v5737_v28  ;;  %v5660_v41 = vmul.f32 1.442695, %v5603_v23  ;;  %v12474_v7 = vld [vmem:[#allocation40_spill] sm:$0xff]  ;;  %v12478_v23 = vld [vmem:[#allocation21_spill] sm:$0xff] }
 0x35f   : > { %9174 = vmatpush3.bf16.msra.mxu0 %v6819_v35  ;;  %9175 = vmatprep.mubr.msk.bf16.mxu0 %vm9603_vm1, %v12331_v46 }
 0x360   : > { %v5658_v1 = vmul.f32 1.442695, %v5602_v51  ;;  %9185 = vmatprep.subr.bf16.mxu0 %v12331_v46  ;;  %9170 = vmatmul.mubr.msk.bf16.vlgmr.msra.gmra.mrb[152].mxu1 %vm5481_vm3, %v5791_v37  ;;  %v12475_v51 = vld [vmem:[#allocation18_spill] sm:$0xff]  ;;  %v7141_v37 = vsel %vm5805_vm2, %v12478_v23, 0 }
 0x361   : > { %9180 = vmatpush3.bf16.msra.mxu1 %v6865_v44  ;;  %9181 = vmatprep.mubr.msk.bf16.mxu1 %vm9603_vm1, %v12331_v46  ;;  %v12477_v3 = vpack.i.b16 %v12475_v51, %v12476_v39 }
 0x362   : > { %9385 = vpow2.f32 %v5658_v1  ;;  %9191 = vmatprep.subr.bf16.mxu1 %v12331_v46 }
 0x363   : > { %v9382_v50 = vpop.eup %9381  ;;  %9387 = vpow2.f32 %v5660_v41  ;;  %v5565_v61 = vpop.xlane.xlu1 %5564  ;;  %v7095_v63 = vsel %vm5805_vm2, %v12477_v3, 0  ;;  %v12483_v3 = vld [vmem:[#allocation11_spill] sm:$0xff] }
 0x364   : > { %v5740_v33 = vsel %vm5481_vm3, %v9382_v50, 0.0  ;;  %v5792_v22 = vpack.c.bf16 %v9382_v50, %v9382_v50  ;;  %v9384_v5 = vpop.eup %9383  ;;  %v5605_v38 = vsub.f32 %v12466_v25, %v5565_v61  ;;  %v12479_v50 = vld [vmem:[#allocation20_spill] sm:$0xff] }
 0x365   : > { %v5562_v12 = vpop.xlane.xlu0 %5561  ;;  %5741 = vadd.xlane.f32.xlu0 %v5740_v33  ;;  %v5743_v13 = vsel %vm5481_vm3, %v9384_v5, 0.0  ;;  %v5793_v11 = vpack.c.bf16 %v9384_v5, %v9384_v5 }
 0x366   : > { %v5604_v55 = vsub.f32 %v12462_v53, %v5562_v12  ;;  %9176 = vmatmul.mubr.msk.bf16.vlgmr.msra.gmra.mrb[156].mxu0 %vm5481_vm3, %v5792_v22  ;;  %5744 = vadd.xlane.f32.xlu1 %v5743_v13  ;;  %v5664_v19 = vmul.f32 1.442695, %v5605_v38  ;;  %v12480_v12 = vld [vmem:[#allocation15_spill] sm:$0xff] }
 0x367   : > { %9186 = vmatpush3.bf16.msra.mxu0 %v6911_v48  ;;  %9187 = vmatprep.mubr.msk.bf16.mxu0 %vm9603_vm1, %v12331_v46  ;;  %v12481_v33 = vpack.i.b16 %v12479_v50, %v12480_v12  ;;  %v12484_v50 = vld [vmem:[#allocation12_spill] sm:$0xff] }
 0x368   : > { %v5662_v47 = vmul.f32 1.442695, %v5604_v55  ;;  %9197 = vmatprep.subr.bf16.mxu0 %v12331_v46  ;;  %9182 = vmatmul.mubr.msk.bf16.vlgmr.msra.gmra.mrb[156].mxu1 %vm5481_vm3, %v5793_v11  ;;  %v12482_v55 = vld [vmem:[#allocation23_spill] sm:$0xff] }
 0x369   : > { %9192 = vmatpush3.bf16.msra.mxu1 %v6957_v9  ;;  %9193 = vmatprep.mubr.msk.bf16.mxu1 %vm9603_vm1, %v12331_v46  ;;  %v7187_v22 = vsel %vm5805_vm2, %v12481_v33, 0  ;;  %v7233_v61 = vsel %vm5805_vm2, %v12482_v55, 0 }
 0x36a   : > { %9389 = vpow2.f32 %v5662_v47  ;;  %9203 = vmatprep.subr.bf16.mxu1 %v12331_v46 }
 0x36b   : > { %9391 = vpow2.f32 %v5664_v19  ;;  %v5571_v16 = vpop.xlane.xlu1 %5570 }
 0x36c   : > { %v9386_v14 = vpop.eup %9385  ;;  %v5607_v4 = vsub.f32 %v12472_v62, %v5571_v16 }
 0x36d   : > { %v5568_v43 = vpop.xlane.xlu0 %5567  ;;  %v5746_v42 = vsel %vm5481_vm3, %v9386_v14, 0.0  ;;  %v5794_v40 = vpack.c.bf16 %v9386_v14, %v9386_v14  ;;  %v9388_v56 = vpop.eup %9387 }
 0x36e   : > { %v5606_v49 = vsub.f32 %v12468_v26, %v5568_v43  ;;  %5747 = vadd.xlane.f32.xlu0 %v5746_v42  ;;  %v5749_v58 = vsel %vm5481_vm3, %v9388_v56, 0.0  ;;  %v5795_v32 = vpack.c.bf16 %v9388_v56, %v9388_v56  ;;  %v5668_v15 = vmul.f32 1.442695, %v5607_v4 }
 0x36f   : > { %9188 = vmatmul.mubr.msk.bf16.vlgmr.msra.gmra.mrb[160].mxu0 %vm5481_vm3, %v5794_v40  ;;  %5750 = vadd.xlane.f32.xlu1 %v5749_v58 }
 0x370   : > { %v5666_v30 = vmul.f32 1.442695, %v5606_v49  ;;  %9198 = vmatpush3.bf16.msra.mxu0 %v7003_v31  ;;  %9199 = vmatprep.mubr.msk.bf16.mxu0 %vm9603_vm1, %v12331_v46 }
 0x371   : > { %9209 = vmatprep.subr.bf16.mxu0 %v12331_v46  ;;  %9194 = vmatmul.mubr.msk.bf16.vlgmr.msra.gmra.mrb[160].mxu1 %vm5481_vm3, %v5795_v32 }
 0x372   : > { %9393 = vpow2.f32 %v5666_v30  ;;  %9204 = vmatpush3.bf16.msra.mxu1 %v7049_v59  ;;  %9205 = vmatprep.mubr.msk.bf16.mxu1 %vm9603_vm1, %v12331_v46 }
 0x373   : > { %9395 = vpow2.f32 %v5668_v15  ;;  %9215 = vmatprep.subr.bf16.mxu1 %v12331_v46  ;;  %v5577_v52 = vpop.xlane.xlu1 %5576 }
 0x374   : > { %v9390_v54 = vpop.eup %9389  ;;  %v5609_v28 = vsub.f32 %v11742_v60, %v5577_v52 }
 0x375   : > { %v5574_v27 = vpop.xlane.xlu0 %5573  ;;  %v5752_v17 = vsel %vm5481_vm3, %v9390_v54, 0.0  ;;  %v5796_v29 = vpack.c.bf16 %v9390_v54, %v9390_v54  ;;  %v9392_v0 = vpop.eup %9391 }
 0x376   : > { %v5608_v8 = vsub.f32 %v12474_v7, %v5574_v27  ;;  %5753 = vadd.xlane.f32.xlu0 %v5752_v17  ;;  %v5755_v20 = vsel %vm5481_vm3, %v9392_v0, 0.0  ;;  %v5797_v1 = vpack.c.bf16 %v9392_v0, %v9392_v0  ;;  %v5672_v21 = vmul.f32 1.442695, %v5609_v28 }
 0x377   : > { %9200 = vmatmul.mubr.msk.bf16.vlgmr.msra.gmra.mrb[164].mxu0 %vm5481_vm3, %v5796_v29  ;;  %5756 = vadd.xlane.f32.xlu1 %v5755_v20 }
 0x378   : > { %v5670_v35 = vmul.f32 1.442695, %v5608_v8  ;;  %9210 = vmatpush3.bf16.msra.mxu0 %v7095_v63  ;;  %9211 = vmatprep.mubr.msk.bf16.mxu0 %vm9603_vm1, %v12331_v46 }
 0x379   : > { %9221 = vmatprep.subr.bf16.mxu0 %v12331_v46  ;;  %9206 = vmatmul.mubr.msk.bf16.vlgmr.msra.gmra.mrb[164].mxu1 %vm5481_vm3, %v5797_v1 }
 0x37a   : > { %9397 = vpow2.f32 %v5670_v35  ;;  %9216 = vmatpush3.bf16.msra.mxu1 %v7141_v37  ;;  %9217 = vmatprep.mubr.msk.bf16.mxu1 %vm9603_vm1, %v12331_v46 }
 0x37b   : > { %9399 = vpow2.f32 %v5672_v21  ;;  %9227 = vmatprep.subr.bf16.mxu1 %v12331_v46 }
 0x37c   : > { %v9394_v41 = vpop.eup %9393 }
 0x37d   : > { %v5758_v60 = vsel %vm5481_vm3, %v9394_v41, 0.0  ;;  %v5798_v6 = vpack.c.bf16 %v9394_v41, %v9394_v41  ;;  %v9396_v44 = vpop.eup %9395 }
 0x37e   : > { %5759 = vadd.xlane.f32.xlu0 %v5758_v60  ;;  %v5761_v5 = vsel %vm5481_vm3, %v9396_v44, 0.0  ;;  %v5799_v53 = vpack.c.bf16 %v9396_v44, %v9396_v44 }
 0x37f   : > { %9212 = vmatmul.mubr.msk.bf16.vlgmr.msra.gmra.mrb[168].mxu0 %vm5481_vm3, %v5798_v6  ;;  %5762 = vadd.xlane.f32.xlu1 %v5761_v5 }
 0x380   : > { %9222 = vmatpush3.bf16.msra.mxu0 %v7187_v22  ;;  %9223 = vmatprep.mubr.msk.bf16.mxu0 %vm9603_vm1, %v12331_v46 }
 0x381   : > { %9218 = vmatmul.mubr.msk.bf16.vlgmr.msra.gmra.mrb[168].mxu1 %vm5481_vm3, %v5799_v53 }
 0x382   : > { %9228 = vmatpush3.bf16.msra.mxu1 %v7233_v61  ;;  %9229 = vmatprep.mubr.msk.bf16.mxu1 %vm9603_vm1, %v12331_v46 }
 0x384   : > { %v9398_v10 = vpop.eup %9397 }
 0x385   : > { %v5764_v45 = vsel %vm5481_vm3, %v9398_v10, 0.0  ;;  %v5800_v2 = vpack.c.bf16 %v9398_v10, %v9398_v10  ;;  %v9400_v48 = vpop.eup %9399 }
 0x386   : > { %5765 = vadd.xlane.f32.xlu0 %v5764_v45  ;;  %v5767_v13 = vsel %vm5481_vm3, %v9400_v48, 0.0  ;;  %v5801_v47 = vpack.c.bf16 %v9400_v48, %v9400_v48 }
 0x387   : > { %9224 = vmatmul.mubr.msk.bf16.vlgmr.msra.gmra.mrb[172].mxu0 %vm5481_vm3, %v5800_v2  ;;  %5768 = vadd.xlane.f32.xlu1 %v5767_v13 }
 0x389   : > { %9230 = vmatmul.mubr.msk.bf16.vlgmr.msra.gmra.mrb[172].mxu1 %vm5481_vm3, %v5801_v47 }
 0x394   : > { %v5676_v25 = vpop.xlane.xlu0 %5675 }
 0x395   : > { %9401 = vrcp.f32 %v5676_v25 }
 0x398   : > { %v5679_v38 = vpop.xlane.xlu1 %5678 }
 0x39e   : > { %v5682_v11 = vpop.xlane.xlu0 %5681 }
 0x39f   : > { %9403 = vrcp.f32 %v5682_v11  ;;  %v9402_v56 = vpop.eup %9401 }
 0x3a0   : > { %9405 = vrcp.f32 %v5679_v38 }
 0x3a2   : > { %v5685_v19 = vpop.xlane.xlu1 %5684 }
 0x3a3   : > { %9407 = vrcp.f32 %v5685_v19 }
 0x3a6   : > { %v5688_v16 = vpop.xlane.xlu0 %5687 }
 0x3a7   : > { %9409 = vrcp.f32 %v5688_v16 }
 0x3a8   : > { %v5691_v62 = vpop.xlane.xlu1 %5690 }
 0x3a9   : > { %v9404_v49 = vpop.eup %9403 }
 0x3aa   : > { %v9406_v30 = vpop.eup %9405 }
 0x3ad   : > { %v9408_v18 = vpop.eup %9407 }
 0x3ae   : > { %v5694_v59 = vpop.xlane.xlu0 %5693 }
 0x3af   : > { %9411 = vrcp.f32 %v5694_v59 }
 0x3b0   : > { %v5697_v7 = vpop.xlane.xlu1 %5696  ;;  %9413 = vrcp.f32 %v5691_v62 }
 0x3b1   : > { %9415 = vrcp.f32 %v5697_v7  ;;  %v9410_v47 = vpop.eup %9409 }
 0x3b6   : > { %v5700_v61 = vpop.xlane.xlu0 %5699 }
 0x3b7   : > { %9417 = vrcp.f32 %v5700_v61 }
 0x3b9   : > { %v9412_v38 = vpop.eup %9411 }
 0x3db   : > { %v5843_v46 = vpop.f32.mrb[112].mxu0 }
 0x3dc   : > { %v9045_v34 = vpop.f32.mrb[113].mxu0  ;;  %v7307_v57 = vmul.f32 %v9402_v56, %v5843_v46 }
 0x3dd   : > { %v5846_v9 = vpop.f32.mrb[114].mxu0 }
 0x3de   : > { %v9046_v14 = vpop.f32.mrb[115].mxu0 }
 0x3df   : > { %v5889_v43 = vpop.f32.mrb[112].mxu1  ;;  %v9414_v14 = vpop.eup %9413 }
 0x3e0   : > { %v9051_v42 = vpop.f32.mrb[113].mxu1  ;;  %v7308_v27 = vmul.f32 %v9406_v30, %v5889_v43  ;;  %v5703_v43 = vpop.xlane.xlu1 %5702 }
 0x3e1   : > { %v5892_v40 = vpop.f32.mrb[114].mxu1 }
 0x3e2   : > { %v9052_v26 = vpop.f32.mrb[115].mxu1 }
 0x3e3   : > { %v5706_v26 = vpop.xlane.xlu0 %5705 }
 0x3e4   : > { %9419 = vrcp.f32 %v5706_v26 }
 0x3e5   : > { %v5935_v24 = vpop.f32.mrb[116].mxu0  ;;  %9421 = vrcp.f32 %v5703_v43 }
 0x3e6   : > { %v7309_v36 = vmul.f32 %v9404_v49, %v5935_v24  ;;  %v9057_v31 = vpop.f32.mrb[117].mxu0 }
 0x3e7   : > { %v5938_v58 = vpop.f32.mrb[118].mxu0  ;;  %v9416_v31 = vpop.eup %9415 }
 0x3e8   : > { %v7339_v4 = vcombine.low %v7307_v57, %v7309_v36  ;;  %v7340_v32 = vcombine.high %v7307_v57, %v7309_v36  ;;  %v9058_v15 = vpop.f32.mrb[119].mxu0 }
 0x3e9   : > { %v5981_v54 = vpop.f32.mrb[116].mxu1 }
 0x3ea   : > { %v7310_v17 = vmul.f32 %v9408_v18, %v5981_v54  ;;  %v9063_v29 = vpop.f32.mrb[117].mxu1  ;;  %v7347_v63 = vrot.slane %v7339_v4, %v12483_v3  ;;  %v7354_v20 = vrot.slane %v7340_v32, %v12483_v3  ;;  %v5709_v54 = vpop.xlane.xlu1 %5708 }
 0x3eb   : > { %v5984_v0 = vpop.f32.mrb[118].mxu1  ;;  %9423 = vrcp.f32 %v5709_v54 }
 0x3ec   : > { %v7355_v8 = vcombine.low %v7308_v27, %v7310_v17  ;;  %v7356_v52 = vcombine.high %v7308_v27, %v7310_v17  ;;  %v9064_v51 = vpop.f32.mrb[119].mxu1 }
 0x3ed   : > { %v6027_v39 = vpop.f32.mrb[120].mxu0 }
 0x3ee   : > { %v7363_v35 = vrot.slane %v7355_v8, %v12483_v3  ;;  %v7370_v28 = vrot.slane %v7356_v52, %v12483_v3  ;;  %v9069_v1 = vpop.f32.mrb[121].mxu0  ;;  %v7311_v42 = vmul.f32 %v9410_v47, %v6027_v39  ;;  %v5715_v43 = vpop.xlane.xlu1 %5714 }
 0x3ef   : > { %v6030_v21 = vpop.f32.mrb[122].mxu0 }
 0x3f0   : > { %v7371_v23 = vcombine.low %v7347_v63, %v7363_v35  ;;  %v7372_v37 = vcombine.high %v7347_v63, %v7363_v35  ;;  %v7387_v41 = vcombine.low %v7354_v20, %v7370_v28  ;;  %v7388_v60 = vcombine.high %v7354_v20, %v7370_v28  ;;  %v9070_v6 = vpop.f32.mrb[123].mxu0 }
 0x3f1   : > { %v6073_v44 = vpop.f32.mrb[120].mxu1 }
 0x3f2   : > { %v7379_v12 = vrot.slane %v7371_v23, %v12484_v50  ;;  %v7386_v33 = vrot.slane %v7372_v37, %v12484_v50  ;;  %v7395_v22 = vrot.slane %v7387_v41, %v12484_v50  ;;  %v7402_v5 = vrot.slane %v7388_v60, %v12484_v50  ;;  %v9075_v53 = vpop.f32.mrb[121].mxu1 }
 0x3f3   : > { %v6076_v55 = vpop.f32.mrb[122].mxu1  ;;  %v7312_v27 = vmul.f32 %v9414_v14, %v6073_v44 }
 0x3f4   : > { %v7883_v10 = vcombine.low %v7379_v12, %v7386_v33  ;;  %v8696_v45 = vcombine.high %v7379_v12, %v7386_v33  ;;  %v7899_v2 = vcombine.low %v7395_v22, %v7402_v5  ;;  %v8697_v48 = vcombine.high %v7395_v22, %v7402_v5  ;;  %v9076_v13 = vpop.f32.mrb[123].mxu1  ;;  %v9418_v5 = vpop.eup %9417 }
 0x3f5   : > { %v6119_v25 = vpop.f32.mrb[124].mxu0  ;;  %v5712_v13 = vpop.xlane.xlu0 %5711 }
 0x3f6   : > { %v7890_v11 = vrot.slane %v7883_v10, %v12483_v3  ;;  %v7898_v19 = vrot.slane %v8696_v45, %v12483_v3  ;;  %v7906_v46 = vrot.slane %v7899_v2, %v12483_v3  ;;  %v7914_v34 = vrot.slane %v8697_v48, %v12483_v3  ;;  %v9081_v9 = vpop.f32.mrb[125].mxu0  ;;  %v9420_v48 = vpop.eup %9419 }
 0x3f7   : > { %v7313_v40 = vmul.f32 %v9412_v38, %v6119_v25  ;;  %v6122_v56 = vpop.f32.mrb[126].mxu0  ;;  %v9422_v14 = vpop.eup %9421  ;;  %9425 = vrcp.f32 %v5712_v13 }
 0x3f8   : > { %v7915_v49 = vcombine.low %v7890_v11, %v7898_v19  ;;  %v7916_v16 = vcombine.high %v7890_v11, %v7898_v19  ;;  %v7931_v24 = vcombine.low %v7906_v46, %v7914_v34  ;;  %v7932_v57 = vcombine.high %v7906_v46, %v7914_v34  ;;  %v9082_v36 = vpop.f32.mrb[127].mxu0 }
 0x3f9   : > { %v7407_v58 = vcombine.low %v7311_v42, %v7313_v40  ;;  %v7408_v30 = vcombine.high %v7311_v42, %v7313_v40  ;;  %v6165_v62 = vpop.f32.mrb[124].mxu1  ;;  %9427 = vrcp.f32 %v5715_v43 }
 0x3fa   : > { %v7923_v4 = vrot.slane %v7915_v49, %v12484_v50  ;;  %v7930_v32 = vrot.slane %v7916_v16, %v12484_v50  ;;  %v7939_v15 = vrot.slane %v7931_v24, %v12484_v50  ;;  %v7946_v18 = vrot.slane %v7932_v57, %v12484_v50  ;;  %v9087_v59 = vpop.f32.mrb[125].mxu1  ;;  %v9424_v16 = vpop.eup %9423 }
 0x3fb   : > { %v7314_v17 = vmul.f32 %v9416_v31, %v6165_v62  ;;  %v6168_v29 = vpop.f32.mrb[126].mxu1  ;;  %v7415_v28 = vrot.slane %v7407_v58, %v12483_v3  ;;  %v7422_v1 = vrot.slane %v7408_v30, %v12483_v3  ;;  %v5718_v31 = vpop.xlane.xlu0 %5717 }
 0x3fc   : > { %v7947_v0 = vcombine.low %v7923_v4, %v7939_v15  ;;  %v7948_v7 = vcombine.high %v7923_v4, %v7939_v15  ;;  %v7949_v8 = vcombine.low %v7930_v32, %v7946_v18  ;;  %v7950_v52 = vcombine.high %v7930_v32, %v7946_v18  ;;  %v9088_v51 = vpop.f32.mrb[127].mxu1 }
 0x3fd   : > { %v7423_v39 = vcombine.low %v7312_v27, %v7314_v17  ;;  %v7424_v63 = vcombine.high %v7312_v27, %v7314_v17  ;;  %v6211_v20 = vpop.f32.mrb[128].mxu0  ;;  %9429 = vrcp.f32 %v5718_v31 }
 0x3fe   : > { %8427 = vst [vmem:[%s12039_s17] sm:$0xff] %v7947_v0  ;;  %8428 = vst [vmem:[%s12039_s17 + $0x8] sm:$0xff] %v7948_v7  ;;  %v9093_v35 = vpop.f32.mrb[129].mxu0  ;;  %v7315_v46 = vmul.f32 %v9418_v5, %v6211_v20  ;;  %v5721_v7 = vpop.xlane.xlu1 %5720 }
 0x3ff   : > { %8429 = vst [vmem:[%s12039_s17 + $0x10] sm:$0xff] %v7949_v8  ;;  %8430 = vst [vmem:[%s12039_s17 + $0x18] sm:$0xff] %v7950_v52  ;;  %v7431_v21 = vrot.slane %v7423_v39, %v12483_v3  ;;  %v7438_v23 = vrot.slane %v7424_v63, %v12483_v3  ;;  %v6214_v37 = vpop.f32.mrb[130].mxu0  ;;  %9431 = vrcp.f32 %v5721_v7 }
 0x400   : > { %v9094_v41 = vpop.f32.mrb[131].mxu0 }
 0x401   : > { %v7439_v60 = vcombine.low %v7415_v28, %v7431_v21  ;;  %v7440_v6 = vcombine.high %v7415_v28, %v7431_v21  ;;  %v7455_v44 = vcombine.low %v7422_v1, %v7438_v23  ;;  %v7456_v12 = vcombine.high %v7422_v1, %v7438_v23  ;;  %v6257_v33 = vpop.f32.mrb[128].mxu1 }
 0x402   : > { %v9099_v22 = vpop.f32.mrb[129].mxu1  ;;  %v7316_v15 = vmul.f32 %v9422_v14, %v6257_v33 }
 0x403   : > { %v7447_v53 = vrot.slane %v7439_v60, %v12484_v50  ;;  %v7454_v55 = vrot.slane %v7440_v6, %v12484_v50  ;;  %v7463_v61 = vrot.slane %v7455_v44, %v12484_v50  ;;  %v7470_v10 = vrot.slane %v7456_v12, %v12484_v50  ;;  %v6260_v45 = vpop.f32.mrb[130].mxu1 }
 0x404   : > { %v9100_v2 = vpop.f32.mrb[131].mxu1 }
 0x405   : > { %v7951_v47 = vcombine.low %v7447_v53, %v7454_v55  ;;  %v8698_v25 = vcombine.high %v7447_v53, %v7454_v55  ;;  %v7967_v38 = vcombine.low %v7463_v61, %v7470_v10  ;;  %v8699_v11 = vcombine.high %v7463_v61, %v7470_v10  ;;  %v6303_v19 = vpop.f32.mrb[132].mxu0  ;;  %v9426_v53 = vpop.eup %9425 }
 0x406   : > { %v7317_v34 = vmul.f32 %v9420_v48, %v6303_v19  ;;  %v9105_v9 = vpop.f32.mrb[133].mxu0  ;;  %v9428_v13 = vpop.eup %9427 }
 0x407   : > { %v7958_v42 = vrot.slane %v7951_v47, %v12483_v3  ;;  %v7966_v40 = vrot.slane %v8698_v25, %v12483_v3  ;;  %v7974_v56 = vrot.slane %v7967_v38, %v12483_v3  ;;  %v7982_v26 = vrot.slane %v8699_v11, %v12483_v3  ;;  %v6306_v49 = vpop.f32.mrb[134].mxu0  ;;  %v5724_v47 = vpop.xlane.xlu0 %5723 }
 0x408   : > { %v7475_v24 = vcombine.low %v7315_v46, %v7317_v34  ;;  %v7476_v57 = vcombine.high %v7315_v46, %v7317_v34  ;;  %v9106_v36 = vpop.f32.mrb[135].mxu0  ;;  %v9430_v9 = vpop.eup %9429  ;;  %9433 = vrcp.f32 %v5724_v47 }
 0x409   : > { %v7983_v58 = vcombine.low %v7958_v42, %v7966_v40  ;;  %v7984_v30 = vcombine.high %v7958_v42, %v7966_v40  ;;  %v7999_v62 = vcombine.low %v7974_v56, %v7982_v26  ;;  %v8000_v4 = vcombine.high %v7974_v56, %v7982_v26  ;;  %v6349_v32 = vpop.f32.mrb[132].mxu1  ;;  %v5727_v26 = vpop.xlane.xlu1 %5726 }
 0x40a   : > { %v7318_v18 = vmul.f32 %v9424_v16, %v6349_v32  ;;  %v9111_v59 = vpop.f32.mrb[133].mxu1  ;;  %v7483_v1 = vrot.slane %v7475_v24, %v12483_v3  ;;  %v7490_v21 = vrot.slane %v7476_v57, %v12483_v3 }
 0x40b   : > { %v7991_v54 = vrot.slane %v7983_v58, %v12484_v50  ;;  %v7998_v27 = vrot.slane %v7984_v30, %v12484_v50  ;;  %v8007_v17 = vrot.slane %v7999_v62, %v12484_v50  ;;  %v8014_v29 = vrot.slane %v8000_v4, %v12484_v50  ;;  %v6352_v0 = vpop.f32.mrb[134].mxu1  ;;  %v5730_v57 = vpop.xlane.xlu0 %5729 }
 0x40c   : > { %v7491_v8 = vcombine.low %v7316_v15, %v7318_v18  ;;  %v7492_v52 = vcombine.high %v7316_v15, %v7318_v18  ;;  %v9112_v51 = vpop.f32.mrb[135].mxu1  ;;  %v9432_v4 = vpop.eup %9431  ;;  %9435 = vrcp.f32 %v5730_v57 }
 0x40d   : > { %v8015_v39 = vcombine.low %v7991_v54, %v8007_v17  ;;  %v8016_v63 = vcombine.high %v7991_v54, %v8007_v17  ;;  %v8017_v20 = vcombine.low %v7998_v27, %v8014_v29  ;;  %v8018_v35 = vcombine.high %v7998_v27, %v8014_v29  ;;  %v6395_v28 = vpop.f32.mrb[136].mxu0  ;;  %v5733_v0 = vpop.xlane.xlu1 %5732 }
 0x40e   : > { %v7499_v23 = vrot.slane %v7491_v8, %v12483_v3  ;;  %v7506_v37 = vrot.slane %v7492_v52, %v12483_v3  ;;  %v9117_v41 = vpop.f32.mrb[137].mxu0  ;;  %v7319_v49 = vmul.f32 %v9426_v53, %v6395_v28  ;;  %9437 = vrcp.f32 %v5727_v26 }
 0x40f   : > { %8431 = vst [vmem:[%s12039_s17 + $0x20] sm:$0xff] %v8015_v39  ;;  %8432 = vst [vmem:[%s12039_s17 + $0x28] sm:$0xff] %v8016_v63  ;;  %v6398_v60 = vpop.f32.mrb[138].mxu0  ;;  %9439 = vrcp.f32 %v5733_v0 }
 0x410   : > { %8433 = vst [vmem:[%s12039_s17 + $0x30] sm:$0xff] %v8017_v20  ;;  %8434 = vst [vmem:[%s12039_s17 + $0x38] sm:$0xff] %v8018_v35  ;;  %v7507_v6 = vcombine.low %v7483_v1, %v7499_v23  ;;  %v7508_v44 = vcombine.high %v7483_v1, %v7499_v23  ;;  %v7523_v12 = vcombine.low %v7490_v21, %v7506_v37  ;;  %v9118_v22 = vpop.f32.mrb[139].mxu0 }
 0x411   : > { %v7524_v33 = vcombine.high %v7490_v21, %v7506_v37  ;;  %v6441_v5 = vpop.f32.mrb[136].mxu1  ;;  %v5739_v26 = vpop.xlane.xlu1 %5738 }
 0x412   : > { %v7515_v55 = vrot.slane %v7507_v6, %v12484_v50  ;;  %v7522_v61 = vrot.slane %v7508_v44, %v12484_v50  ;;  %v7531_v10 = vrot.slane %v7523_v12, %v12484_v50  ;;  %v9123_v2 = vpop.f32.mrb[137].mxu1  ;;  %v7320_v7 = vmul.f32 %v9428_v13, %v6441_v5 }
 0x413   : > { %v7538_v45 = vrot.slane %v7524_v33, %v12484_v50  ;;  %v6444_v48 = vpop.f32.mrb[138].mxu1 }
 0x414   : > { %v8019_v25 = vcombine.low %v7515_v55, %v7522_v61  ;;  %v8700_v38 = vcombine.high %v7515_v55, %v7522_v61  ;;  %v9124_v46 = vpop.f32.mrb[139].mxu1 }
 0x415   : > { %v8035_v11 = vcombine.low %v7531_v10, %v7538_v45  ;;  %v8701_v19 = vcombine.high %v7531_v10, %v7538_v45  ;;  %v6487_v34 = vpop.f32.mrb[140].mxu0  ;;  %v9434_v10 = vpop.eup %9433 }
 0x416   : > { %v8026_v14 = vrot.slane %v8019_v25, %v12483_v3  ;;  %v8034_v43 = vrot.slane %v8700_v38, %v12483_v3  ;;  %v9129_v56 = vpop.f32.mrb[141].mxu0  ;;  %v7321_v16 = vmul.f32 %v9430_v9, %v6487_v34  ;;  %v9436_v38 = vpop.eup %9435 }
 0x417   : > { %v8042_v42 = vrot.slane %v8035_v11, %v12483_v3  ;;  %v8050_v40 = vrot.slane %v8701_v19, %v12483_v3  ;;  %v6490_v24 = vpop.f32.mrb[142].mxu0  ;;  %v5736_v11 = vpop.xlane.xlu0 %5735 }
 0x418   : > { %v8051_v36 = vcombine.low %v8026_v14, %v8034_v43  ;;  %v8052_v31 = vcombine.high %v8026_v14, %v8034_v43  ;;  %v9130_v62 = vpop.f32.mrb[143].mxu0  ;;  %v7543_v32 = vcombine.low %v7319_v49, %v7321_v16  ;;  %v7544_v15 = vcombine.high %v7319_v49, %v7321_v16  ;;  %v9438_v56 = vpop.eup %9437 }
 0x419   : > { %v8067_v58 = vcombine.low %v8042_v42, %v8050_v40  ;;  %v8068_v30 = vcombine.high %v8042_v42, %v8050_v40  ;;  %v6533_v18 = vpop.f32.mrb[140].mxu1  ;;  %9441 = vrcp.f32 %v5736_v11 }
 0x41a   : > { %v8059_v59 = vrot.slane %v8051_v36, %v12484_v50  ;;  %v8066_v54 = vrot.slane %v8052_v31, %v12484_v50  ;;  %v9135_v29 = vpop.f32.mrb[141].mxu1  ;;  %v7322_v8 = vmul.f32 %v9432_v4, %v6533_v18  ;;  %v7551_v37 = vrot.slane %v7543_v32, %v12483_v3  ;;  %v9440_v31 = vpop.eup %9439 }
 0x41b   : > { %v8075_v27 = vrot.slane %v8067_v58, %v12484_v50  ;;  %v8082_v17 = vrot.slane %v8068_v30, %v12484_v50  ;;  %v6536_v52 = vpop.f32.mrb[142].mxu1  ;;  %v7558_v41 = vrot.slane %v7544_v15, %v12483_v3  ;;  %v5742_v4 = vpop.xlane.xlu0 %5741  ;;  %9443 = vrcp.f32 %v5739_v26 }
 0x41c   : > { %v9136_v35 = vpop.f32.mrb[143].mxu1  ;;  %v7559_v28 = vcombine.low %v7320_v7, %v7322_v8  ;;  %v7560_v1 = vcombine.high %v7320_v7, %v7322_v8  ;;  %9445 = vrcp.f32 %v5742_v4 }
 0x41d   : > { %v8083_v51 = vcombine.low %v8059_v59, %v8075_v27  ;;  %v8084_v39 = vcombine.high %v8059_v59, %v8075_v27  ;;  %v8085_v63 = vcombine.low %v8066_v54, %v8082_v17  ;;  %v8086_v20 = vcombine.high %v8066_v54, %v8082_v17 }
 0x41e   : > { %v6579_v21 = vpop.f32.mrb[144].mxu0  ;;  %v7567_v60 = vrot.slane %v7559_v28, %v12483_v3  ;;  %v7574_v6 = vrot.slane %v7560_v1, %v12483_v3 }
 0x41f   : > { %8435 = vst [vmem:[%s12039_s17 + $0x40] sm:$0xff] %v8083_v51  ;;  %8436 = vst [vmem:[%s12039_s17 + $0x48] sm:$0xff] %v8084_v39  ;;  %v9141_v23 = vpop.f32.mrb[145].mxu0  ;;  %v7323_v43 = vmul.f32 %v9434_v10, %v6579_v21  ;;  %v5745_v39 = vpop.xlane.xlu1 %5744 }
 0x420   : > { %8437 = vst [vmem:[%s12039_s17 + $0x50] sm:$0xff] %v8085_v63  ;;  %8438 = vst [vmem:[%s12039_s17 + $0x58] sm:$0xff] %v8086_v20  ;;  %v6582_v44 = vpop.f32.mrb[146].mxu0  ;;  %v7575_v33 = vcombine.low %v7551_v37, %v7567_v60  ;;  %v7576_v22 = vcombine.high %v7551_v37, %v7567_v60  ;;  %v7591_v5 = vcombine.low %v7558_v41, %v7574_v6  ;;  %9447 = vrcp.f32 %v5745_v39 }
 0x421   : > { %v9142_v12 = vpop.f32.mrb[147].mxu0  ;;  %v7592_v53 = vcombine.high %v7558_v41, %v7574_v6  ;;  %v6625_v55 = vpop.f32.mrb[144].mxu1 }
 0x422   : > { %v9147_v61 = vpop.f32.mrb[145].mxu1  ;;  %v7583_v45 = vrot.slane %v7575_v33, %v12484_v50  ;;  %v7590_v2 = vrot.slane %v7576_v22, %v12484_v50  ;;  %v7599_v48 = vrot.slane %v7591_v5, %v12484_v50  ;;  %v7324_v27 = vmul.f32 %v9438_v56, %v6625_v55 }
 0x423   : > { %v7606_v13 = vrot.slane %v7592_v53, %v12484_v50  ;;  %v6628_v47 = vpop.f32.mrb[146].mxu1 }
 0x424   : > { %v9148_v25 = vpop.f32.mrb[147].mxu1  ;;  %v8087_v19 = vcombine.low %v7583_v45, %v7590_v2  ;;  %v8702_v46 = vcombine.high %v7583_v45, %v7590_v2  ;;  %v9442_v45 = vpop.eup %9441 }
 0x425   : > { %v8103_v34 = vcombine.low %v7599_v48, %v7606_v13  ;;  %v8703_v9 = vcombine.high %v7599_v48, %v7606_v13  ;;  %v9444_v11 = vpop.eup %9443 }
 0x426   : > { %v8094_v49 = vrot.slane %v8087_v19, %v12483_v3  ;;  %v8102_v16 = vrot.slane %v8702_v46, %v12483_v3  ;;  %v5748_v19 = vpop.xlane.xlu0 %5747 }
 0x427   : > { %v8110_v24 = vrot.slane %v8103_v34, %v12483_v3  ;;  %v8118_v57 = vrot.slane %v8703_v9, %v12483_v3  ;;  %9449 = vrcp.f32 %v5748_v19 }
 0x428   : > { %v8119_v32 = vcombine.low %v8094_v49, %v8102_v16  ;;  %v8120_v15 = vcombine.high %v8094_v49, %v8102_v16 }
 0x429   : > { %v6671_v14 = vpop.f32.mrb[148].mxu0  ;;  %v8135_v18 = vcombine.low %v8110_v24, %v8118_v57  ;;  %v8136_v59 = vcombine.high %v8110_v24, %v8118_v57  ;;  %v5751_v57 = vpop.xlane.xlu1 %5750 }
 0x42a   : > { %v7325_v42 = vmul.f32 %v9436_v38, %v6671_v14  ;;  %v9153_v40 = vpop.f32.mrb[149].mxu0  ;;  %v8127_v0 = vrot.slane %v8119_v32, %v12484_v50  ;;  %v8134_v7 = vrot.slane %v8120_v15, %v12484_v50 }
 0x42b   : > { %v6674_v36 = vpop.f32.mrb[150].mxu0  ;;  %v6717_v54 = vpop.f32.mrb[148].mxu1  ;;  %v8143_v8 = vrot.slane %v8135_v18, %v12484_v50  ;;  %v8150_v52 = vrot.slane %v8136_v59, %v12484_v50 }
 0x42c   : > { %v7611_v58 = vcombine.low %v7323_v43, %v7325_v42  ;;  %v7612_v30 = vcombine.high %v7323_v43, %v7325_v42  ;;  %v9154_v62 = vpop.f32.mrb[151].mxu0  ;;  %v7326_v17 = vmul.f32 %v9440_v31, %v6717_v54  ;;  %v9159_v29 = vpop.f32.mrb[149].mxu1 }
 0x42d   : > { %v6720_v51 = vpop.f32.mrb[150].mxu1  ;;  %v8151_v28 = vcombine.low %v8127_v0, %v8143_v8  ;;  %v8152_v1 = vcombine.high %v8127_v0, %v8143_v8  ;;  %v8153_v21 = vcombine.low %v8134_v7, %v8150_v52  ;;  %v8154_v23 = vcombine.high %v8134_v7, %v8150_v52  ;;  %v9446_v40 = vpop.eup %9445 }
 0x42e   : > { %v7627_v63 = vcombine.low %v7324_v27, %v7326_v17  ;;  %v7628_v20 = vcombine.high %v7324_v27, %v7326_v17  ;;  %v9160_v35 = vpop.f32.mrb[151].mxu1  ;;  %v7619_v41 = vrot.slane %v7611_v58, %v12483_v3  ;;  %v7626_v60 = vrot.slane %v7612_v30, %v12483_v3  ;;  %v5754_v30 = vpop.xlane.xlu0 %5753 }
 0x42f   : > { %8439 = vst [vmem:[%s12039_s17 + $0x60] sm:$0xff] %v8151_v28  ;;  %8440 = vst [vmem:[%s12039_s17 + $0x68] sm:$0xff] %v8152_v1  ;;  %v9448_v59 = vpop.eup %9447  ;;  %9451 = vrcp.f32 %v5754_v30  ;;  %v5757_v51 = vpop.xlane.xlu1 %5756 }
 0x430   : > { %v7635_v6 = vrot.slane %v7627_v63, %v12483_v3  ;;  %v7642_v44 = vrot.slane %v7628_v20, %v12483_v3  ;;  %8441 = vst [vmem:[%s12039_s17 + $0x70] sm:$0xff] %v8153_v21  ;;  %8442 = vst [vmem:[%s12039_s17 + $0x78] sm:$0xff] %v8154_v23  ;;  %9453 = vrcp.f32 %v5751_v57 }
 0x431   : > { %v6763_v37 = vpop.f32.mrb[152].mxu0  ;;  %9455 = vrcp.f32 %v5757_v51 }
 0x432   : > { %v9165_v12 = vpop.f32.mrb[153].mxu0  ;;  %v7643_v22 = vcombine.low %v7619_v41, %v7635_v6  ;;  %v7644_v5 = vcombine.high %v7619_v41, %v7635_v6  ;;  %v7659_v53 = vcombine.low %v7626_v60, %v7642_v44  ;;  %v7660_v55 = vcombine.high %v7626_v60, %v7642_v44 }
 0x433   : > { %v6766_v33 = vpop.f32.mrb[154].mxu0  ;;  %v6809_v10 = vpop.f32.mrb[152].mxu1  ;;  %v7327_v36 = vmul.f32 %v9442_v45, %v6763_v37 }
 0x434   : > { %v9166_v61 = vpop.f32.mrb[155].mxu0  ;;  %v7651_v2 = vrot.slane %v7643_v22, %v12484_v50  ;;  %v7658_v48 = vrot.slane %v7644_v5, %v12484_v50  ;;  %v7667_v13 = vrot.slane %v7659_v53, %v12484_v50  ;;  %v7674_v47 = vrot.slane %v7660_v55, %v12484_v50  ;;  %v9171_v25 = vpop.f32.mrb[153].mxu1 }
 0x435   : > { %v6812_v38 = vpop.f32.mrb[154].mxu1  ;;  %v7328_v39 = vmul.f32 %v9444_v11, %v6809_v10  ;;  %v5763_v57 = vpop.xlane.xlu1 %5762 }
 0x436   : > { %v8155_v46 = vcombine.low %v7651_v2, %v7658_v48  ;;  %v8704_v34 = vcombine.high %v7651_v2, %v7658_v48  ;;  %v8171_v9 = vcombine.low %v7667_v13, %v7674_v47  ;;  %v8705_v14 = vcombine.high %v7667_v13, %v7674_v47  ;;  %v9172_v43 = vpop.f32.mrb[155].mxu1  ;;  %v9450_v13 = vpop.eup %9449 }
 0x438   : > { %v8162_v56 = vrot.slane %v8155_v46, %v12483_v3  ;;  %v8170_v26 = vrot.slane %v8704_v34, %v12483_v3  ;;  %v8178_v49 = vrot.slane %v8171_v9, %v12483_v3  ;;  %v8186_v16 = vrot.slane %v8705_v14, %v12483_v3  ;;  %v5760_v9 = vpop.xlane.xlu0 %5759 }
 0x439   : > { %v6855_v42 = vpop.f32.mrb[156].mxu0  ;;  %v9452_v34 = vpop.eup %9451  ;;  %9457 = vrcp.f32 %v5760_v9 }
 0x43a   : > { %v9177_v24 = vpop.f32.mrb[157].mxu0  ;;  %v7329_v31 = vmul.f32 %v9446_v40, %v6855_v42  ;;  %v8187_v62 = vcombine.low %v8162_v56, %v8170_v26  ;;  %v8188_v4 = vcombine.high %v8162_v56, %v8170_v26  ;;  %v8203_v32 = vcombine.low %v8178_v49, %v8186_v16 }
 0x43b   : > { %v6858_v58 = vpop.f32.mrb[158].mxu0  ;;  %v8204_v15 = vcombine.high %v8178_v49, %v8186_v16  ;;  %v6901_v17 = vpop.f32.mrb[156].mxu1  ;;  %9459 = vrcp.f32 %v5763_v57 }
 0x43c   : > { %v9178_v18 = vpop.f32.mrb[159].mxu0  ;;  %v7679_v54 = vcombine.low %v7327_v36, %v7329_v31  ;;  %v7680_v27 = vcombine.high %v7327_v36, %v7329_v31  ;;  %v8195_v29 = vrot.slane %v8187_v62, %v12484_v50  ;;  %v8202_v0 = vrot.slane %v8188_v4, %v12484_v50  ;;  %v9183_v52 = vpop.f32.mrb[157].mxu1 }
 0x43d   : > { %v8211_v7 = vrot.slane %v8203_v32, %v12484_v50  ;;  %v8218_v8 = vrot.slane %v8204_v15, %v12484_v50  ;;  %v7330_v63 = vmul.f32 %v9448_v59, %v6901_v17  ;;  %v6904_v20 = vpop.f32.mrb[158].mxu1  ;;  %v9454_v24 = vpop.eup %9453 }
 0x43e   : > { %v9184_v23 = vpop.f32.mrb[159].mxu1  ;;  %v7687_v44 = vrot.slane %v7679_v54, %v12483_v3  ;;  %v7694_v12 = vrot.slane %v7680_v27, %v12483_v3  ;;  %v9456_v4 = vpop.eup %9455 }
 0x43f   : > { %v8219_v35 = vcombine.low %v8195_v29, %v8211_v7  ;;  %v8220_v28 = vcombine.high %v8195_v29, %v8211_v7  ;;  %v8221_v1 = vcombine.low %v8202_v0, %v8218_v8  ;;  %v8222_v21 = vcombine.high %v8202_v0, %v8218_v8  ;;  %v5766_v59 = vpop.xlane.xlu0 %5765 }
 0x440   : > { %v7695_v37 = vcombine.low %v7328_v39, %v7330_v63  ;;  %v7696_v41 = vcombine.high %v7328_v39, %v7330_v63  ;;  %9461 = vrcp.f32 %v5766_v59 }
 0x441   : > { %8443 = vst [vmem:[%s12039_s17 + $0x80] sm:$0xff] %v8219_v35  ;;  %8444 = vst [vmem:[%s12039_s17 + $0x88] sm:$0xff] %v8220_v28  ;;  %v5769_v28 = vpop.xlane.xlu1 %5768 }
 0x442   : > { %v6947_v60 = vpop.f32.mrb[160].mxu0  ;;  %8445 = vst [vmem:[%s12039_s17 + $0x90] sm:$0xff] %v8221_v1  ;;  %8446 = vst [vmem:[%s12039_s17 + $0x98] sm:$0xff] %v8222_v21  ;;  %v7703_v33 = vrot.slane %v7695_v37, %v12483_v3  ;;  %v7710_v22 = vrot.slane %v7696_v41, %v12483_v3  ;;  %9463 = vrcp.f32 %v5769_v28 }
 0x443   : > { %v9189_v6 = vpop.f32.mrb[161].mxu0  ;;  %v7331_v26 = vmul.f32 %v9450_v13, %v6947_v60 }
 0x444   : > { %v6950_v5 = vpop.f32.mrb[162].mxu0  ;;  %v7711_v55 = vcombine.low %v7687_v44, %v7703_v33  ;;  %v7712_v61 = vcombine.high %v7687_v44, %v7703_v33  ;;  %v7727_v10 = vcombine.low %v7694_v12, %v7710_v22  ;;  %v7728_v45 = vcombine.high %v7694_v12, %v7710_v22  ;;  %v6993_v2 = vpop.f32.mrb[160].mxu1 }
 0x445   : > { %v9190_v53 = vpop.f32.mrb[163].mxu0  ;;  %v9195_v48 = vpop.f32.mrb[161].mxu1  ;;  %v7332_v7 = vmul.f32 %v9454_v24, %v6993_v2 }
 0x446   : > { %v7719_v47 = vrot.slane %v7711_v55, %v12484_v50  ;;  %v7726_v25 = vrot.slane %v7712_v61, %v12484_v50  ;;  %v7735_v38 = vrot.slane %v7727_v10, %v12484_v50  ;;  %v7742_v11 = vrot.slane %v7728_v45, %v12484_v50  ;;  %v6996_v19 = vpop.f32.mrb[162].mxu1 }
 0x447   : > { %v9196_v46 = vpop.f32.mrb[163].mxu1 }
 0x448   : > { %v8223_v14 = vcombine.low %v7719_v47, %v7726_v25  ;;  %v8706_v43 = vcombine.high %v7719_v47, %v7726_v25  ;;  %v8239_v42 = vcombine.low %v7735_v38, %v7742_v11  ;;  %v8707_v40 = vcombine.high %v7735_v38, %v7742_v11  ;;  %v9458_v47 = vpop.eup %9457 }
 0x449   : > { %v9460_v9 = vpop.eup %9459 }
 0x44a   : > { %v7039_v56 = vpop.f32.mrb[164].mxu0  ;;  %v8230_v36 = vrot.slane %v8223_v14, %v12483_v3  ;;  %v8238_v31 = vrot.slane %v8706_v43, %v12483_v3  ;;  %v8246_v58 = vrot.slane %v8239_v42, %v12483_v3  ;;  %v8254_v30 = vrot.slane %v8707_v40, %v12483_v3 }
 0x44b   : > { %v7333_v49 = vmul.f32 %v9452_v34, %v7039_v56  ;;  %v9201_v16 = vpop.f32.mrb[165].mxu0 }
 0x44c   : > { %v7042_v62 = vpop.f32.mrb[166].mxu0  ;;  %v8255_v54 = vcombine.low %v8230_v36, %v8238_v31  ;;  %v8256_v27 = vcombine.high %v8230_v36, %v8238_v31  ;;  %v8271_v17 = vcombine.low %v8246_v58, %v8254_v30  ;;  %v8272_v29 = vcombine.high %v8246_v58, %v8254_v30  ;;  %v7085_v0 = vpop.f32.mrb[164].mxu1 }
 0x44d   : > { %v7747_v32 = vcombine.low %v7331_v26, %v7333_v49  ;;  %v7748_v15 = vcombine.high %v7331_v26, %v7333_v49  ;;  %v9202_v18 = vpop.f32.mrb[167].mxu0  ;;  %v7334_v8 = vmul.f32 %v9456_v4, %v7085_v0  ;;  %v9207_v52 = vpop.f32.mrb[165].mxu1 }
 0x44e   : > { %v8263_v51 = vrot.slane %v8255_v54, %v12484_v50  ;;  %v8270_v39 = vrot.slane %v8256_v27, %v12484_v50  ;;  %v8279_v63 = vrot.slane %v8271_v17, %v12484_v50  ;;  %v8286_v20 = vrot.slane %v8272_v29, %v12484_v50  ;;  %v7088_v35 = vpop.f32.mrb[166].mxu1  ;;  %v9462_v49 = vpop.eup %9461 }
 0x44f   : > { %v7763_v1 = vcombine.low %v7332_v7, %v7334_v8  ;;  %v7764_v21 = vcombine.high %v7332_v7, %v7334_v8  ;;  %v9208_v23 = vpop.f32.mrb[167].mxu1  ;;  %v7755_v12 = vrot.slane %v7747_v32, %v12483_v3  ;;  %v7762_v33 = vrot.slane %v7748_v15, %v12483_v3  ;;  %v9464_v54 = vpop.eup %9463 }
 0x450   : > { %v8287_v37 = vcombine.low %v8263_v51, %v8279_v63  ;;  %v8288_v41 = vcombine.high %v8263_v51, %v8279_v63  ;;  %v8289_v60 = vcombine.low %v8270_v39, %v8286_v20  ;;  %v8290_v6 = vcombine.high %v8270_v39, %v8286_v20 }
 0x451   : > { %v7771_v22 = vrot.slane %v7763_v1, %v12483_v3  ;;  %v7778_v5 = vrot.slane %v7764_v21, %v12483_v3 }
 0x452   : > { %v7131_v44 = vpop.f32.mrb[168].mxu0  ;;  %8447 = vst [vmem:[%s12039_s17 + $0xa0] sm:$0xff] %v8287_v37  ;;  %8448 = vst [vmem:[%s12039_s17 + $0xa8] sm:$0xff] %v8288_v41 }
 0x453   : > { %v9213_v53 = vpop.f32.mrb[169].mxu0  ;;  %8449 = vst [vmem:[%s12039_s17 + $0xb0] sm:$0xff] %v8289_v60  ;;  %8450 = vst [vmem:[%s12039_s17 + $0xb8] sm:$0xff] %v8290_v6  ;;  %v7779_v61 = vcombine.low %v7755_v12, %v7771_v22  ;;  %v7780_v10 = vcombine.high %v7755_v12, %v7771_v22  ;;  %v7795_v45 = vcombine.low %v7762_v33, %v7778_v5 }
 0x454   : > { %v7134_v55 = vpop.f32.mrb[170].mxu0  ;;  %v7796_v2 = vcombine.high %v7762_v33, %v7778_v5  ;;  %v7177_v13 = vpop.f32.mrb[168].mxu1  ;;  %v7335_v58 = vmul.f32 %v9458_v47, %v7131_v44 }
 0x455   : > { %v9214_v48 = vpop.f32.mrb[171].mxu0  ;;  %v7787_v25 = vrot.slane %v7779_v61, %v12484_v50  ;;  %v7794_v38 = vrot.slane %v7780_v10, %v12484_v50  ;;  %v7803_v11 = vrot.slane %v7795_v45, %v12484_v50  ;;  %v9219_v46 = vpop.f32.mrb[169].mxu1  ;;  %v7336_v39 = vmul.f32 %v9460_v9, %v7177_v13 }
 0x456   : > { %v7810_v19 = vrot.slane %v7796_v2, %v12484_v50  ;;  %v7180_v34 = vpop.f32.mrb[170].mxu1 }
 0x457   : > { %v8291_v14 = vcombine.low %v7787_v25, %v7794_v38  ;;  %v8708_v43 = vcombine.high %v7787_v25, %v7794_v38  ;;  %v9220_v56 = vpop.f32.mrb[171].mxu1 }
 0x458   : > { %v8307_v42 = vcombine.low %v7803_v11, %v7810_v19  ;;  %v8709_v40 = vcombine.high %v7803_v11, %v7810_v19 }
 0x459   : > { %v8298_v16 = vrot.slane %v8291_v14, %v12483_v3  ;;  %v8306_v24 = vrot.slane %v8708_v43, %v12483_v3 }
 0x45a   : > { %v7223_v26 = vpop.f32.mrb[172].mxu0  ;;  %v8314_v57 = vrot.slane %v8307_v42, %v12483_v3  ;;  %v8322_v36 = vrot.slane %v8709_v40, %v12483_v3 }
 0x45b   : > { %v9225_v31 = vpop.f32.mrb[173].mxu0  ;;  %v7337_v30 = vmul.f32 %v9462_v49, %v7223_v26  ;;  %v8323_v4 = vcombine.low %v8298_v16, %v8306_v24  ;;  %v8324_v32 = vcombine.high %v8298_v16, %v8306_v24 }
 0x45c   : > { %v7226_v62 = vpop.f32.mrb[174].mxu0  ;;  %v8339_v15 = vcombine.low %v8314_v57, %v8322_v36  ;;  %v8340_v18 = vcombine.high %v8314_v57, %v8322_v36  ;;  %v7269_v29 = vpop.f32.mrb[172].mxu1 }
 0x45d   : > { %v9226_v59 = vpop.f32.mrb[175].mxu0  ;;  %v7815_v27 = vcombine.low %v7335_v58, %v7337_v30  ;;  %v7816_v17 = vcombine.high %v7335_v58, %v7337_v30  ;;  %v8331_v0 = vrot.slane %v8323_v4, %v12484_v50  ;;  %v8338_v7 = vrot.slane %v8324_v32, %v12484_v50  ;;  %v9231_v51 = vpop.f32.mrb[173].mxu1 }
 0x45e   : > { %v8347_v8 = vrot.slane %v8339_v15, %v12484_v50  ;;  %v8354_v52 = vrot.slane %v8340_v18, %v12484_v50  ;;  %v7338_v63 = vmul.f32 %v9464_v54, %v7269_v29  ;;  %v7272_v20 = vpop.f32.mrb[174].mxu1 }
 0x45f   : > { %v9232_v23 = vpop.f32.mrb[175].mxu1  ;;  %v7823_v60 = vrot.slane %v7815_v27, %v12483_v3  ;;  %v7830_v6 = vrot.slane %v7816_v17, %v12483_v3 }
 0x460   : > { %v8355_v35 = vcombine.low %v8331_v0, %v8347_v8  ;;  %v8356_v28 = vcombine.high %v8331_v0, %v8347_v8  ;;  %v8357_v1 = vcombine.low %v8338_v7, %v8354_v52  ;;  %v8358_v21 = vcombine.high %v8338_v7, %v8354_v52 }
 0x461   : > { %v7831_v37 = vcombine.low %v7336_v39, %v7338_v63  ;;  %v7832_v41 = vcombine.high %v7336_v39, %v7338_v63 }
 0x462   : > { %8451 = vst [vmem:[%s12039_s17 + $0xc0] sm:$0xff] %v8355_v35  ;;  %8452 = vst [vmem:[%s12039_s17 + $0xc8] sm:$0xff] %v8356_v28 }
 0x463   : > { %8453 = vst [vmem:[%s12039_s17 + $0xd0] sm:$0xff] %v8357_v1  ;;  %8454 = vst [vmem:[%s12039_s17 + $0xd8] sm:$0xff] %v8358_v21  ;;  %v7839_v44 = vrot.slane %v7831_v37, %v12483_v3  ;;  %v7846_v12 = vrot.slane %v7832_v41, %v12483_v3 }
 0x465   : > { %v7847_v33 = vcombine.low %v7823_v60, %v7839_v44  ;;  %v7848_v22 = vcombine.high %v7823_v60, %v7839_v44  ;;  %v7863_v5 = vcombine.low %v7830_v6, %v7846_v12  ;;  %v7864_v53 = vcombine.high %v7830_v6, %v7846_v12 }
 0x467   : > { %v7855_v55 = vrot.slane %v7847_v33, %v12484_v50  ;;  %v7862_v61 = vrot.slane %v7848_v22, %v12484_v50  ;;  %v7871_v10 = vrot.slane %v7863_v5, %v12484_v50  ;;  %v7878_v45 = vrot.slane %v7864_v53, %v12484_v50 }
 0x469   : > { %v8359_v2 = vcombine.low %v7855_v55, %v7862_v61  ;;  %v8710_v48 = vcombine.high %v7855_v55, %v7862_v61  ;;  %v8375_v13 = vcombine.low %v7871_v10, %v7878_v45  ;;  %v8711_v47 = vcombine.high %v7871_v10, %v7878_v45 }
 0x46b   : > { %v8366_v25 = vrot.slane %v8359_v2, %v12483_v3  ;;  %v8374_v38 = vrot.slane %v8710_v48, %v12483_v3  ;;  %v8382_v11 = vrot.slane %v8375_v13, %v12483_v3  ;;  %v8390_v19 = vrot.slane %v8711_v47, %v12483_v3 }
 0x46d   : > { %v8391_v46 = vcombine.low %v8366_v25, %v8374_v38  ;;  %v8392_v34 = vcombine.high %v8366_v25, %v8374_v38  ;;  %v8407_v9 = vcombine.low %v8382_v11, %v8390_v19  ;;  %v8408_v14 = vcombine.high %v8382_v11, %v8390_v19 }
 0x46f   : > { %v8399_v43 = vrot.slane %v8391_v46, %v12484_v50  ;;  %v8406_v42 = vrot.slane %v8392_v34, %v12484_v50  ;;  %v8415_v40 = vrot.slane %v8407_v9, %v12484_v50  ;;  %v8422_v3 = vrot.slane %v8408_v14, %v12484_v50 }
 0x471   : > { %v8423_v56 = vcombine.low %v8399_v43, %v8415_v40  ;;  %v8424_v26 = vcombine.high %v8399_v43, %v8415_v40  ;;  %v8425_v49 = vcombine.low %v8406_v42, %v8422_v3  ;;  %v8426_v16 = vcombine.high %v8406_v42, %v8422_v3 }
 0x473   : > { %8455 = vst [vmem:[%s12039_s17 + $0xe0] sm:$0xff] %v8423_v56  ;;  %8456 = vst [vmem:[%s12039_s17 + $0xe8] sm:$0xff] %v8424_v26 }
 0x474   : > { %8457 = vst [vmem:[%s12039_s17 + $0xf0] sm:$0xff] %v8425_v49  ;;  %8458 = vst [vmem:[%s12039_s17 + $0xf8] sm:$0xff] %v8426_v16 }
 0x475   : > { %9536 = shalt.err (!%p9533_p7)
}
 0x476   : > { %s9537_s24 = scalar_lea.hbm %s12186_s4, 4096  ;;  %s9541_s26 = scalar_lea.hbm %s12238_s2, 8192 }
 0x477   : > { %p9538_p9 = scmp.ne.s32.totalorder %s12186_s4, %s9537_s24  ;;  %p9542_p5 = scmp.lt.u32.totalorder %s12186_s4, %s12238_s2 }
 0x478   : > { %p9543_p11 = scmp.lt.u32.totalorder %s9541_s26, %s9537_s24  ;;  %p9545_p4 = scmp.lt.u32.totalorder %s9537_s24, %s12186_s4 }
 0x479   : > { %p9539_p2 = pnand %p9538_p9, %p9715_p12 }
 0x47a   : > { %p9544_p1 = por %p9543_p11, %p9542_p5 }
 0x47b   : > { %p9540_p0 = pneg %p9539_p2 }
 0x47c   : > { %p9546_p6 = por %p9545_p4, %p9544_p1 }
 0x47e   : > { %p9547_p8 = pnand %p9546_p6, %p9540_p0 }
 0x480   : > { %9550 = shalt.err (!%p9547_p8)
}
 0x481   : > { %s9607_s3 = smov 512   ;;  %s9608_s15 = smov 32  }
 0x482   : > { %9239 = dma.vmem_to_hbm [thread:$0]  (%p9715_p12), %s12188_s22, 4096, %s12186_s4, %s8460_s13, %s9607_s3, %s9607_s3, %s9608_s15  }
 0x483 PF: > { %s8489_s17 = sand.u32 1, %s9581_s9   ;;  %p12485_p10 = scmp.ne.s32.totalorder %s12296_s16, 0 }
 0x484   : > { %p12486_p13 = scmp.ge.s32.totalorder %s9593_s12, 2  ;;  %s8490_s27 = scalar_lea.sflag [#allocation4], %s8489_s17 }
 0x486   : > { %p9250_p3 = pnand %p12486_p13, %p12485_p10 }
 0x488   : > { %9576 = dma.done.wait (!%p9250_p3), %s8490_s27, 4096  }
 0x489   : > { %9578 = vsyncadd (!%p9250_p3), %s8490_s27, 4294963200  ;;  %p16_p7 = scmp.ge.s32.totalorder %s9680_s21, 4   ;;  %s12487_s9 = smov %s9585_s10 }
 0x48a   : > { %s12488_s10 = smov %s9589_s11  ;;  %s12489_s11 = smov %s9711_s8 }
 0x48b   : > { %s12490_s12 = smov %s9680_s21  ;;  %18 = sbr.rel (!%p16_p7) target bundleno = 6 (0x6), region = 77 }
 0x492   :  { %8495 = vsyncpa [#allocation3], 1 }
 0x493   :  { %8497 = vsyncpa [#allocation3 + $0x1], 1 }
 0x494   :  { %8498 = vsyncpa [#allocation6], 1 }
 0x495   :  { %8499 = vsyncpa [#allocation4], 1 }
 0x496   :  { %8501 = vsyncpa [#allocation4 + $0x1], 1 }

</bundles_post_ra>
